<compile_context>
chip_gen: v6e
topology: v6e:2x2x1
jax: 0.10.0
libtpu: 0.0.40
codegen_flags: <defaults>
</compile_context>

<pallas_src>
import functools

import jax
import jax.numpy as jnp
from jax.experimental import pallas as pl
from jax.experimental.pallas import tpu as pltpu

EPS = 1e-5
F32 = jnp.float32
BF16 = jnp.bfloat16


# --------------------------------------------------------------------------
# Kernel A: conv1/bn1/relu -> conv2/bn2/relu -> conv3/bn3/relu
#           -> per-batch max over points -> fc1/bn4/relu -> fc2/bn5/relu
# Single grid step; every operand resident in VMEM (all small at these sizes).
# --------------------------------------------------------------------------
def _feature_kernel(x_ref, w1, s1, t1, w2, s2, t2, w3, s3, t3,
                    wf1, s4, t4, wf2, s5, t5, o_ref, *, batch, npts):
    x = x_ref[...]                                                # (B*N, 128) bf16
    h = jnp.dot(x, w1[...], preferred_element_type=F32)
    h = jnp.maximum(h * s1[...] + t1[...], 0.0)                   # (B*N, 256) f32
    h = jnp.dot(h.astype(BF16), w2[...], preferred_element_type=F32)
    h = jnp.maximum(h * s2[...] + t2[...], 0.0)                   # (B*N, 512)
    h = jnp.dot(h.astype(BF16), w3[...], preferred_element_type=F32)
    h = jnp.maximum(h * s3[...] + t3[...], 0.0)                   # (B*N, 1024)

    # Per-batch global max over the point dimension.
    g = jnp.max(h.reshape(batch, npts, 1024), axis=1)             # (B, 1024)

    # MLP head prologue (hoisted out of the fc3 tile loop).
    f1 = jnp.dot(g.astype(BF16), wf1[...], preferred_element_type=F32)
    f1 = jnp.maximum(f1 * s4[...] + t4[...], 0.0)                 # (B, 512)
    f2 = jnp.dot(f1.astype(BF16), wf2[...], preferred_element_type=F32)
    f2 = jnp.maximum(f2 * s5[...] + t5[...], 0.0)                 # (B, 256)
    o_ref[...] = f2


def _features(x_flat, p, *, batch, npts):
    row = lambda v: v.reshape(1, -1)
    full = lambda shp: pl.BlockSpec(shp, lambda i: tuple(0 for _ in shp))
    return pl.pallas_call(
        functools.partial(_feature_kernel, batch=batch, npts=npts),
        out_shape=jax.ShapeDtypeStruct((batch, 256), F32),
        grid_spec=pltpu.PrefetchScalarGridSpec(
            num_scalar_prefetch=0,
            grid=(1,),
            in_specs=[
                full((batch * npts, 128)),
                full((128, 256)), full((1, 256)), full((1, 256)),
                full((256, 512)), full((1, 512)), full((1, 512)),
                full((512, 1024)), full((1, 1024)), full((1, 1024)),
                full((1024, 512)), full((1, 512)), full((1, 512)),
                full((512, 256)), full((1, 256)), full((1, 256)),
            ],
            out_specs=full((batch, 256)),
        ),
        compiler_params=pltpu.CompilerParams(
            dimension_semantics=("arbitrary",)),
    )(x_flat,
      p["w1"], row(p["s1"]), row(p["t1"]),
      p["w2"], row(p["s2"]), row(p["t2"]),
      p["w3"], row(p["s3"]), row(p["t3"]),
      p["wf1"], row(p["s4"]), row(p["t4"]),
      p["wf2"], row(p["s5"]), row(p["t5"]))


# --------------------------------------------------------------------------
# Kernel B: fc3 (+bias +flattened identity), tiled over the 16384-wide output.
# Purely HBM-bound on the bf16 fc3 weight; tile axis is "parallel" so v7x can
# split tiles across both TensorCores.
# --------------------------------------------------------------------------
def _fc3_kernel(f2_ref, wf3_ref, bi3_ref, o_ref):
    f2 = f2_ref[...].astype(BF16)                                 # (B, 256)
    o_ref[...] = (jnp.dot(f2, wf3_ref[...], preferred_element_type=F32)
                  + bi3_ref[...])


def _fc3(f2, wf3, bi3, *, tile_n=4096):
    B = f2.shape[0]
    n_out = wf3.shape[1]            # 16384
    n_tiles = n_out // tile_n
    return pl.pallas_call(
        _fc3_kernel,
        out_shape=jax.ShapeDtypeStruct((B, n_out), F32),
        grid_spec=pltpu.PrefetchScalarGridSpec(
            num_scalar_prefetch=0,
            grid=(n_tiles,),
            in_specs=[
                pl.BlockSpec((B, 256), lambda t: (0, 0)),
                pl.BlockSpec((256, tile_n), lambda t: (0, t)),
                pl.BlockSpec((1, tile_n), lambda t: (0, t)),
            ],
            out_specs=pl.BlockSpec((B, tile_n), lambda t: (0, t)),
        ),
        compiler_params=pltpu.CompilerParams(
            dimension_semantics=("parallel",)),
    )(f2, wf3, bi3)


# --------------------------------------------------------------------------
# Parameter construction (deterministic, synthetic) + BN folding
# --------------------------------------------------------------------------
def _bn_fold(key, c):
    kg, kb, km, kv = jax.random.split(key, 4)
    gamma = 1.0 + 0.05 * jax.random.normal(kg, (c,), F32)
    beta = 0.05 * jax.random.normal(kb, (c,), F32)
    mean = 0.05 * jax.random.normal(km, (c,), F32)
    var = 1.0 + 0.1 * jnp.abs(jax.random.normal(kv, (c,), F32))
    scale = gamma / jnp.sqrt(var + EPS)
    shift = beta - mean * scale
    return scale, shift


def make_params(key):
    ks = jax.random.split(key, 16)
    p = {}
    # Conv1d weights (kernel_size=1, no bias): stored as (C_in, C_out) bf16.
    p["w1"] = (0.02 * jax.random.normal(ks[0], (128, 256), F32)).astype(BF16)
    p["w2"] = (0.02 * jax.random.normal(ks[1], (256, 512), F32)).astype(BF16)
    p["w3"] = (0.02 * jax.random.normal(ks[2], (512, 1024), F32)).astype(BF16)
    # Linear weights: stored as (in, out) bf16; biases f32.
    p["wf1"] = (0.02 * jax.random.normal(ks[3], (1024, 512), F32)).astype(BF16)
    p["bf1"] = 0.02 * jax.random.normal(ks[4], (512,), F32)
    p["wf2"] = (0.02 * jax.random.normal(ks[5], (512, 256), F32)).astype(BF16)
    p["bf2"] = 0.02 * jax.random.normal(ks[6], (256,), F32)
    p["wf3"] = (0.02 * jax.random.normal(ks[7], (256, 128 * 128), F32)).astype(BF16)
    p["bf3"] = 0.02 * jax.random.normal(ks[8], (128 * 128,), F32)
    # BatchNorms (inference mode), folded to f32 scale/shift.
    s1, t1 = _bn_fold(ks[9], 256)
    s2, t2 = _bn_fold(ks[10], 512)
    s3, t3 = _bn_fold(ks[11], 1024)
    s4, t4 = _bn_fold(ks[12], 512)
    s5, t5 = _bn_fold(ks[13], 256)
    p["s1"], p["t1"] = s1, t1
    p["s2"], p["t2"] = s2, t2
    p["s3"], p["t3"] = s3, t3
    # bn4(fc1(x)) = (x@W)*s4 + ((b - mean)*s4 + beta)  -> fold fc bias in.
    p["s4"], p["t4"] = s4, t4 + p["bf1"] * s4
    p["s5"], p["t5"] = s5, t5 + p["bf2"] * s5
    return p


# --------------------------------------------------------------------------
# Forward pass (matches T3_Net.forward, BN in eval mode)
# --------------------------------------------------------------------------
def t3_net_forward(x_ncw, p, *, tile_n=4096):
    # x_ncw: (B, 128, N)  -- PyTorch NCW layout.
    B, C, N = x_ncw.shape
    # Channels-last, batch folded into the matmul M dimension, cast to bf16.
    x_flat = jnp.transpose(x_ncw, (0, 2, 1)).reshape(B * N, C).astype(BF16)

    f2 = _features(x_flat, p, batch=B, npts=N)                    # (B, 256) f32

    iden = jnp.eye(128, dtype=F32).reshape(128 * 128)
    bi3 = (p["bf3"] + iden).reshape(1, -1)                        # (1, 16384) f32

    out = _fc3(f2, p["wf3"], bi3, tile_n=tile_n)                  # (B, 16384) f32
    return out.reshape(B, 128, 128)


# Pure-JAX reference for a correctness check (mirrors the bf16 operand casts,
# accumulates in f32 — same math as the kernels, done by plain XLA).
def t3_net_reference(x_ncw, p):
    B = x_ncw.shape[0]
    x = jnp.transpose(x_ncw, (0, 2, 1)).astype(BF16).astype(F32)

    def mm(a, w):
        return jnp.dot(a.astype(BF16).astype(F32), w.astype(F32))

    h = jnp.maximum(mm(x, p["w1"]) * p["s1"] + p["t1"], 0.0)
    h = jnp.maximum(mm(h, p["w2"]) * p["s2"] + p["t2"], 0.0)
    h = jnp.maximum(mm(h, p["w3"]) * p["s3"] + p["t3"], 0.0)
    g = jnp.max(h, axis=1)
    f1 = jnp.maximum(mm(g, p["wf1"]) * p["s4"] + p["t4"], 0.0)
    f2 = jnp.maximum(mm(f1, p["wf2"]) * p["s5"] + p["t5"], 0.0)
    out = mm(f2, p["wf3"]) + p["bf3"] + jnp.eye(128, dtype=F32).reshape(-1)
    return out.reshape(B, 128, 128)


if __name__ == "__main__":
    key = jax.random.PRNGKey(0)
    kp, kx = jax.random.split(key)
    params = make_params(kp)

    B, N = 2, 16                                  # small batch / point count
    x = jax.random.normal(kx, (B, 128, N), F32)   # PyTorch NCW input

    out = jax.block_until_ready(t3_net_forward(x, params))
    ref = jax.block_until_ready(t3_net_reference(x, params))

    assert out.shape == (B, 128, 128), out.shape
    assert bool(jnp.all(jnp.isfinite(out)))
    assert jnp.allclose(out, ref, rtol=2e-3, atol=2e-3)
    print("KERNEL_OK")
</pallas_src>

<mosaic_0001>
module attributes {stable_mosaic.version = 11 : i64} {
  func.func @_feature_kernel(%arg0: i32, %arg1: memref<32x128xbf16, #tpu.memory_space<vmem>>, %arg2: memref<128x256xbf16, #tpu.memory_space<vmem>>, %arg3: memref<1x256xf32, #tpu.memory_space<vmem>>, %arg4: memref<1x256xf32, #tpu.memory_space<vmem>>, %arg5: memref<256x512xbf16, #tpu.memory_space<vmem>>, %arg6: memref<1x512xf32, #tpu.memory_space<vmem>>, %arg7: memref<1x512xf32, #tpu.memory_space<vmem>>, %arg8: memref<512x1024xbf16, #tpu.memory_space<vmem>>, %arg9: memref<1x1024xf32, #tpu.memory_space<vmem>>, %arg10: memref<1x1024xf32, #tpu.memory_space<vmem>>, %arg11: memref<1024x512xbf16, #tpu.memory_space<vmem>>, %arg12: memref<1x512xf32, #tpu.memory_space<vmem>>, %arg13: memref<1x512xf32, #tpu.memory_space<vmem>>, %arg14: memref<512x256xbf16, #tpu.memory_space<vmem>>, %arg15: memref<1x256xf32, #tpu.memory_space<vmem>>, %arg16: memref<1x256xf32, #tpu.memory_space<vmem>>, %arg17: memref<2x256xf32, #tpu.memory_space<vmem>>) attributes {dimension_semantics = [#tpu.dimension_semantics<arbitrary>], iteration_bounds = array<i64: 1>, scalar_prefetch = 0 : i64, scratch_operands = 0 : i64, tpu.core_type = #tpu.core_type<tc>, window_params = [{pipeline_mode = #tpu.pipeline_mode<synchronous>, transform_indices = @transform_0, window_bounds = array<i64: 32, 128>}, {pipeline_mode = #tpu.pipeline_mode<synchronous>, transform_indices = @transform_1, window_bounds = array<i64: 128, 256>}, {pipeline_mode = #tpu.pipeline_mode<synchronous>, transform_indices = @transform_2, window_bounds = array<i64: 1, 256>}, {pipeline_mode = #tpu.pipeline_mode<synchronous>, transform_indices = @transform_3, window_bounds = array<i64: 1, 256>}, {pipeline_mode = #tpu.pipeline_mode<synchronous>, transform_indices = @transform_4, window_bounds = array<i64: 256, 512>}, {pipeline_mode = #tpu.pipeline_mode<synchronous>, transform_indices = @transform_5, window_bounds = array<i64: 1, 512>}, {pipeline_mode = #tpu.pipeline_mode<synchronous>, transform_indices = @transform_6, window_bounds = array<i64: 1, 512>}, {pipeline_mode = #tpu.pipeline_mode<synchronous>, transform_indices = @transform_7, window_bounds = array<i64: 512, 1024>}, {pipeline_mode = #tpu.pipeline_mode<synchronous>, transform_indices = @transform_8, window_bounds = array<i64: 1, 1024>}, {pipeline_mode = #tpu.pipeline_mode<synchronous>, transform_indices = @transform_9, window_bounds = array<i64: 1, 1024>}, {pipeline_mode = #tpu.pipeline_mode<synchronous>, transform_indices = @transform_10, window_bounds = array<i64: 1024, 512>}, {pipeline_mode = #tpu.pipeline_mode<synchronous>, transform_indices = @transform_11, window_bounds = array<i64: 1, 512>}, {pipeline_mode = #tpu.pipeline_mode<synchronous>, transform_indices = @transform_12, window_bounds = array<i64: 1, 512>}, {pipeline_mode = #tpu.pipeline_mode<synchronous>, transform_indices = @transform_13, window_bounds = array<i64: 512, 256>}, {pipeline_mode = #tpu.pipeline_mode<synchronous>, transform_indices = @transform_14, window_bounds = array<i64: 1, 256>}, {pipeline_mode = #tpu.pipeline_mode<synchronous>, transform_indices = @transform_15, window_bounds = array<i64: 1, 256>}, {pipeline_mode = #tpu.pipeline_mode<synchronous>, transform_indices = @transform_16, window_bounds = array<i64: 2, 256>}]} {
    %c0 = arith.constant 0 : index
    %c0_0 = arith.constant 0 : index
    %0 = vector.load %arg1[%c0, %c0_0] : memref<32x128xbf16, #tpu.memory_space<vmem>>, vector<32x128xbf16>
    %c0_1 = arith.constant 0 : index
    %c0_2 = arith.constant 0 : index
    %1 = vector.load %arg2[%c0_1, %c0_2] : memref<128x256xbf16, #tpu.memory_space<vmem>>, vector<128x256xbf16>
    %cst = arith.constant dense<0.000000e+00> : vector<32x256xf32>
    %2 = tpu.matmul %0, %1, %cst {dimension_numbers = #tpu.dot_dimension_numbers<[1], [0], [0], [1], [0, 0, 1, 1], [], []>} : vector<32x128xbf16>, vector<128x256xbf16>, vector<32x256xf32> -> vector<32x256xf32>
    %c0_3 = arith.constant 0 : index
    %c0_4 = arith.constant 0 : index
    %3 = vector.load %arg3[%c0_3, %c0_4] : memref<1x256xf32, #tpu.memory_space<vmem>>, vector<1x256xf32>
    %4 = vector.broadcast %3 : vector<1x256xf32> to vector<32x256xf32>
    %5 = arith.mulf %2, %4 : vector<32x256xf32>
    %c0_5 = arith.constant 0 : index
    %c0_6 = arith.constant 0 : index
    %6 = vector.load %arg4[%c0_5, %c0_6] : memref<1x256xf32, #tpu.memory_space<vmem>>, vector<1x256xf32>
    %7 = vector.broadcast %6 : vector<1x256xf32> to vector<32x256xf32>
    %8 = arith.addf %5, %7 : vector<32x256xf32>
    %cst_7 = arith.constant 0.000000e+00 : f32
    %9 = vector.broadcast %cst_7 : f32 to vector<32x256xf32>
    %10 = arith.maximumf %8, %9 : vector<32x256xf32>
    %11 = arith.truncf %10 : vector<32x256xf32> to vector<32x256xbf16>
    %c0_8 = arith.constant 0 : index
    %c0_9 = arith.constant 0 : index
    %12 = vector.load %arg5[%c0_8, %c0_9] : memref<256x512xbf16, #tpu.memory_space<vmem>>, vector<256x512xbf16>
    %cst_10 = arith.constant dense<0.000000e+00> : vector<32x512xf32>
    %13 = tpu.matmul %11, %12, %cst_10 {dimension_numbers = #tpu.dot_dimension_numbers<[1], [0], [0], [1], [0, 0, 1, 1], [], []>} : vector<32x256xbf16>, vector<256x512xbf16>, vector<32x512xf32> -> vector<32x512xf32>
    %c0_11 = arith.constant 0 : index
    %c0_12 = arith.constant 0 : index
    %14 = vector.load %arg6[%c0_11, %c0_12] : memref<1x512xf32, #tpu.memory_space<vmem>>, vector<1x512xf32>
    %15 = vector.broadcast %14 : vector<1x512xf32> to vector<32x512xf32>
    %16 = arith.mulf %13, %15 : vector<32x512xf32>
    %c0_13 = arith.constant 0 : index
    %c0_14 = arith.constant 0 : index
    %17 = vector.load %arg7[%c0_13, %c0_14] : memref<1x512xf32, #tpu.memory_space<vmem>>, vector<1x512xf32>
    %18 = vector.broadcast %17 : vector<1x512xf32> to vector<32x512xf32>
    %19 = arith.addf %16, %18 : vector<32x512xf32>
    %cst_15 = arith.constant 0.000000e+00 : f32
    %20 = vector.broadcast %cst_15 : f32 to vector<32x512xf32>
    %21 = arith.maximumf %19, %20 : vector<32x512xf32>
    %22 = arith.truncf %21 : vector<32x512xf32> to vector<32x512xbf16>
    %c0_16 = arith.constant 0 : index
    %c0_17 = arith.constant 0 : index
    %23 = vector.load %arg8[%c0_16, %c0_17] : memref<512x1024xbf16, #tpu.memory_space<vmem>>, vector<512x1024xbf16>
    %cst_18 = arith.constant dense<0.000000e+00> : vector<32x1024xf32>
    %24 = tpu.matmul %22, %23, %cst_18 {dimension_numbers = #tpu.dot_dimension_numbers<[1], [0], [0], [1], [0, 0, 1, 1], [], []>} : vector<32x512xbf16>, vector<512x1024xbf16>, vector<32x1024xf32> -> vector<32x1024xf32>
    %c0_19 = arith.constant 0 : index
    %c0_20 = arith.constant 0 : index
    %25 = vector.load %arg9[%c0_19, %c0_20] : memref<1x1024xf32, #tpu.memory_space<vmem>>, vector<1x1024xf32>
    %26 = vector.broadcast %25 : vector<1x1024xf32> to vector<32x1024xf32>
    %27 = arith.mulf %24, %26 : vector<32x1024xf32>
    %c0_21 = arith.constant 0 : index
    %c0_22 = arith.constant 0 : index
    %28 = vector.load %arg10[%c0_21, %c0_22] : memref<1x1024xf32, #tpu.memory_space<vmem>>, vector<1x1024xf32>
    %29 = vector.broadcast %28 : vector<1x1024xf32> to vector<32x1024xf32>
    %30 = arith.addf %27, %29 : vector<32x1024xf32>
    %cst_23 = arith.constant 0.000000e+00 : f32
    %31 = vector.broadcast %cst_23 : f32 to vector<32x1024xf32>
    %32 = arith.maximumf %30, %31 : vector<32x1024xf32>
    %33 = vector.shape_cast %32 : vector<32x1024xf32> to vector<2x16x1024xf32>
    %cst_24 = arith.constant dense<0xFF800000> : vector<2x1024xf32>
    %34 = vector.multi_reduction <maximumf>, %33, %cst_24 [1] : vector<2x16x1024xf32> to vector<2x1024xf32>
    %35 = arith.truncf %34 : vector<2x1024xf32> to vector<2x1024xbf16>
    %c0_25 = arith.constant 0 : index
    %c0_26 = arith.constant 0 : index
    %36 = vector.load %arg11[%c0_25, %c0_26] : memref<1024x512xbf16, #tpu.memory_space<vmem>>, vector<1024x512xbf16>
    %cst_27 = arith.constant dense<0.000000e+00> : vector<2x512xf32>
    %37 = tpu.matmul %35, %36, %cst_27 {dimension_numbers = #tpu.dot_dimension_numbers<[1], [0], [0], [1], [0, 0, 1, 1], [], []>} : vector<2x1024xbf16>, vector<1024x512xbf16>, vector<2x512xf32> -> vector<2x512xf32>
    %c0_28 = arith.constant 0 : index
    %c0_29 = arith.constant 0 : index
    %38 = vector.load %arg12[%c0_28, %c0_29] : memref<1x512xf32, #tpu.memory_space<vmem>>, vector<1x512xf32>
    %39 = vector.broadcast %38 : vector<1x512xf32> to vector<2x512xf32>
    %40 = arith.mulf %37, %39 : vector<2x512xf32>
    %c0_30 = arith.constant 0 : index
    %c0_31 = arith.constant 0 : index
    %41 = vector.load %arg13[%c0_30, %c0_31] : memref<1x512xf32, #tpu.memory_space<vmem>>, vector<1x512xf32>
    %42 = vector.broadcast %41 : vector<1x512xf32> to vector<2x512xf32>
    %43 = arith.addf %40, %42 : vector<2x512xf32>
    %cst_32 = arith.constant 0.000000e+00 : f32
    %44 = vector.broadcast %cst_32 : f32 to vector<2x512xf32>
    %45 = arith.maximumf %43, %44 : vector<2x512xf32>
    %46 = arith.truncf %45 : vector<2x512xf32> to vector<2x512xbf16>
    %c0_33 = arith.constant 0 : index
    %c0_34 = arith.constant 0 : index
    %47 = vector.load %arg14[%c0_33, %c0_34] : memref<512x256xbf16, #tpu.memory_space<vmem>>, vector<512x256xbf16>
    %cst_35 = arith.constant dense<0.000000e+00> : vector<2x256xf32>
    %48 = tpu.matmul %46, %47, %cst_35 {dimension_numbers = #tpu.dot_dimension_numbers<[1], [0], [0], [1], [0, 0, 1, 1], [], []>} : vector<2x512xbf16>, vector<512x256xbf16>, vector<2x256xf32> -> vector<2x256xf32>
    %c0_36 = arith.constant 0 : index
    %c0_37 = arith.constant 0 : index
    %49 = vector.load %arg15[%c0_36, %c0_37] : memref<1x256xf32, #tpu.memory_space<vmem>>, vector<1x256xf32>
    %50 = vector.broadcast %49 : vector<1x256xf32> to vector<2x256xf32>
    %51 = arith.mulf %48, %50 : vector<2x256xf32>
    %c0_38 = arith.constant 0 : index
    %c0_39 = arith.constant 0 : index
    %52 = vector.load %arg16[%c0_38, %c0_39] : memref<1x256xf32, #tpu.memory_space<vmem>>, vector<1x256xf32>
    %53 = vector.broadcast %52 : vector<1x256xf32> to vector<2x256xf32>
    %54 = arith.addf %51, %53 : vector<2x256xf32>
    %cst_40 = arith.constant 0.000000e+00 : f32
    %55 = vector.broadcast %cst_40 : f32 to vector<2x256xf32>
    %56 = arith.maximumf %54, %55 : vector<2x256xf32>
    %c0_41 = arith.constant 0 : index
    %c0_42 = arith.constant 0 : index
    %57 = vector.load %arg17[%c0_41, %c0_42] : memref<2x256xf32, #tpu.memory_space<vmem>>, vector<2x256xf32>
    tpu.vector_store %arg17[%c0_41, %c0_42], %56 {strides = array<i32>} : memref<2x256xf32, #tpu.memory_space<vmem>>, vector<2x256xf32>,
    return
  }
  func.func @transform_0(%arg0: i32) -> (i32, i32) {
    %c0_i32 = arith.constant 0 : i32
    %c0_i32_0 = arith.constant 0 : i32
    %c0_i32_1 = arith.constant 0 : i32
    return %c0_i32, %c0_i32_0 : i32, i32
  }
  func.func @transform_1(%arg0: i32) -> (i32, i32) {
    %c0_i32 = arith.constant 0 : i32
    %c0_i32_0 = arith.constant 0 : i32
    %c0_i32_1 = arith.constant 0 : i32
    return %c0_i32, %c0_i32_0 : i32, i32
  }
  func.func @transform_2(%arg0: i32) -> (i32, i32) {
    %c0_i32 = arith.constant 0 : i32
    %c0_i32_0 = arith.constant 0 : i32
    %c0_i32_1 = arith.constant 0 : i32
    return %c0_i32, %c0_i32_0 : i32, i32
  }
  func.func @transform_3(%arg0: i32) -> (i32, i32) {
    %c0_i32 = arith.constant 0 : i32
    %c0_i32_0 = arith.constant 0 : i32
    %c0_i32_1 = arith.constant 0 : i32
    return %c0_i32, %c0_i32_0 : i32, i32
  }
  func.func @transform_4(%arg0: i32) -> (i32, i32) {
    %c0_i32 = arith.constant 0 : i32
    %c0_i32_0 = arith.constant 0 : i32
    %c0_i32_1 = arith.constant 0 : i32
    return %c0_i32, %c0_i32_0 : i32, i32
  }
  func.func @transform_5(%arg0: i32) -> (i32, i32) {
    %c0_i32 = arith.constant 0 : i32
    %c0_i32_0 = arith.constant 0 : i32
    %c0_i32_1 = arith.constant 0 : i32
    return %c0_i32, %c0_i32_0 : i32, i32
  }
  func.func @transform_6(%arg0: i32) -> (i32, i32) {
    %c0_i32 = arith.constant 0 : i32
    %c0_i32_0 = arith.constant 0 : i32
    %c0_i32_1 = arith.constant 0 : i32
    return %c0_i32, %c0_i32_0 : i32, i32
  }
  func.func @transform_7(%arg0: i32) -> (i32, i32) {
    %c0_i32 = arith.constant 0 : i32
    %c0_i32_0 = arith.constant 0 : i32
    %c0_i32_1 = arith.constant 0 : i32
    return %c0_i32, %c0_i32_0 : i32, i32
  }
  func.func @transform_8(%arg0: i32) -> (i32, i32) {
    %c0_i32 = arith.constant 0 : i32
    %c0_i32_0 = arith.constant 0 : i32
    %c0_i32_1 = arith.constant 0 : i32
    return %c0_i32, %c0_i32_0 : i32, i32
  }
  func.func @transform_9(%arg0: i32) -> (i32, i32) {
    %c0_i32 = arith.constant 0 : i32
    %c0_i32_0 = arith.constant 0 : i32
    %c0_i32_1 = arith.constant 0 : i32
    return %c0_i32, %c0_i32_0 : i32, i32
  }
  func.func @transform_10(%arg0: i32) -> (i32, i32) {
    %c0_i32 = arith.constant 0 : i32
    %c0_i32_0 = arith.constant 0 : i32
    %c0_i32_1 = arith.constant 0 : i32
    return %c0_i32, %c0_i32_0 : i32, i32
  }
  func.func @transform_11(%arg0: i32) -> (i32, i32) {
    %c0_i32 = arith.constant 0 : i32
    %c0_i32_0 = arith.constant 0 : i32
    %c0_i32_1 = arith.constant 0 : i32
    return %c0_i32, %c0_i32_0 : i32, i32
  }
  func.func @transform_12(%arg0: i32) -> (i32, i32) {
    %c0_i32 = arith.constant 0 : i32
    %c0_i32_0 = arith.constant 0 : i32
    %c0_i32_1 = arith.constant 0 : i32
    return %c0_i32, %c0_i32_0 : i32, i32
  }
  func.func @transform_13(%arg0: i32) -> (i32, i32) {
    %c0_i32 = arith.constant 0 : i32
    %c0_i32_0 = arith.constant 0 : i32
    %c0_i32_1 = arith.constant 0 : i32
    return %c0_i32, %c0_i32_0 : i32, i32
  }
  func.func @transform_14(%arg0: i32) -> (i32, i32) {
    %c0_i32 = arith.constant 0 : i32
    %c0_i32_0 = arith.constant 0 : i32
    %c0_i32_1 = arith.constant 0 : i32
    return %c0_i32, %c0_i32_0 : i32, i32
  }
  func.func @transform_15(%arg0: i32) -> (i32, i32) {
    %c0_i32 = arith.constant 0 : i32
    %c0_i32_0 = arith.constant 0 : i32
    %c0_i32_1 = arith.constant 0 : i32
    return %c0_i32, %c0_i32_0 : i32, i32
  }
  func.func @transform_16(%arg0: i32) -> (i32, i32) {
    %c0_i32 = arith.constant 0 : i32
    %c0_i32_0 = arith.constant 0 : i32
    %c0_i32_1 = arith.constant 0 : i32
    return %c0_i32, %c0_i32_0 : i32, i32
  }
}

</mosaic_0001>

<bundles_post_ra>
// kernel: tpu_custom_call.1
= control target key start
LH: loop header
LB: loop body
LE: loop exit
PB: predicated region body
PF: predicated region fallthrough
CT: control target
= control target key end

     0   :  { %s7833_s0 = inlined_call_operand.hbm [shape: bf16[32,128], index: 0, kind: input, shape index: {}]   ;;  %s7834_s1 = inlined_call_operand.hbm [shape: bf16[128,256], index: 1, kind: input, shape index: {}]   ;;  %s7835_s2 = inlined_call_operand.hbm [shape: f32[1,256], index: 2, kind: input, shape index: {}]   ;;  %s7836_s3 = inlined_call_operand.hbm [shape: f32[1,256], index: 3, kind: input, shape index: {}]   ;;  %s7837_s4 = inlined_call_operand.hbm [shape: bf16[256,512], index: 4, kind: input, shape index: {}]   ;;  %s7838_s5 = inlined_call_operand.hbm [shape: f32[1,512], index: 5, kind: input, shape index: {}]   ;;  %s7839_s6 = inlined_call_operand.hbm [shape: f32[1,512], index: 6, kind: input, shape index: {}]   ;;  %s7840_s7 = inlined_call_operand.hbm [shape: bf16[512,1024], index: 7, kind: input, shape index: {}]   ;;  %s7841_s8 = inlined_call_operand.vmem [shape: f32[1,1024], index: 8, kind: input, shape index: {}]   ;;  %s7842_s9 = inlined_call_operand.vmem [shape: f32[1,1024], index: 9, kind: input, shape index: {}]   ;;  %s7843_s10 = inlined_call_operand.hbm [shape: bf16[1024,512], index: 10, kind: input, shape index: {}]   ;;  %s7844_s11 = inlined_call_operand.vmem [shape: f32[1,512], index: 11, kind: input, shape index: {}]   ;;  %s7845_s12 = inlined_call_operand.hbm [shape: f32[1,512], index: 12, kind: input, shape index: {}]   ;;  %s7846_s13 = inlined_call_operand.hbm [shape: bf16[512,256], index: 13, kind: input, shape index: {}]   ;;  %s7847_s14 = inlined_call_operand.vmem [shape: f32[1,256], index: 14, kind: input, shape index: {}]   ;;  %s7848_s15 = inlined_call_operand.vmem [shape: f32[1,256], index: 15, kind: input, shape index: {}]   ;;  %s7849_s16 = inlined_call_operand.hbm [shape: f32[2,256], index: 16, kind: output, shape index: {}]  }
   0x1   :  { %7850 = sst [smem:[#allocation28_spill]] %s7833_s0 }
   0x2   :  { %21 = vsyncpa [#allocation3], 0 }
   0x3   :  { %22 = vsyncpa [#allocation6], 0 }
   0x4   :  { %23 = vsyncpa [#allocation9], 0 }
   0x5   :  { %24 = vsyncpa [#allocation12], 0 }
   0x6   :  { %25 = vsyncpa [#allocation15], 0 }
   0x7   :  { %26 = vsyncpa [#allocation18], 0 }
   0x8   :  { %27 = vsyncpa [#allocation4], 0  ;;  %s7316_s21 = smov [#allocation5]  }
   0x9   :  { %s45_s22 = sshll.u32 %s7316_s21, 4  ;;  %s46_s22 = int_to_ptr.vmem [resolvable:$true] %s45_s22 }
   0xa   :  { %s7070_s23 = scalar_lea.vmem %s46_s22, 2048  ;;  %p7075_p1 = scmp.lt.s32.totalorder %s46_s22, %s46_s22 }
   0xb   :  { %p7071_p0 = scmp.ne.s32.totalorder %s46_s22, %s7070_s23  ;;  %p7076_p2 = scmp.lt.s32.totalorder %s7070_s23, %s7070_s23 }
   0xd   :  { %p7077_p3 = por %p7076_p2, %p7075_p1 }
   0xf   :  { %p7078_p4 = pnand %p7077_p3, %p7071_p0 }
  0x11   :  { %7081 = shalt.err (!%p7078_p4)
}
  0x12   :  { %s7317_s24 = smov 128   ;;  %s7318_s25 = smov 8  }
  0x13   :  { %51 = dma.hbm_to_vmem [thread:$0]  %s7834_s1, 2048, %s46_s22, [#allocation6], %s7317_s24, %s7317_s24, %s7318_s25  }
  0x14   :  { %s7319_s28 = smov [#allocation8]   ;;  %s7320_s30 = smov [#allocation11]  }
  0x15   :  { %s68_s29 = sshll.u32 %s7319_s28, 4  ;;  %s90_s0 = sshll.u32 %s7320_s30, 4  ;;  %s69_s29 = int_to_ptr.vmem [resolvable:$true] %s68_s29  ;;  %s91_s0 = int_to_ptr.vmem [resolvable:$true] %s90_s0 }
  0x16   :  { %s7090_s17 = scalar_lea.vmem %s69_s29, 32  ;;  %p7095_p6 = scmp.lt.s32.totalorder %s69_s29, %s69_s29 }
  0x17   :  { %p7091_p5 = scmp.ne.s32.totalorder %s69_s29, %s7090_s17  ;;  %p7096_p7 = scmp.lt.s32.totalorder %s7090_s17, %s7090_s17 }
  0x19   :  { %p7097_p8 = por %p7096_p7, %p7095_p6 }
  0x1b   :  { %p7098_p9 = pnand %p7097_p8, %p7091_p5 }
  0x1d   :  { %7101 = shalt.err (!%p7098_p9)
}
  0x1e   :  { %71 = dma.hbm_to_vmem [thread:$0]  %s7836_s3, 32, %s69_s29, [#allocation9]  }
  0x1f   :  { %s7110_s20 = scalar_lea.vmem %s91_s0, 64  ;;  %p7115_p11 = scmp.lt.s32.totalorder %s91_s0, %s91_s0 }
  0x20   :  { %p7111_p10 = scmp.ne.s32.totalorder %s91_s0, %s7110_s20  ;;  %p7116_p12 = scmp.lt.s32.totalorder %s7110_s20, %s7110_s20 }
  0x22   :  { %p7117_p13 = por %p7116_p12, %p7115_p11 }
  0x24   :  { %p7118_p0 = pnand %p7117_p13, %p7111_p10 }
  0x26   :  { %7121 = shalt.err (!%p7118_p0)
}
  0x27   :  { %93 = dma.hbm_to_vmem [thread:$0]  %s7838_s5, 64, %s91_s0, [#allocation12]  }
  0x28   :  { %s7321_s22 = smov [#allocation14]  }
  0x29   :  { %s109_s23 = sshll.u32 %s7321_s22, 4  ;;  %s110_s23 = int_to_ptr.vmem [resolvable:$true] %s109_s23 }
  0x2a   :  { %s7130_s26 = scalar_lea.vmem %s110_s23, 32768  ;;  %p7135_p2 = scmp.lt.s32.totalorder %s110_s23, %s110_s23 }
  0x2b   :  { %p7131_p1 = scmp.ne.s32.totalorder %s110_s23, %s7130_s26  ;;  %p7136_p3 = scmp.lt.s32.totalorder %s7130_s26, %s7130_s26 }
  0x2d   :  { %p7137_p4 = por %p7136_p3, %p7135_p2 }
  0x2f   :  { %p7138_p5 = pnand %p7137_p4, %p7131_p1 }
  0x31   :  { %7141 = shalt.err (!%p7138_p5)
}
  0x32   :  { %s7322_s3 = smov 512   ;;  %s7323_s27 = smov 32  }
  0x33   :  { %115 = dma.hbm_to_vmem [thread:$0]  %s7840_s7, 32768, %s110_s23, [#allocation15], %s7322_s3, %s7322_s3, %s7323_s27  }
  0x34   :  { %s7324_s30 = smov [#allocation17]   ;;  %s7325_s18 = smov [#allocation2]  }
  0x35   :  { %s140_s17 = sshll.u32 %s7324_s30, 4  ;;  %s33_s5 = sshll.u32 %s7325_s18, 4  ;;  %s141_s17 = int_to_ptr.vmem [resolvable:$true] %s140_s17  ;;  %s34_s5 = int_to_ptr.vmem [resolvable:$true] %s33_s5 }
  0x36   :  { %s7150_s0 = scalar_lea.vmem %s141_s17, 64  ;;  %p7155_p7 = scmp.lt.s32.totalorder %s141_s17, %s141_s17 }
  0x37   :  { %p7151_p6 = scmp.ne.s32.totalorder %s141_s17, %s7150_s0  ;;  %p7156_p8 = scmp.lt.s32.totalorder %s7150_s0, %s7150_s0 }
  0x39   :  { %p7157_p9 = por %p7156_p8, %p7155_p7 }
  0x3b   :  { %p7158_p10 = pnand %p7157_p9, %p7151_p6 }
  0x3d   :  { %7161 = shalt.err (!%p7158_p10)
}
  0x3e   :  { %143 = dma.hbm_to_vmem [thread:$0]  %s7845_s12, 64, %s141_s17, [#allocation18]  }
  0x3f   :  { %s7170_s1 = scalar_lea.vmem %s34_s5, 256  ;;  %p7175_p12 = scmp.lt.s32.totalorder %s34_s5, %s34_s5 }
  0x40   :  { %p7171_p11 = scmp.ne.s32.totalorder %s34_s5, %s7170_s1  ;;  %p7176_p13 = scmp.lt.s32.totalorder %s7170_s1, %s7170_s1 }
  0x42   :  { %p7177_p0 = por %p7176_p13, %p7175_p12 }
  0x44   :  { %p7178_p1 = pnand %p7177_p0, %p7171_p11 }
  0x46   :  { %7181 = shalt.err (!%p7178_p1)
}
  0x47   :  { %s7326_s7 = smov 64   ;;  %s7327_s21 = smov 4  }
  0x48   :  { %s7851_s26 = sld [smem:[#allocation28_spill]]  ;;  %s7328_s3 = smov [#allocation7]  }
  0x49   :  { %s58_s27 = sshll.u32 %s7328_s3, 4  ;;  %s7329_s28 = smov [#allocation10]   ;;  %s59_s27 = int_to_ptr.vmem [resolvable:$true] %s58_s27 }
  0x4a   :  { %s77_s29 = sshll.u32 %s7329_s28, 4  ;;  %s7190_s12 = scalar_lea.vmem %s59_s27, 32  ;;  %s78_s29 = int_to_ptr.vmem [resolvable:$true] %s77_s29 }
  0x4b   :  { %p7191_p2 = scmp.ne.s32.totalorder %s59_s27, %s7190_s12  ;;  %p7195_p3 = scmp.lt.s32.totalorder %s59_s27, %s59_s27 }
  0x4c   :  { %p7196_p4 = scmp.lt.s32.totalorder %s7190_s12, %s7190_s12 }
  0x4e   :  { %39 = dma.hbm_to_vmem [thread:$0]  %s7851_s26, 256, %s34_s5, [#allocation3], %s7326_s7, %s7326_s7, %s7327_s21  }
  0x4f   :  { %p7197_p5 = por %p7196_p4, %p7195_p3 }
  0x51   :  { %p7198_p6 = pnand %p7197_p5, %p7191_p2 }
  0x53   :  { %7201 = shalt.err (!%p7198_p6)
}
  0x54   :  { %61 = dma.hbm_to_vmem [thread:$0]  %s7835_s2, 32, %s59_s27, [#allocation6]  }
  0x55   :  { %s7210_s18 = scalar_lea.vmem %s78_s29, 8192  ;;  %p7215_p8 = scmp.lt.s32.totalorder %s78_s29, %s78_s29 }
  0x56   :  { %p7211_p7 = scmp.ne.s32.totalorder %s78_s29, %s7210_s18  ;;  %p7216_p9 = scmp.lt.s32.totalorder %s7210_s18, %s7210_s18 }
  0x58   :  { %p7217_p10 = por %p7216_p9, %p7215_p8 }
  0x5a   :  { %p7218_p11 = pnand %p7217_p10, %p7211_p7 }
  0x5c   :  { %7221 = shalt.err (!%p7218_p11)
}
  0x5d   :  { %s7330_s5 = smov 256   ;;  %s7331_s0 = smov 16  }
  0x5e   :  { %83 = dma.hbm_to_vmem [thread:$0]  %s7837_s4, 8192, %s78_s29, [#allocation9], %s7330_s5, %s7330_s5, %s7331_s0  }
  0x5f   :  { %s7332_s1 = smov [#allocation13]   ;;  %s7333_s21 = smov [#allocation16]  }
  0x60   :  { %s100_s7 = sshll.u32 %s7332_s1, 4  ;;  %s125_s22 = sshll.u32 %s7333_s21, 4  ;;  %s101_s7 = int_to_ptr.vmem [resolvable:$true] %s100_s7  ;;  %s126_s22 = int_to_ptr.vmem [resolvable:$true] %s125_s22 }
  0x61   :  { %s7230_s2 = scalar_lea.vmem %s101_s7, 64  ;;  %p7235_p13 = scmp.lt.s32.totalorder %s101_s7, %s101_s7 }
  0x62   :  { %p7231_p12 = scmp.ne.s32.totalorder %s101_s7, %s7230_s2  ;;  %p7236_p0 = scmp.lt.s32.totalorder %s7230_s2, %s7230_s2 }
  0x64   :  { %p7237_p1 = por %p7236_p0, %p7235_p13 }
  0x66   :  { %p7238_p2 = pnand %p7237_p1, %p7231_p12 }
  0x68   :  { %7241 = shalt.err (!%p7238_p2)
}
  0x69   :  { %103 = dma.hbm_to_vmem [thread:$0]  %s7839_s6, 64, %s101_s7, [#allocation12]  }
  0x6a   :  { %s7250_s3 = scalar_lea.vmem %s126_s22, 32768  ;;  %p7255_p4 = scmp.lt.s32.totalorder %s126_s22, %s126_s22 }
  0x6b   :  { %p7251_p3 = scmp.ne.s32.totalorder %s126_s22, %s7250_s3  ;;  %p7256_p5 = scmp.lt.s32.totalorder %s7250_s3, %s7250_s3 }
  0x6d   :  { %p7257_p6 = por %p7256_p5, %p7255_p4 }
  0x6f   :  { %p7258_p7 = pnand %p7257_p6, %p7251_p3 }
  0x71   :  { %7261 = shalt.err (!%p7258_p7)
}
  0x72   :  { %131 = dma.hbm_to_vmem [thread:$0]  %s7843_s10, 32768, %s126_s22, [#allocation15], %s7330_s5, %s7330_s5, %s7331_s0  }
  0x73   :  { %s7334_s28 = smov [#allocation19]  }
  0x74   :  { %s149_s29 = sshll.u32 %s7334_s28, 4  ;;  %s150_s29 = int_to_ptr.vmem [resolvable:$true] %s149_s29 }
  0x75   :  { %s7270_s12 = scalar_lea.vmem %s150_s29, 8192  ;;  %p7275_p9 = scmp.lt.s32.totalorder %s150_s29, %s150_s29 }
  0x76   :  { %p7271_p8 = scmp.ne.s32.totalorder %s150_s29, %s7270_s12  ;;  %p7276_p10 = scmp.lt.s32.totalorder %s7270_s12, %s7270_s12 }
  0x78   :  { %p7277_p11 = por %p7276_p10, %p7275_p9 }
  0x7a   :  { %p7278_p12 = pnand %p7277_p11, %p7271_p8 }
  0x7c   :  { %7281 = shalt.err (!%p7278_p12)
}
  0x7d   :  { %155 = dma.hbm_to_vmem [thread:$0]  %s7846_s13, 8192, %s150_s29, [#allocation18], %s7317_s24, %s7317_s24, %s7318_s25  }
  0x7e   :  { %7302 = dma.done.wait [#allocation3], 256  }
  0x7f   :  { %7303 = vsyncadd [#allocation3], 4294967040 }
  0x80   :  { %7304 = dma.done.wait [#allocation6], 2080  }
  0x81   :  { %7305 = vsyncadd [#allocation6], 4294965216 }
  0x82   :  { %7306 = dma.done.wait [#allocation9], 8224  }
  0x83   :  { %7307 = vsyncadd [#allocation9], 4294959072 }
  0x84   :  { %7308 = dma.done.wait [#allocation12], 128  }
  0x85   :  { %7309 = vsyncadd [#allocation12], 4294967168 }
  0x86   :  { %7310 = dma.done.wait [#allocation15], 65536  }
  0x87   :  { %7311 = vsyncadd [#allocation15], 4294901760 }
  0x88   :  { %7312 = dma.done.wait [#allocation18], 8256  }
  0x89   :  { %7313 = vsyncadd [#allocation18], 4294959040  ;;  %v7335_v0 = vmov 0   ;;  %v6458_v1 = vld [vmem:[#allocation5 + $0x74] ss:$8 sps:$4 sm:$0xff]   ;;  %vm3557_vm0 = vcmask 1041409  }
  0x8a   :  { %338 = vmatprep.mubr.bf16.mxu0 %v7335_v0  ;;  %v6460_v2 = vld [vmem:[#allocation5 + $0x70] ss:$8 sps:$4 sm:$0xff]   ;;  %306 = vmatprep.subr.bf16.mxu0 %v6458_v1  ;;  %v6461_v3 = vld [vmem:[#allocation5 + $0x64] ss:$8 sps:$4 sm:$0xff]   ;;  %v6463_v4 = vld [vmem:[#allocation5 + $0x60] ss:$8 sps:$4 sm:$0xff]  }
  0x8b   :  { %307 = vmatpush1.bf16.msra.mxu0 %v6460_v2  ;;  %v6464_v5 = vld [vmem:[#allocation5 + $0x54] ss:$8 sps:$4 sm:$0xff]   ;;  %v6466_v6 = vld [vmem:[#allocation5 + $0x50] ss:$8 sps:$4 sm:$0xff]   ;;  %v6467_v7 = vld [vmem:[#allocation5 + $0x44] ss:$8 sps:$4 sm:$0xff]  }
  0x8c   :  { %308 = vmatprep.subr.bf16.mxu0 %v6461_v3  ;;  %v6469_v8 = vld [vmem:[#allocation5 + $0x40] ss:$8 sps:$4 sm:$0xff]   ;;  %v6470_v9 = vld [vmem:[#allocation5 + $0x34] ss:$8 sps:$4 sm:$0xff]   ;;  %v6472_v11 = vld [vmem:[#allocation5 + $0x30] ss:$8 sps:$4 sm:$0xff]  }
  0x8d   :  { %v6484_v10 = vld [vmem:[#allocation10 + $0xe4] ss:$16 sps:$4 sm:$0xff]   ;;  %v6473_v12 = vld [vmem:[#allocation5 + $0x24] ss:$8 sps:$4 sm:$0xff]   ;;  %v6476_v18 = vld [vmem:[#allocation5 + $0x14] ss:$8 sps:$4 sm:$0xff]  }
  0x8e   :  { %795 = vmatprep.subr.bf16.mxu1 %v6484_v10  ;;  %v6489_v13 = vld [vmem:[#allocation10 + $0xe0] ss:$16 sps:$4 sm:$0xff]   ;;  %v6490_v14 = vld [vmem:[#allocation10 + $0xc4] ss:$16 sps:$4 sm:$0xff]   ;;  %v6488_v26 = vld [vmem:[#allocation10 + $0xec] ss:$16 sps:$4 sm:$0xff]  }
  0x8f   :  { %309 = vmatpush1.bf16.msra.mxu0 %v6463_v4  ;;  %796 = vmatpush1.bf16.msra.mxu1 %v6489_v13  ;;  %v6495_v15 = vld [vmem:[#allocation10 + $0xc0] ss:$16 sps:$4 sm:$0xff]   ;;  %v6496_v16 = vld [vmem:[#allocation10 + $0xa4] ss:$16 sps:$4 sm:$0xff]   ;;  %v6486_v30 = vld [vmem:[#allocation10 + $0xe8] ss:$16 sps:$4 sm:$0xff]  }
  0x90   :  { %310 = vmatprep.subr.bf16.mxu0 %v6464_v5  ;;  %797 = vmatprep.subr.bf16.mxu1 %v6490_v14  ;;  %v6475_v17 = vld [vmem:[#allocation5 + $0x20] ss:$8 sps:$4 sm:$0xff]   ;;  %v6501_v19 = vld [vmem:[#allocation10 + $0xa0] ss:$16 sps:$4 sm:$0xff]   ;;  %v6478_v21 = vld [vmem:[#allocation5 + $0x10] ss:$8 sps:$4 sm:$0xff]  }
  0x91   :  { %v6502_v20 = vld [vmem:[#allocation10 + $0x84] ss:$16 sps:$4 sm:$0xff]   ;;  %v6479_v22 = vld [vmem:[#allocation5 + $0x4] ss:$8 sps:$4 sm:$0xff]   ;;  %v6482_v28 = vld [vmem:[#allocation2] sm:$0xff]  }
  0x92   :  { %v6507_v23 = vld [vmem:[#allocation10 + $0x80] ss:$16 sps:$4 sm:$0xff]   ;;  %v6508_v24 = vld [vmem:[#allocation10 + $0x64] ss:$16 sps:$4 sm:$0xff]   ;;  %v6494_v31 = vld [vmem:[#allocation10 + $0xcc] ss:$16 sps:$4 sm:$0xff]  }
  0x93   :  { %311 = vmatpush1.bf16.msra.mxu0 %v6466_v6  ;;  %798 = vmatpush1.bf16.msra.mxu1 %v6495_v15  ;;  %v6481_v25 = vld [vmem:[#allocation5] ss:$8 sps:$4 sm:$0xff]   ;;  %v6513_v27 = vld [vmem:[#allocation10 + $0x60] ss:$16 sps:$4 sm:$0xff]   ;;  %v6492_v34 = vld [vmem:[#allocation10 + $0xc8] ss:$16 sps:$4 sm:$0xff]  }
  0x94   :  { %312 = vmatprep.subr.bf16.mxu0 %v6467_v7  ;;  %799 = vmatprep.subr.bf16.mxu1 %v6496_v16  ;;  %v6514_v29 = vld [vmem:[#allocation10 + $0x44] ss:$16 sps:$4 sm:$0xff]   ;;  %v6519_v32 = vld [vmem:[#allocation10 + $0x40] ss:$16 sps:$4 sm:$0xff]   ;;  %v6500_v35 = vld [vmem:[#allocation10 + $0xac] ss:$16 sps:$4 sm:$0xff]  }
  0x95   :  { %v6520_v33 = vld [vmem:[#allocation10 + $0x24] ss:$16 sps:$4 sm:$0xff]   ;;  %v6525_v36 = vld [vmem:[#allocation10 + $0x20] ss:$16 sps:$4 sm:$0xff]   ;;  %v6498_v39 = vld [vmem:[#allocation10 + $0xa8] ss:$16 sps:$4 sm:$0xff]  }
  0x96   :  { %v6483_v37 = vld [vmem:[#allocation2 + $0x8] sm:$0xff]   ;;  %v6506_v40 = vld [vmem:[#allocation10 + $0x8c] ss:$16 sps:$4 sm:$0xff]   ;;  %v6531_v42 = vld [vmem:[#allocation10] ss:$16 sps:$4 sm:$0xff]  }
  0x97   :  { %313 = vmatpush1.bf16.msra.mxu0 %v6469_v8  ;;  %800 = vmatpush1.bf16.msra.mxu1 %v6501_v19  ;;  %v6526_v38 = vld [vmem:[#allocation10 + $0x4] ss:$16 sps:$4 sm:$0xff]   ;;  %v6504_v41 = vld [vmem:[#allocation10 + $0x88] ss:$16 sps:$4 sm:$0xff]   ;;  %v6512_v44 = vld [vmem:[#allocation10 + $0x6c] ss:$16 sps:$4 sm:$0xff]  }
  0x98   :  { %314 = vmatprep.subr.bf16.mxu0 %v6470_v9  ;;  %801 = vmatprep.subr.bf16.mxu1 %v6502_v20  ;;  %v6532_v43 = vld [vmem:[#allocation10 + $0x1e4] ss:$16 sps:$4 sm:$0xff]   ;;  %v6537_v45 = vld [vmem:[#allocation10 + $0x1e0] ss:$16 sps:$4 sm:$0xff]   ;;  %v6510_v47 = vld [vmem:[#allocation10 + $0x68] ss:$16 sps:$4 sm:$0xff]  }
  0x99   :  { %v6538_v46 = vld [vmem:[#allocation10 + $0x1c4] ss:$16 sps:$4 sm:$0xff]   ;;  %v6518_v48 = vld [vmem:[#allocation10 + $0x4c] ss:$16 sps:$4 sm:$0xff]   ;;  %v6543_v49 = vld [vmem:[#allocation10 + $0x1c0] ss:$16 sps:$4 sm:$0xff]  }
  0x9a   :  { %v6544_v50 = vld [vmem:[#allocation10 + $0x1a4] ss:$16 sps:$4 sm:$0xff]   ;;  %v6516_v51 = vld [vmem:[#allocation10 + $0x48] ss:$16 sps:$4 sm:$0xff]   ;;  %v6524_v52 = vld [vmem:[#allocation10 + $0x2c] ss:$16 sps:$4 sm:$0xff]  }
  0x9b   :  { %315 = vmatpush1.bf16.msra.mxu0 %v6472_v11  ;;  %802 = vmatpush1.bf16.msra.mxu1 %v6507_v23  ;;  %v6549_v53 = vld [vmem:[#allocation10 + $0x1a0] ss:$16 sps:$4 sm:$0xff]   ;;  %v6550_v54 = vld [vmem:[#allocation10 + $0x184] ss:$16 sps:$4 sm:$0xff]   ;;  %v6522_v55 = vld [vmem:[#allocation10 + $0x28] ss:$16 sps:$4 sm:$0xff]  }
  0x9c   :  { %316 = vmatprep.subr.bf16.mxu0 %v6473_v12  ;;  %803 = vmatprep.subr.bf16.mxu1 %v6508_v24  ;;  %v6530_v56 = vld [vmem:[#allocation10 + $0xc] ss:$16 sps:$4 sm:$0xff]   ;;  %v6555_v57 = vld [vmem:[#allocation10 + $0x180] ss:$16 sps:$4 sm:$0xff]   ;;  %v6528_v58 = vld [vmem:[#allocation10 + $0x8] ss:$16 sps:$4 sm:$0xff]  }
  0x9d   :  { %v6536_v59 = vld [vmem:[#allocation10 + $0x1ec] ss:$16 sps:$4 sm:$0xff]   ;;  %v6534_v60 = vld [vmem:[#allocation10 + $0x1e8] ss:$16 sps:$4 sm:$0xff]   ;;  %v6556_v3 = vld [vmem:[#allocation10 + $0x164] ss:$16 sps:$4 sm:$0xff]  }
  0x9e   :  { %v6542_v61 = vld [vmem:[#allocation10 + $0x1cc] ss:$16 sps:$4 sm:$0xff]   ;;  %v6540_v62 = vld [vmem:[#allocation10 + $0x1c8] ss:$16 sps:$4 sm:$0xff]   ;;  %v6561_v6 = vld [vmem:[#allocation10 + $0x160] ss:$16 sps:$4 sm:$0xff]  }
  0x9f   :  { %317 = vmatpush1.bf16.msra.mxu0 %v6475_v17  ;;  %804 = vmatpush1.bf16.msra.mxu1 %v6513_v27  ;;  %v6548_v63 = vld [vmem:[#allocation10 + $0x1ac] ss:$16 sps:$4 sm:$0xff]   ;;  %v6552_v2 = vld [vmem:[#allocation10 + $0x188] ss:$16 sps:$4 sm:$0xff]   ;;  %v6562_v7 = vld [vmem:[#allocation10 + $0x144] ss:$16 sps:$4 sm:$0xff]   ;;  %v361_v27 = vlaneseq }
  0xa0   :  { %318 = vmatprep.subr.bf16.mxu0 %v6476_v18  ;;  %805 = vmatprep.subr.bf16.mxu1 %v6514_v29  ;;  %v6554_v1 = vld [vmem:[#allocation10 + $0x18c] ss:$16 sps:$4 sm:$0xff]   ;;  %v6558_v5 = vld [vmem:[#allocation10 + $0x168] ss:$16 sps:$4 sm:$0xff]   ;;  %v6567_v10 = vld [vmem:[#allocation10 + $0x140] ss:$16 sps:$4 sm:$0xff]  }
  0xa1   :  { %v6560_v4 = vld [vmem:[#allocation10 + $0x16c] ss:$16 sps:$4 sm:$0xff]   ;;  %v6564_v9 = vld [vmem:[#allocation10 + $0x148] ss:$16 sps:$4 sm:$0xff]   ;;  %v6568_v11 = vld [vmem:[#allocation10 + $0x124] ss:$16 sps:$4 sm:$0xff]  }
  0xa2   :  { %v6566_v8 = vld [vmem:[#allocation10 + $0x14c] ss:$16 sps:$4 sm:$0xff]   ;;  %v6570_v13 = vld [vmem:[#allocation10 + $0x128] ss:$16 sps:$4 sm:$0xff]   ;;  %v6573_v14 = vld [vmem:[#allocation10 + $0x120] ss:$16 sps:$4 sm:$0xff]  }
  0xa3   :  { %319 = vmatpush1.bf16.msra.mxu0 %v6478_v21  ;;  %806 = vmatpush1.bf16.msra.mxu1 %v6519_v32  ;;  %v6572_v12 = vld [vmem:[#allocation10 + $0x12c] ss:$16 sps:$4 sm:$0xff]   ;;  %v6574_v15 = vld [vmem:[#allocation10 + $0x104] ss:$16 sps:$4 sm:$0xff]   ;;  %v6576_v17 = vld [vmem:[#allocation10 + $0x108] ss:$16 sps:$4 sm:$0xff]  }
  0xa4   :  { %320 = vmatprep.subr.bf16.mxu0 %v6479_v22  ;;  %807 = vmatprep.subr.bf16.mxu1 %v6520_v33  ;;  %v6578_v16 = vld [vmem:[#allocation10 + $0x10c] ss:$16 sps:$4 sm:$0xff]   ;;  %v6579_v18 = vld [vmem:[#allocation10 + $0x100] ss:$16 sps:$4 sm:$0xff]  }
  0xa5   :  { %v7463_v19 = vld [vmem:[#allocation14 + $0x1c0] sm:$0xff] }
  0xa6   :  { %v7465_v20 = vld [vmem:[#allocation14 + $0x1e0] sm:$0xff] }
  0xa7   :  { %321 = vmatpush1.bf16.msra.mxu0 %v6481_v25  ;;  %808 = vmatpush1.bf16.msra.mxu1 %v6525_v36  ;;  %v7467_v21 = vld [vmem:[#allocation14 + $0x5c0] sm:$0xff]  ;;  %v5916_v22 = vcombine.low %v7463_v19, %v7465_v20  ;;  %v5917_v23 = vcombine.high %v7463_v19, %v7465_v20 }
  0xa8   :  { %848 = vmatprep.subr.bf16.mxu0 %v6488_v26  ;;  %809 = vmatprep.subr.bf16.mxu1 %v6526_v38  ;;  %v7473_v24 = vld [vmem:[#allocation14 + $0x5e0] sm:$0xff] }
  0xa9   :  { %v6044_v25 = vcombine.low %v7467_v21, %v7473_v24  ;;  %v6045_v26 = vcombine.high %v7467_v21, %v7473_v24 }
  0xaa   :  { %339 = vmatmul.mubr.bf16.vlgmr.msra.gmra.mxu0 %v6482_v28  ;;  %v7479_v28 = vshrl.u32 %v361_v27, 7  ;;  %v1161_v27 = vld [vmem:[#allocation14 + $0x500] sm:$0xff] }
  0xab   :  { %348 = vmatprep.mubr.bf16.mxu0 %v7335_v0  ;;  %849 = vmatpush1.bf16.msra.mxu0 %v6486_v30  ;;  %v6546_v0 = vld [vmem:[#allocation10 + $0x1a8] ss:$16 sps:$4 sm:$0xff]  }
  0xac   :  { %850 = vmatprep.subr.bf16.mxu0 %v6494_v31  ;;  %810 = vmatpush1.bf16.msra.mxu1 %v6531_v42  ;;  %v7482_v29 = vsub.s32 1, %v7479_v28  ;;  %v7485_v30 = vsub.s32 0, %v7479_v28  ;;  %v359_v31 = vld [vmem:[#allocation7] sm:$0x3] }
  0xad   :  { %811 = vmatprep.subr.bf16.mxu1 %v6532_v43 }
  0xae   :  { %v368_v32 = vrot.slane %v359_v31, %v7482_v29 }
  0xaf   :  { %851 = vmatpush1.bf16.msra.mxu0 %v6492_v34  ;;  %v364_v34 = vrot.slane %v359_v31, %v7485_v30  ;;  %v1165_v31 = vld [vmem:[#allocation14 + $0x520] sm:$0xff] }
  0xb0   :  { %852 = vmatprep.subr.bf16.mxu0 %v6500_v35  ;;  %812 = vmatpush2.bf16.msra.mxu1 %v6537_v45  ;;  %v379_v35 = vld [vmem:[#allocation8] sm:$0x3]  ;;  %v6021_v20 = vcombine.high %v1161_v27, %v1165_v31 }
  0xb1   :  { %813 = vmatprep.subr.bf16.mxu1 %v6538_v46  ;;  %v388_v38 = vrot.slane %v379_v35, %v7482_v29 }
  0xb2   :  { %349 = vmatmul.mubr.bf16.gmra.mxu0 %v6483_v37 }
  0xb3   :  { %853 = vmatpush1.bf16.msra.mxu0 %v6498_v39 }
  0xb4   :  { %854 = vmatprep.subr.bf16.mxu0 %v6506_v40  ;;  %814 = vmatpush2.bf16.msra.mxu1 %v6543_v49  ;;  %v384_v40 = vrot.slane %v379_v35, %v7485_v30 }
  0xb5   :  { %815 = vmatprep.subr.bf16.mxu1 %v6544_v50 }
  0xb7   :  { %855 = vmatpush1.bf16.msra.mxu0 %v6504_v41 }
  0xb8   :  { %856 = vmatprep.subr.bf16.mxu0 %v6512_v44  ;;  %816 = vmatpush2.bf16.msra.mxu1 %v6549_v53  ;;  %v1049_v53 = vld [vmem:[#allocation14 + $0x180] sm:$0xff] }
  0xb9   :  { %817 = vmatprep.subr.bf16.mxu1 %v6550_v54 }
  0xbb   :  { %857 = vmatpush1.bf16.msra.mxu0 %v6510_v47 }
  0xbc   :  { %858 = vmatprep.subr.bf16.mxu0 %v6518_v48  ;;  %818 = vmatpush2.bf16.msra.mxu1 %v6555_v57  ;;  %v1053_v57 = vld [vmem:[#allocation14 + $0x1a0] sm:$0xff] }
  0xbd   :  { %819 = vmatprep.subr.bf16.mxu1 %v6556_v3 }
  0xbf   :  { %859 = vmatpush1.bf16.msra.mxu0 %v6516_v51 }
  0xc0   :  { %860 = vmatprep.subr.bf16.mxu0 %v6524_v52  ;;  %820 = vmatpush2.bf16.msra.mxu1 %v6561_v6  ;;  %v1041_v6 = vld [vmem:[#allocation14 + $0x140] sm:$0xff] }
  0xc1   :  { %821 = vmatprep.subr.bf16.mxu1 %v6562_v7 }
  0xc3   :  { %861 = vmatpush1.bf16.msra.mxu0 %v6522_v55 }
  0xc4   :  { %862 = vmatprep.subr.bf16.mxu0 %v6530_v56  ;;  %822 = vmatpush2.bf16.msra.mxu1 %v6567_v10  ;;  %v1169_v10 = vld [vmem:[#allocation14 + $0x540] sm:$0xff] }
  0xc5   :  { %823 = vmatprep.subr.bf16.mxu1 %v6568_v11  ;;  %v1173_v11 = vld [vmem:[#allocation14 + $0x560] sm:$0xff] }
  0xc6   :  { %v6029_v21 = vcombine.high %v1169_v10, %v1173_v11  ;;  %v6028_v35 = vcombine.low %v1169_v10, %v1173_v11  ;;  %v1113_v10 = vld [vmem:[#allocation14 + $0x380] sm:$0xff] }
  0xc7   :  { %863 = vmatpush1.bf16.msra.mxu0 %v6528_v58  ;;  %v1177_v58 = vld [vmem:[#allocation14 + $0x580] sm:$0xff] }
  0xc8   :  { %864 = vmatprep.subr.bf16.mxu0 %v6536_v59  ;;  %824 = vmatpush2.bf16.msra.mxu1 %v6573_v14  ;;  %v1181_v59 = vld [vmem:[#allocation14 + $0x5a0] sm:$0xff] }
  0xc9   :  { %825 = vmatprep.subr.bf16.mxu1 %v6574_v15  ;;  %v1117_v11 = vld [vmem:[#allocation14 + $0x3a0] sm:$0xff] }
  0xcb   :  { %865 = vmatpush2.bf16.msra.mxu0 %v6534_v60 }
  0xcc   :  { %866 = vmatprep.subr.bf16.mxu0 %v6542_v61  ;;  %826 = vmatpush2.bf16.msra.mxu1 %v6579_v18 }
  0xcd   :  { %2537 = vmatprep.subr.bf16.mxu1 %v5917_v23  ;;  %v1033_v23 = vld [vmem:[#allocation14 + $0x100] sm:$0xff] }
  0xcf   :  { %867 = vmatpush2.bf16.msra.mxu0 %v6540_v62 }
  0xd0   :  { %868 = vmatprep.subr.bf16.mxu0 %v6548_v63 }
  0xd3   :  { %869 = vmatpush2.bf16.msra.mxu0 %v6546_v0 }
  0xd4   :  { %870 = vmatprep.subr.bf16.mxu0 %v6554_v1 }
  0xd7   :  { %871 = vmatpush2.bf16.msra.mxu0 %v6552_v2 }
  0xd8   :  { %872 = vmatprep.subr.bf16.mxu0 %v6560_v4  ;;  %v5909_v4 = vcombine.high %v1049_v53, %v1053_v57 }
  0xdb   :  { %873 = vmatpush2.bf16.msra.mxu0 %v6558_v5  ;;  %v6037_v5 = vcombine.high %v1177_v58, %v1181_v59 }
  0xdc   :  { %874 = vmatprep.subr.bf16.mxu0 %v6566_v8 }
  0xdf   :  { %875 = vmatpush2.bf16.msra.mxu0 %v6564_v9  ;;  %v1045_v9 = vld [vmem:[#allocation14 + $0x160] sm:$0xff] }
  0xe0   :  { %876 = vmatprep.subr.bf16.mxu0 %v6572_v12  ;;  %v5901_v18 = vcombine.high %v1041_v6, %v1045_v9 }
  0xe3   :  { %877 = vmatpush2.bf16.msra.mxu0 %v6570_v13  ;;  %v5908_v13 = vcombine.low %v1049_v53, %v1053_v57  ;;  %v1141_v53 = vld [vmem:[#allocation14 + $0x460] sm:$0xff] }
  0xe4   :  { %878 = vmatprep.subr.bf16.mxu0 %v6578_v16 }
  0xe7   :  { %879 = vmatpush2.bf16.msra.mxu0 %v6576_v17  ;;  %v6036_v17 = vcombine.low %v1177_v58, %v1181_v59  ;;  %v1001_v58 = vld [vmem:[#allocation14] sm:$0xff] }
  0xe8   :  { %2590 = vmatprep.subr.bf16.mxu0 %v6045_v26  ;;  %v1037_v26 = vld [vmem:[#allocation14 + $0x120] sm:$0xff] }
  0xe9   :  { %v5893_v19 = vcombine.high %v1033_v23, %v1037_v26  ;;  %v1005_v59 = vld [vmem:[#allocation14 + $0x20] sm:$0xff] }
 0x16a   :  { %v340_v33 = vpop.f32.mrf.mxu0 }
 0x16b   :  { %v371_v39 = vmul.f32 %v364_v34, %v340_v33 }
 0x16c   :  { %v342_v36 = vpop.f32.mrf.mxu0 }
 0x16d   :  { %v372_v37 = vmul.f32 %v368_v32, %v342_v36  ;;  %v391_v47 = vadd.f32 %v384_v40, %v371_v39  ;;  %v1153_v36 = vld [vmem:[#allocation14 + $0x4c0] sm:$0xff]  ;;  %v6020_v39 = vcombine.low %v1161_v27, %v1165_v31 }
 0x16e   :  { %v344_v41 = vpop.f32.mrf.mxu0 }
 0x16f   :  { %v373_v42 = vmul.f32 %v364_v34, %v344_v41  ;;  %v392_v44 = vadd.f32 %v388_v38, %v372_v37  ;;  %v399_v60 = vmax.f32 %v391_v47, 0.0  ;;  %v1157_v37 = vld [vmem:[#allocation14 + $0x4e0] sm:$0xff] }
 0x170   :  { %v346_v43 = vpop.f32.mrf.mxu0  ;;  %v6013_v41 = vcombine.high %v1153_v36, %v1157_v37  ;;  %v6012_v47 = vcombine.low %v1153_v36, %v1157_v37  ;;  %v1089_v37 = vld [vmem:[#allocation14 + $0x2c0] sm:$0xff] }
 0x171   :  { %v393_v45 = vadd.f32 %v384_v40, %v373_v42  ;;  %v374_v46 = vmul.f32 %v368_v32, %v346_v43  ;;  %v400_v54 = vmax.f32 %v392_v44, 0.0  ;;  %v1017_v42 = vld [vmem:[#allocation14 + $0x80] sm:$0xff] }
 0x172   :  { %v350_v48 = vpop.f32.mrf.mxu0  ;;  %v1021_v43 = vld [vmem:[#allocation14 + $0xa0] sm:$0xff] }
 0x173   :  { %v394_v49 = vadd.f32 %v388_v38, %v374_v46  ;;  %v375_v50 = vmul.f32 %v364_v34, %v350_v48  ;;  %v401_v51 = vmax.f32 %v393_v45, 0.0  ;;  %v1145_v44 = vld [vmem:[#allocation14 + $0x480] sm:$0xff]  ;;  %v5877_v48 = vcombine.high %v1017_v42, %v1021_v43 }
 0x174   :  { %v352_v52 = vpop.f32.mrf.mxu0  ;;  %v1149_v45 = vld [vmem:[#allocation14 + $0x4a0] sm:$0xff] }
 0x175   :  { %v402_v55 = vmax.f32 %v394_v49, 0.0  ;;  %v376_v56 = vmul.f32 %v368_v32, %v352_v52  ;;  %v395_v61 = vadd.f32 %v384_v40, %v375_v50  ;;  %v407_v3 = vpack.c.bf16 %v401_v51, %v399_v60  ;;  %v1009_v50 = vld [vmem:[#allocation14 + $0x40] sm:$0xff] }
 0x176   :  { %v354_v62 = vpop.f32.mrf.mxu0  ;;  %v6005_v49 = vcombine.high %v1145_v44, %v1149_v45  ;;  %v1013_v51 = vld [vmem:[#allocation14 + $0x60] sm:$0xff] }
 0x177   :  { %v396_v63 = vadd.f32 %v388_v38, %v376_v56  ;;  %v377_v0 = vmul.f32 %v364_v34, %v354_v62  ;;  %v408_v1 = vpack.c.bf16 %v402_v55, %v400_v54  ;;  %v403_v12 = vmax.f32 %v395_v61, 0.0  ;;  %v1137_v52 = vld [vmem:[#allocation14 + $0x440] sm:$0xff] }
 0x178   :  { %v356_v2 = vpop.f32.mrf.mxu0  ;;  %v5900_v34 = vcombine.low %v1041_v6, %v1045_v9  ;;  %v5876_v54 = vcombine.low %v1017_v42, %v1021_v43  ;;  %v6004_v55 = vcombine.low %v1145_v44, %v1149_v45  ;;  %v5869_v56 = vcombine.high %v1009_v50, %v1013_v51  ;;  %v1129_v60 = vld [vmem:[#allocation14 + $0x400] sm:$0xff] }
 0x179   :  { %v397_v7 = vadd.f32 %v384_v40, %v377_v0  ;;  %v378_v8 = vmul.f32 %v368_v32, %v356_v2  ;;  %827 = vmatprep.mubr.bf16.mxu1 %v408_v1  ;;  %880 = vmatprep.mubr.bf16.mxu0 %v408_v1  ;;  %v404_v14 = vmax.f32 %v396_v63, 0.0  ;;  %v5997_v57 = vcombine.high %v1137_v52, %v1141_v53  ;;  %v1133_v61 = vld [vmem:[#allocation14 + $0x420] sm:$0xff] }
 0x17a   :  { %828 = vmatmul.mubr.bf16.vlgmr.msra.gmra.mxu1 %v407_v3  ;;  %881 = vmatmul.mubr.bf16.vlgmr.msra.gmra.mxu0 %v407_v3  ;;  %v5868_v62 = vcombine.low %v1009_v50, %v1013_v51  ;;  %v5996_v63 = vcombine.low %v1137_v52, %v1141_v53  ;;  %v5861_v0 = vcombine.high %v1001_v58, %v1005_v59  ;;  %v1121_v2 = vld [vmem:[#allocation14 + $0x3c0] sm:$0xff] }
 0x17b   :  { %v405_v15 = vmax.f32 %v397_v7, 0.0  ;;  %v398_v16 = vadd.f32 %v388_v38, %v378_v8  ;;  %2538 = vmatpush1.bf16.msra.mxu1 %v5916_v22  ;;  %2591 = vmatpush1.bf16.msra.mxu0 %v6044_v25  ;;  %v1025_v22 = vld [vmem:[#allocation14 + $0xc0] sm:$0xff]  ;;  %v5892_v38 = vcombine.low %v1033_v23, %v1037_v26  ;;  %v5989_v1 = vcombine.high %v1129_v60, %v1133_v61 }
 0x17c   :  { %2539 = vmatprep.subr.bf16.mxu1 %v5909_v4  ;;  %2592 = vmatprep.subr.bf16.mxu0 %v6037_v5  ;;  %v1029_v25 = vld [vmem:[#allocation14 + $0xe0] sm:$0xff]  ;;  %v5860_v6 = vcombine.low %v1001_v58, %v1005_v59  ;;  %v5988_v7 = vcombine.low %v1129_v60, %v1133_v61  ;;  %v5972_v26 = vcombine.low %v1113_v10, %v1117_v11 }
 0x17d   :  { %v406_v24 = vmax.f32 %v398_v16, 0.0  ;;  %v409_v32 = vpack.c.bf16 %v405_v15, %v403_v12  ;;  %v5885_v40 = vcombine.high %v1025_v22, %v1029_v25  ;;  %v5884_v46 = vcombine.low %v1025_v22, %v1029_v25  ;;  %v1125_v3 = vld [vmem:[#allocation14 + $0x3e0] sm:$0xff] }
 0x17e   :  { %v1249_v4 = vld [vmem:[#allocation14 + $0x7c0] sm:$0xff]  ;;  %v5981_v8 = vcombine.high %v1121_v2, %v1125_v3  ;;  %v5973_v16 = vcombine.high %v1113_v10, %v1117_v11  ;;  %v7502_v11 = vld [vmem:[#allocation14 + $0x5e8] sm:$0xff] }
 0x17f   :  { %v410_v33 = vpack.c.bf16 %v406_v24, %v404_v14  ;;  %2540 = vmatpush1.bf16.msra.mxu1 %v5908_v13  ;;  %2593 = vmatpush1.bf16.msra.mxu0 %v6036_v17  ;;  %v1253_v5 = vld [vmem:[#allocation14 + $0x7e0] sm:$0xff]  ;;  %v5980_v14 = vcombine.low %v1121_v2, %v1125_v3 }
 0x180   :  { %2541 = vmatprep.subr.bf16.mxu1 %v5901_v18  ;;  %2594 = vmatprep.subr.bf16.mxu0 %v6029_v21  ;;  %v6109_v9 = vcombine.high %v1249_v4, %v1253_v5  ;;  %v1241_v12 = vld [vmem:[#allocation14 + $0x780] sm:$0xff]  ;;  %v6108_v15 = vcombine.low %v1249_v4, %v1253_v5 }
 0x181   :  { %837 = vmatprep.mubr.bf16.mxu1 %v410_v33  ;;  %890 = vmatprep.mubr.bf16.mxu0 %v410_v33  ;;  %v1245_v13 = vld [vmem:[#allocation14 + $0x7a0] sm:$0xff] }
 0x182   :  { %838 = vmatmul.mubr.bf16.gmra.mxu1 %v409_v32  ;;  %891 = vmatmul.mubr.bf16.gmra.mxu0 %v409_v32  ;;  %v6101_v17 = vcombine.high %v1241_v12, %v1245_v13  ;;  %v1105_v18 = vld [vmem:[#allocation14 + $0x340] sm:$0xff]  ;;  %v6100_v27 = vcombine.low %v1241_v12, %v1245_v13 }
 0x183   :  { %2542 = vmatpush1.bf16.msra.mxu1 %v5900_v34  ;;  %2595 = vmatpush1.bf16.msra.mxu0 %v6028_v35  ;;  %v1109_v21 = vld [vmem:[#allocation14 + $0x360] sm:$0xff] }
 0x184   :  { %2543 = vmatprep.subr.bf16.mxu1 %v5893_v19  ;;  %2596 = vmatprep.subr.bf16.mxu0 %v6021_v20  ;;  %v1233_v23 = vld [vmem:[#allocation14 + $0x740] sm:$0xff]  ;;  %v5965_v31 = vcombine.high %v1105_v18, %v1109_v21  ;;  %v5964_v20 = vcombine.low %v1105_v18, %v1109_v21 }
 0x185   :  { %v1237_v24 = vld [vmem:[#allocation14 + $0x760] sm:$0xff] }
 0x186   :  { %v6093_v32 = vcombine.high %v1233_v23, %v1237_v24  ;;  %v1097_v33 = vld [vmem:[#allocation14 + $0x300] sm:$0xff]  ;;  %v6092_v22 = vcombine.low %v1233_v23, %v1237_v24  ;;  %v939_v23 = vld [vmem:[#allocation13] sm:$0xf] }
 0x187   :  { %2544 = vmatpush1.bf16.msra.mxu1 %v5892_v38  ;;  %2597 = vmatpush1.bf16.msra.mxu0 %v6020_v39  ;;  %v1101_v34 = vld [vmem:[#allocation14 + $0x320] sm:$0xff] }
 0x188   :  { %2545 = vmatprep.subr.bf16.mxu1 %v5885_v40  ;;  %2598 = vmatprep.subr.bf16.mxu0 %v6013_v41  ;;  %v1225_v35 = vld [vmem:[#allocation14 + $0x700] sm:$0xff]  ;;  %v5957_v25 = vcombine.high %v1097_v33, %v1101_v34  ;;  %v5956_v41 = vcombine.low %v1097_v33, %v1101_v34  ;;  %v7530_v33 = vrot.slane %v939_v23, %v7485_v30 }
 0x189   :  { %v1229_v19 = vld [vmem:[#allocation14 + $0x720] sm:$0xff] }
 0x18a   :  { %v6085_v36 = vcombine.high %v1225_v35, %v1229_v19  ;;  %v1093_v38 = vld [vmem:[#allocation14 + $0x2e0] sm:$0xff]  ;;  %v6084_v42 = vcombine.low %v1225_v35, %v1229_v19 }
 0x18b   :  { %2546 = vmatpush1.bf16.msra.mxu1 %v5884_v46  ;;  %2599 = vmatpush1.bf16.msra.mxu0 %v6012_v47  ;;  %v1217_v39 = vld [vmem:[#allocation14 + $0x6c0] sm:$0xff]  ;;  %v5949_v43 = vcombine.high %v1089_v37, %v1093_v38  ;;  %v5948_v45 = vcombine.low %v1089_v37, %v1093_v38  ;;  %v7542_v37 = vrot.slane %v939_v23, %v7482_v29 }
 0x18c   :  { %2547 = vmatprep.subr.bf16.mxu1 %v5877_v48  ;;  %2600 = vmatprep.subr.bf16.mxu0 %v6005_v49  ;;  %v1221_v40 = vld [vmem:[#allocation14 + $0x6e0] sm:$0xff] }
 0x18d   :  { %v6077_v44 = vcombine.high %v1217_v39, %v1221_v40  ;;  %v6076_v46 = vcombine.low %v1217_v39, %v1221_v40  ;;  %v1081_v47 = vld [vmem:[#allocation14 + $0x280] sm:$0xff] }
 0x18e   :  { %v1085_v48 = vld [vmem:[#allocation14 + $0x2a0] sm:$0xff] }
 0x18f   :  { %2548 = vmatpush1.bf16.msra.mxu1 %v5876_v54  ;;  %2601 = vmatpush1.bf16.msra.mxu0 %v6004_v55  ;;  %v1209_v49 = vld [vmem:[#allocation14 + $0x680] sm:$0xff]  ;;  %v5940_v51 = vcombine.low %v1081_v47, %v1085_v48  ;;  %v5941_v52 = vcombine.high %v1081_v47, %v1085_v48 }
 0x190   :  { %2549 = vmatprep.subr.bf16.mxu1 %v5869_v56  ;;  %2602 = vmatprep.subr.bf16.mxu0 %v5997_v57  ;;  %v1213_v50 = vld [vmem:[#allocation14 + $0x6a0] sm:$0xff] }
 0x191   :  { %v6068_v53 = vcombine.low %v1209_v49, %v1213_v50  ;;  %v6069_v54 = vcombine.high %v1209_v49, %v1213_v50  ;;  %v1073_v55 = vld [vmem:[#allocation14 + $0x240] sm:$0xff] }
 0x192   :  { %v1077_v56 = vld [vmem:[#allocation14 + $0x260] sm:$0xff] }
 0x193   :  { %2550 = vmatpush1.bf16.msra.mxu1 %v5868_v62  ;;  %2603 = vmatpush1.bf16.msra.mxu0 %v5996_v63  ;;  %v1201_v57 = vld [vmem:[#allocation14 + $0x640] sm:$0xff]  ;;  %v5933_v58 = vcombine.high %v1073_v55, %v1077_v56  ;;  %v5932_v60 = vcombine.low %v1073_v55, %v1077_v56 }
 0x194   :  { %2551 = vmatprep.subr.bf16.mxu1 %v5861_v0  ;;  %2604 = vmatprep.subr.bf16.mxu0 %v5989_v1  ;;  %v1205_v59 = vld [vmem:[#allocation14 + $0x660] sm:$0xff] }
 0x195   :  { %v6060_v61 = vcombine.low %v1201_v57, %v1205_v59  ;;  %v6061_v62 = vcombine.high %v1201_v57, %v1205_v59  ;;  %v1065_v63 = vld [vmem:[#allocation14 + $0x200] sm:$0xff] }
 0x196   :  { %v1069_v0 = vld [vmem:[#allocation14 + $0x220] sm:$0xff] }
 0x197   :  { %2552 = vmatpush1.bf16.msra.mxu1 %v5860_v6  ;;  %2605 = vmatpush1.bf16.msra.mxu0 %v5988_v7  ;;  %v1193_v1 = vld [vmem:[#allocation14 + $0x600] sm:$0xff]  ;;  %v5925_v2 = vcombine.high %v1065_v63, %v1069_v0  ;;  %v5924_v4 = vcombine.low %v1065_v63, %v1069_v0  ;;  %v7494_v7 = vld [vmem:[#allocation14 + $0x1c8] sm:$0xff] }
 0x198   :  { %2553 = vmatprep.subr.bf16.mxu1 %v5981_v8  ;;  %2606 = vmatprep.subr.bf16.mxu0 %v6109_v9  ;;  %v1197_v3 = vld [vmem:[#allocation14 + $0x620] sm:$0xff]  ;;  %v7496_v8 = vld [vmem:[#allocation14 + $0x1e8] sm:$0xff] }
 0x199   :  { %v6052_v5 = vcombine.low %v1193_v1, %v1197_v3  ;;  %v6053_v6 = vcombine.high %v1193_v1, %v1197_v3  ;;  %v7498_v9 = vld [vmem:[#allocation14 + $0x5c8] sm:$0xff]  ;;  %v5919_v10 = vcombine.high %v7494_v7, %v7496_v8  ;;  %v5918_v12 = vcombine.low %v7494_v7, %v7496_v8 }
 0x19a   :  { %v6046_v13 = vcombine.low %v7498_v9, %v7502_v11 }
 0x19b   :  { %2554 = vmatpush2.bf16.msra.mxu1 %v5980_v14  ;;  %2607 = vmatpush2.bf16.msra.mxu0 %v6108_v15  ;;  %v6047_v14 = vcombine.high %v7498_v9, %v7502_v11  ;;  %v7511_v15 = vsub.s32 2, %v7479_v28  ;;  %v1162_v9 = vld [vmem:[#allocation14 + $0x508] sm:$0xff] }
 0x19c   :  { %2555 = vmatprep.subr.bf16.mxu1 %v5973_v16  ;;  %2608 = vmatprep.subr.bf16.mxu0 %v6101_v17  ;;  %v901_v16 = vld [vmem:[#allocation11] sm:$0xf]  ;;  %v7514_v17 = vsub.s32 3, %v7479_v28  ;;  %v1166_v11 = vld [vmem:[#allocation14 + $0x528] sm:$0xff] }
 0x19d   :  { %v7517_v18 = vrot.slane %v901_v16, %v7485_v30  ;;  %v7520_v21 = vrot.slane %v901_v16, %v7511_v15  ;;  %v7523_v24 = vrot.slane %v901_v16, %v7482_v29  ;;  %v7534_v35 = vrot.slane %v939_v23, %v7511_v15 }
 0x19e   :  { %v7546_v39 = vrot.slane %v939_v23, %v7514_v17 }
 0x19f   :  { %2556 = vmatpush2.bf16.msra.mxu1 %v5972_v26  ;;  %2609 = vmatpush2.bf16.msra.mxu0 %v6100_v27  ;;  %v7526_v26 = vrot.slane %v901_v16, %v7514_v17 }
 0x1a0   :  { %2557 = vmatprep.subr.bf16.mxu1 %v5965_v31  ;;  %2610 = vmatprep.subr.bf16.mxu0 %v6093_v32 }
 0x1a3   :  { %2558 = vmatpush2.bf16.msra.mxu1 %v5964_v20  ;;  %2611 = vmatpush2.bf16.msra.mxu0 %v6092_v22  ;;  %v7536_v22 = vld [vmem:[#allocation14 + $0x188] sm:$0xff] }
 0x1a4   :  { %2559 = vmatprep.subr.bf16.mxu1 %v5957_v25  ;;  %2612 = vmatprep.subr.bf16.mxu0 %v6085_v36  ;;  %v7538_v25 = vld [vmem:[#allocation14 + $0x1a8] sm:$0xff] }
 0x1a5   :  { %v5910_v59 = vcombine.low %v7536_v22, %v7538_v25 }
 0x1a7   :  { %2560 = vmatpush2.bf16.msra.mxu1 %v5956_v41  ;;  %2613 = vmatpush2.bf16.msra.mxu0 %v6084_v42  ;;  %v5911_v42 = vcombine.high %v7536_v22, %v7538_v25  ;;  %v6022_v25 = vcombine.low %v1162_v9, %v1166_v11 }
 0x1a8   :  { %2561 = vmatprep.subr.bf16.mxu1 %v5949_v43  ;;  %2614 = vmatprep.subr.bf16.mxu0 %v6077_v44  ;;  %v7550_v43 = vld [vmem:[#allocation14 + $0x588] sm:$0xff] }
 0x1a9   :  { %v7552_v44 = vld [vmem:[#allocation14 + $0x5a8] sm:$0xff] }
 0x1ab   :  { %2562 = vmatpush2.bf16.msra.mxu1 %v5948_v45  ;;  %2615 = vmatpush2.bf16.msra.mxu0 %v6076_v46 }
 0x1ac   :  { %2563 = vmatprep.subr.bf16.mxu1 %v5941_v52  ;;  %2616 = vmatprep.subr.bf16.mxu0 %v6069_v54 }
 0x1af   :  { %2564 = vmatpush2.bf16.msra.mxu1 %v5940_v51  ;;  %2617 = vmatpush2.bf16.msra.mxu0 %v6068_v53 }
 0x1b0   :  { %2565 = vmatprep.subr.bf16.mxu1 %v5933_v58  ;;  %2618 = vmatprep.subr.bf16.mxu0 %v6061_v62 }
 0x1b3   :  { %2566 = vmatpush2.bf16.msra.mxu1 %v5932_v60  ;;  %2619 = vmatpush2.bf16.msra.mxu0 %v6060_v61  ;;  %v6039_v60 = vcombine.high %v7550_v43, %v7552_v44 }
 0x1b4   :  { %2567 = vmatprep.subr.bf16.mxu1 %v5925_v2  ;;  %2620 = vmatprep.subr.bf16.mxu0 %v6053_v6 }
 0x1b7   :  { %2568 = vmatpush2.bf16.msra.mxu1 %v5924_v4  ;;  %2621 = vmatpush2.bf16.msra.mxu0 %v6052_v5 }
 0x1b8   :  { %2643 = vmatprep.subr.bf16.mxu1 %v5919_v10  ;;  %2696 = vmatprep.subr.bf16.mxu0 %v6047_v14 }
 0x23a   :  { %v829_v27 = vpop.f32.mrf.mxu1  ;;  %v882_v31 = vpop.f32.mrf.mxu0 }
 0x23b   :  { %v923_v32 = vmul.f32 %v7517_v18, %v829_v27  ;;  %v925_v34 = vmul.f32 %v7520_v21, %v882_v31 }
 0x23c   :  { %v831_v19 = vpop.f32.mrf.mxu1  ;;  %v884_v20 = vpop.f32.mrf.mxu0 }
 0x23d   :  { %v924_v36 = vmul.f32 %v7523_v24, %v831_v19  ;;  %v926_v38 = vmul.f32 %v7526_v26, %v884_v20  ;;  %v961_v45 = vadd.f32 %v7530_v33, %v923_v32  ;;  %v963_v46 = vadd.f32 %v7534_v35, %v925_v34 }
 0x23e   :  { %v833_v40 = vpop.f32.mrf.mxu1  ;;  %v886_v41 = vpop.f32.mrf.mxu0 }
 0x23f   :  { %v927_v47 = vmul.f32 %v7517_v18, %v833_v40  ;;  %v929_v48 = vmul.f32 %v7520_v21, %v886_v41  ;;  %v962_v51 = vadd.f32 %v7542_v37, %v924_v36  ;;  %v964_v52 = vadd.f32 %v7546_v39, %v926_v38 }
 0x240   :  { %v835_v49 = vpop.f32.mrf.mxu1  ;;  %v888_v50 = vpop.f32.mrf.mxu0  ;;  %v977_v1 = vmax.f32 %v961_v45, 0.0  ;;  %v979_v2 = vmax.f32 %v963_v46, 0.0 }
 0x241   :  { %v928_v53 = vmul.f32 %v7523_v24, %v835_v49  ;;  %v930_v54 = vmul.f32 %v7526_v26, %v888_v50  ;;  %v965_v55 = vadd.f32 %v7530_v33, %v927_v47  ;;  %v967_v56 = vadd.f32 %v7534_v35, %v929_v48 }
 0x242   :  { %v839_v57 = vpop.f32.mrf.mxu1  ;;  %v892_v58 = vpop.f32.mrf.mxu0  ;;  %v978_v10 = vmax.f32 %v962_v51, 0.0  ;;  %v980_v14 = vmax.f32 %v964_v52, 0.0  ;;  %v1042_v51 = vld [vmem:[#allocation14 + $0x148] sm:$0xff] }
 0x243   :  { %v966_v61 = vadd.f32 %v7542_v37, %v928_v53  ;;  %v968_v62 = vadd.f32 %v7546_v39, %v930_v54  ;;  %v931_v63 = vmul.f32 %v7517_v18, %v839_v57  ;;  %v933_v0 = vmul.f32 %v7520_v21, %v892_v58  ;;  %v1174_v57 = vld [vmem:[#allocation14 + $0x568] sm:$0xff] }
 0x244   :  { %v981_v3 = vmax.f32 %v965_v55, 0.0  ;;  %v983_v4 = vmax.f32 %v967_v56, 0.0  ;;  %v841_v5 = vpop.f32.mrf.mxu1  ;;  %v894_v6 = vpop.f32.mrf.mxu0  ;;  %v6038_v54 = vcombine.low %v7550_v43, %v7552_v44  ;;  %v1046_v55 = vld [vmem:[#allocation14 + $0x168] sm:$0xff] }
 0x245   :  { %v982_v16 = vmax.f32 %v966_v61, 0.0  ;;  %v984_v23 = vmax.f32 %v968_v62, 0.0  ;;  %v969_v27 = vadd.f32 %v7530_v33, %v931_v63  ;;  %v971_v31 = vadd.f32 %v7534_v35, %v933_v0  ;;  %v1170_v56 = vld [vmem:[#allocation14 + $0x548] sm:$0xff] }
 0x246   :  { %v932_v32 = vmul.f32 %v7523_v24, %v841_v5  ;;  %v934_v34 = vmul.f32 %v7526_v26, %v894_v6  ;;  %v843_v19 = vpop.f32.mrf.mxu1  ;;  %v896_v20 = vpop.f32.mrf.mxu0  ;;  %v7576_v36 = vpack.c.bf16 %v981_v3, %v977_v1  ;;  %v7578_v38 = vpack.c.bf16 %v983_v4, %v979_v2  ;;  %v1030_v5 = vld [vmem:[#allocation14 + $0xe8] sm:$0xff] }
 0x247   :  { %v7580_v40 = vpack.c.bf16 %v982_v16, %v978_v10  ;;  %v7582_v41 = vpack.c.bf16 %v984_v23, %v980_v14  ;;  %v935_v47 = vmul.f32 %v7517_v18, %v843_v19  ;;  %v937_v48 = vmul.f32 %v7520_v21, %v896_v20  ;;  %v1154_v6 = vld [vmem:[#allocation14 + $0x4c8] sm:$0xff] }
 0x248   :  { %v970_v45 = vadd.f32 %v7542_v37, %v932_v32  ;;  %v972_v46 = vadd.f32 %v7546_v39, %v934_v34  ;;  %v845_v49 = vpop.f32.mrf.mxu1  ;;  %v898_v50 = vpop.f32.mrf.mxu0  ;;  %v985_v18 = vmax.f32 %v969_v27, 0.0  ;;  %v987_v58 = vmax.f32 %v971_v31, 0.0  ;;  %v1158_v10 = vld [vmem:[#allocation14 + $0x4e8] sm:$0xff] }
 0x249   :  { %v936_v52 = vmul.f32 %v7523_v24, %v845_v49  ;;  %v938_v53 = vmul.f32 %v7526_v26, %v898_v50  ;;  %2569 = vmatprep.mubr.bf16.mxu1 %v7580_v40  ;;  %2622 = vmatprep.mubr.bf16.mxu0 %v7582_v41  ;;  %v973_v21 = vadd.f32 %v7530_v33, %v935_v47  ;;  %v1018_v16 = vld [vmem:[#allocation14 + $0x88] sm:$0xff] }
 0x24a   :  { %v975_v61 = vadd.f32 %v7534_v35, %v937_v48  ;;  %2570 = vmatmul.mubr.bf16.vlgmr.msra.gmra.mxu1 %v7576_v36  ;;  %2623 = vmatmul.mubr.bf16.vlgmr.msra.gmra.mxu0 %v7578_v38  ;;  %v986_v24 = vmax.f32 %v970_v45, 0.0  ;;  %v988_v26 = vmax.f32 %v972_v46, 0.0  ;;  %v5903_v43 = vcombine.high %v1042_v51, %v1046_v55  ;;  %v1022_v23 = vld [vmem:[#allocation14 + $0xa8] sm:$0xff] }
 0x24b   :  { %v974_v62 = vadd.f32 %v7542_v37, %v936_v52  ;;  %v976_v63 = vadd.f32 %v7546_v39, %v938_v53  ;;  %2644 = vmatpush1.bf16.msra.mxu1 %v5918_v12  ;;  %2697 = vmatpush1.bf16.msra.mxu0 %v6046_v13  ;;  %v989_v33 = vmax.f32 %v973_v21, 0.0  ;;  %v6031_v44 = vcombine.high %v1170_v56, %v1174_v57  ;;  %v1034_v39 = vld [vmem:[#allocation14 + $0x108] sm:$0xff] }
 0x24c   :  { %v991_v35 = vmax.f32 %v975_v61, 0.0  ;;  %2645 = vmatprep.subr.bf16.mxu1 %v5911_v42  ;;  %2698 = vmatprep.subr.bf16.mxu0 %v6039_v60  ;;  %v5902_v8 = vcombine.low %v1042_v51, %v1046_v55  ;;  %v1038_v12 = vld [vmem:[#allocation14 + $0x128] sm:$0xff]  ;;  %v6030_v42 = vcombine.low %v1170_v56, %v1174_v57  ;;  %v6023_v4 = vcombine.high %v1162_v9, %v1166_v11 }
 0x24d   :  { %v990_v37 = vmax.f32 %v974_v62, 0.0  ;;  %v992_v0 = vmax.f32 %v976_v63, 0.0  ;;  %v7609_v1 = vpack.c.bf16 %v989_v33, %v985_v18  ;;  %v1026_v60 = vld [vmem:[#allocation14 + $0xc8] sm:$0xff]  ;;  %v5895_v3 = vcombine.high %v1034_v39, %v1038_v12 }
 0x24e   :  { %v7611_v7 = vpack.c.bf16 %v991_v35, %v987_v58  ;;  %v5894_v22 = vcombine.low %v1034_v39, %v1038_v12  ;;  %v6015_v14 = vcombine.high %v1154_v6, %v1158_v10  ;;  %v1146_v27 = vld [vmem:[#allocation14 + $0x488] sm:$0xff]  ;;  %v5886_v32 = vcombine.low %v1026_v60, %v1030_v5 }
 0x24f   :  { %v7613_v13 = vpack.c.bf16 %v990_v37, %v986_v24  ;;  %v7615_v2 = vpack.c.bf16 %v992_v0, %v988_v26  ;;  %2646 = vmatpush1.bf16.msra.mxu1 %v5910_v59  ;;  %2699 = vmatpush1.bf16.msra.mxu0 %v6038_v54  ;;  %v5887_v59 = vcombine.high %v1026_v60, %v1030_v5  ;;  %v1150_v31 = vld [vmem:[#allocation14 + $0x4a8] sm:$0xff] }
 0x250   :  { %2647 = vmatprep.subr.bf16.mxu1 %v5903_v43  ;;  %2700 = vmatprep.subr.bf16.mxu0 %v6031_v44  ;;  %v6014_v34 = vcombine.low %v1154_v6, %v1158_v10  ;;  %v5879_v19 = vcombine.high %v1018_v16, %v1022_v23  ;;  %v6007_v20 = vcombine.high %v1146_v27, %v1150_v31  ;;  %v1010_v45 = vld [vmem:[#allocation14 + $0x48] sm:$0xff] }
 0x251   :  { %2579 = vmatprep.mubr.bf16.mxu1 %v7613_v13  ;;  %2632 = vmatprep.mubr.bf16.mxu0 %v7615_v2  ;;  %v1014_v46 = vld [vmem:[#allocation14 + $0x68] sm:$0xff]  ;;  %v5878_v49 = vcombine.low %v1018_v16, %v1022_v23  ;;  %v6006_v50 = vcombine.low %v1146_v27, %v1150_v31 }
 0x252   :  { %2580 = vmatmul.mubr.bf16.gmra.mxu1 %v7609_v1  ;;  %2633 = vmatmul.mubr.bf16.gmra.mxu0 %v7611_v7  ;;  %v1138_v47 = vld [vmem:[#allocation14 + $0x448] sm:$0xff]  ;;  %v5871_v51 = vcombine.high %v1010_v45, %v1014_v46  ;;  %v5870_v57 = vcombine.low %v1010_v45, %v1014_v46 }
 0x253   :  { %2648 = vmatpush1.bf16.msra.mxu1 %v5902_v8  ;;  %2701 = vmatpush1.bf16.msra.mxu0 %v6030_v42  ;;  %v1142_v48 = vld [vmem:[#allocation14 + $0x468] sm:$0xff] }
 0x254   :  { %2675 = vmatprep.mubr.bf16.mxu1 %v7580_v40  ;;  %2728 = vmatprep.mubr.bf16.mxu0 %v7582_v41  ;;  %v5999_v52 = vcombine.high %v1138_v47, %v1142_v48  ;;  %v1002_v53 = vld [vmem:[#allocation14 + $0x8] sm:$0xff]  ;;  %v5998_v18 = vcombine.low %v1138_v47, %v1142_v48 }
 0x255   :  { %2649 = vmatprep.subr.bf16.mxu1 %v5895_v3  ;;  %2702 = vmatprep.subr.bf16.mxu0 %v6023_v4  ;;  %v1006_v54 = vld [vmem:[#allocation14 + $0x28] sm:$0xff] }
 0x256   :  { %v1130_v55 = vld [vmem:[#allocation14 + $0x408] sm:$0xff]  ;;  %v5863_v58 = vcombine.high %v1002_v53, %v1006_v54  ;;  %v5862_v63 = vcombine.low %v1002_v53, %v1006_v54 }
 0x257   :  { %2650 = vmatpush1.bf16.msra.mxu1 %v5894_v22  ;;  %2703 = vmatpush1.bf16.msra.mxu0 %v6022_v25  ;;  %v1134_v56 = vld [vmem:[#allocation14 + $0x428] sm:$0xff] }
 0x258   :  { %2651 = vmatprep.subr.bf16.mxu1 %v5887_v59  ;;  %2704 = vmatprep.subr.bf16.mxu0 %v6015_v14  ;;  %v5991_v21 = vcombine.high %v1130_v55, %v1134_v56  ;;  %v1122_v61 = vld [vmem:[#allocation14 + $0x3c8] sm:$0xff]  ;;  %v5990_v33 = vcombine.low %v1130_v55, %v1134_v56 }
 0x259   :  { %v1126_v24 = vld [vmem:[#allocation14 + $0x3e8] sm:$0xff] }
 0x25a   :  { %v1250_v26 = vld [vmem:[#allocation14 + $0x7c8] sm:$0xff]  ;;  %v5983_v35 = vcombine.high %v1122_v61, %v1126_v24  ;;  %v5982_v8 = vcombine.low %v1122_v61, %v1126_v24 }
 0x25b   :  { %2652 = vmatpush1.bf16.msra.mxu1 %v5886_v32  ;;  %2705 = vmatpush1.bf16.msra.mxu0 %v6014_v34  ;;  %v1254_v62 = vld [vmem:[#allocation14 + $0x7e8] sm:$0xff] }
 0x25c   :  { %2653 = vmatprep.subr.bf16.mxu1 %v5879_v19  ;;  %2706 = vmatprep.subr.bf16.mxu0 %v6007_v20  ;;  %v6111_v43 = vcombine.high %v1250_v26, %v1254_v62  ;;  %v1114_v44 = vld [vmem:[#allocation14 + $0x388] sm:$0xff]  ;;  %v6110_v12 = vcombine.low %v1250_v26, %v1254_v62 }
 0x25d   :  { %v1118_v37 = vld [vmem:[#allocation14 + $0x3a8] sm:$0xff] }
 0x25e   :  { %v1242_v0 = vld [vmem:[#allocation14 + $0x788] sm:$0xff]  ;;  %v5975_v9 = vcombine.high %v1114_v44, %v1118_v37  ;;  %v5974_v5 = vcombine.low %v1114_v44, %v1118_v37 }
 0x25f   :  { %2654 = vmatpush1.bf16.msra.mxu1 %v5878_v49  ;;  %2707 = vmatpush1.bf16.msra.mxu0 %v6006_v50  ;;  %v1246_v39 = vld [vmem:[#allocation14 + $0x7a8] sm:$0xff] }
 0x260   :  { %2655 = vmatprep.subr.bf16.mxu1 %v5871_v51  ;;  %2708 = vmatprep.subr.bf16.mxu0 %v5999_v52  ;;  %v6103_v11 = vcombine.high %v1242_v0, %v1246_v39  ;;  %v1106_v42 = vld [vmem:[#allocation14 + $0x348] sm:$0xff]  ;;  %v6102_v6 = vcombine.low %v1242_v0, %v1246_v39 }
 0x261   :  { %v1110_v60 = vld [vmem:[#allocation14 + $0x368] sm:$0xff] }
 0x262   :  { %v1234_v3 = vld [vmem:[#allocation14 + $0x748] sm:$0xff]  ;;  %v5967_v10 = vcombine.high %v1106_v42, %v1110_v60  ;;  %v5966_v23 = vcombine.low %v1106_v42, %v1110_v60  ;;  %v1191_v42 = vld [vmem:[#allocation14 + $0x5f0] sm:$0xff] }
 0x263   :  { %2656 = vmatpush1.bf16.msra.mxu1 %v5870_v57  ;;  %2709 = vmatpush1.bf16.msra.mxu0 %v5998_v18  ;;  %v1238_v4 = vld [vmem:[#allocation14 + $0x768] sm:$0xff] }
 0x264   :  { %2657 = vmatprep.subr.bf16.mxu1 %v5863_v58  ;;  %2710 = vmatprep.subr.bf16.mxu0 %v5991_v21  ;;  %v6095_v22 = vcombine.high %v1234_v3, %v1238_v4  ;;  %v1098_v25 = vld [vmem:[#allocation14 + $0x308] sm:$0xff]  ;;  %v6094_v27 = vcombine.low %v1234_v3, %v1238_v4 }
 0x265   :  { %v1102_v59 = vld [vmem:[#allocation14 + $0x328] sm:$0xff] }
 0x266   :  { %v1226_v14 = vld [vmem:[#allocation14 + $0x708] sm:$0xff]  ;;  %v5959_v31 = vcombine.high %v1098_v25, %v1102_v59  ;;  %v5958_v46 = vcombine.low %v1098_v25, %v1102_v59  ;;  %v1183_v25 = vld [vmem:[#allocation14 + $0x5b0] sm:$0xff] }
 0x267   :  { %2658 = vmatpush1.bf16.msra.mxu1 %v5862_v63  ;;  %2711 = vmatpush1.bf16.msra.mxu0 %v5990_v33  ;;  %v1230_v16 = vld [vmem:[#allocation14 + $0x728] sm:$0xff] }
 0x268   :  { %2659 = vmatprep.subr.bf16.mxu1 %v5983_v35  ;;  %2712 = vmatprep.subr.bf16.mxu0 %v6111_v43  ;;  %v6087_v32 = vcombine.high %v1226_v14, %v1230_v16  ;;  %v1090_v34 = vld [vmem:[#allocation14 + $0x2c8] sm:$0xff]  ;;  %v6086_v47 = vcombine.low %v1226_v14, %v1230_v16 }
 0x269   :  { %v1094_v19 = vld [vmem:[#allocation14 + $0x2e8] sm:$0xff] }
 0x26a   :  { %v1218_v20 = vld [vmem:[#allocation14 + $0x6c8] sm:$0xff]  ;;  %v5951_v48 = vcombine.high %v1090_v34, %v1094_v19  ;;  %v5950_v54 = vcombine.low %v1090_v34, %v1094_v19  ;;  %v1175_v34 = vld [vmem:[#allocation14 + $0x570] sm:$0xff] }
 0x26b   :  { %2660 = vmatpush2.bf16.msra.mxu1 %v5982_v8  ;;  %2713 = vmatpush2.bf16.msra.mxu0 %v6110_v12  ;;  %v1222_v45 = vld [vmem:[#allocation14 + $0x6e8] sm:$0xff]  ;;  %v1059_v12 = vld [vmem:[#allocation14 + $0x1d0] sm:$0xff] }
 0x26c   :  { %2661 = vmatprep.subr.bf16.mxu1 %v5975_v9  ;;  %2714 = vmatprep.subr.bf16.mxu0 %v6103_v11  ;;  %v6079_v49 = vcombine.high %v1218_v20, %v1222_v45  ;;  %v1082_v50 = vld [vmem:[#allocation14 + $0x288] sm:$0xff]  ;;  %v6078_v55 = vcombine.low %v1218_v20, %v1222_v45  ;;  %v1063_v9 = vld [vmem:[#allocation14 + $0x1f0] sm:$0xff] }
 0x26d   :  { %v1086_v51 = vld [vmem:[#allocation14 + $0x2a8] sm:$0xff]  ;;  %v1187_v11 = vld [vmem:[#allocation14 + $0x5d0] sm:$0xff]  ;;  %v5921_v4 = vcombine.high %v1059_v12, %v1063_v9  ;;  %v5920_v59 = vcombine.low %v1059_v12, %v1063_v9 }
 0x26e   :  { %v1210_v52 = vld [vmem:[#allocation14 + $0x688] sm:$0xff]  ;;  %v5943_v56 = vcombine.high %v1082_v50, %v1086_v51  ;;  %v5942_v24 = vcombine.low %v1082_v50, %v1086_v51  ;;  %v6048_v14 = vcombine.low %v1187_v11, %v1191_v42  ;;  %v1167_v50 = vld [vmem:[#allocation14 + $0x530] sm:$0xff] }
 0x26f   :  { %2662 = vmatpush2.bf16.msra.mxu1 %v5974_v5  ;;  %2715 = vmatpush2.bf16.msra.mxu0 %v6102_v6  ;;  %v1214_v53 = vld [vmem:[#allocation14 + $0x6a8] sm:$0xff]  ;;  %v6049_v5 = vcombine.high %v1187_v11, %v1191_v42  ;;  %v1051_v6 = vld [vmem:[#allocation14 + $0x190] sm:$0xff] }
 0x270   :  { %2663 = vmatprep.subr.bf16.mxu1 %v5967_v10  ;;  %2716 = vmatprep.subr.bf16.mxu0 %v6095_v22  ;;  %v6071_v57 = vcombine.high %v1210_v52, %v1214_v53  ;;  %v1074_v18 = vld [vmem:[#allocation14 + $0x248] sm:$0xff]  ;;  %v6070_v26 = vcombine.low %v1210_v52, %v1214_v53  ;;  %v1055_v10 = vld [vmem:[#allocation14 + $0x1b0] sm:$0xff] }
 0x271   :  { %v1078_v58 = vld [vmem:[#allocation14 + $0x268] sm:$0xff]  ;;  %v1179_v22 = vld [vmem:[#allocation14 + $0x590] sm:$0xff]  ;;  %v5913_v16 = vcombine.high %v1051_v6, %v1055_v10  ;;  %v5912_v19 = vcombine.low %v1051_v6, %v1055_v10 }
 0x272   :  { %v1202_v21 = vld [vmem:[#allocation14 + $0x648] sm:$0xff]  ;;  %v5935_v62 = vcombine.high %v1074_v18, %v1078_v58  ;;  %v5934_v37 = vcombine.low %v1074_v18, %v1078_v58  ;;  %v6040_v20 = vcombine.low %v1179_v22, %v1183_v25  ;;  %v1159_v18 = vld [vmem:[#allocation14 + $0x4f0] sm:$0xff] }
 0x273   :  { %2664 = vmatpush2.bf16.msra.mxu1 %v5966_v23  ;;  %2717 = vmatpush2.bf16.msra.mxu0 %v6094_v27  ;;  %v1206_v61 = vld [vmem:[#allocation14 + $0x668] sm:$0xff]  ;;  %v6041_v23 = vcombine.high %v1179_v22, %v1183_v25  ;;  %v1043_v27 = vld [vmem:[#allocation14 + $0x150] sm:$0xff] }
 0x274   :  { %2665 = vmatprep.subr.bf16.mxu1 %v5959_v31  ;;  %2718 = vmatprep.subr.bf16.mxu0 %v6087_v32  ;;  %v6063_v63 = vcombine.high %v1202_v21, %v1206_v61  ;;  %v1066_v33 = vld [vmem:[#allocation14 + $0x208] sm:$0xff]  ;;  %v6062_v0 = vcombine.low %v1202_v21, %v1206_v61  ;;  %v1047_v31 = vld [vmem:[#allocation14 + $0x170] sm:$0xff] }
 0x275   :  { %v1070_v35 = vld [vmem:[#allocation14 + $0x228] sm:$0xff]  ;;  %v1171_v32 = vld [vmem:[#allocation14 + $0x550] sm:$0xff]  ;;  %v5905_v45 = vcombine.high %v1043_v27, %v1047_v31  ;;  %v5904_v51 = vcombine.low %v1043_v27, %v1047_v31 }
 0x276   :  { %v1194_v43 = vld [vmem:[#allocation14 + $0x608] sm:$0xff]  ;;  %v5927_v39 = vcombine.high %v1066_v33, %v1070_v35  ;;  %v5926_v60 = vcombine.low %v1066_v33, %v1070_v35  ;;  %v6032_v52 = vcombine.low %v1171_v32, %v1175_v34  ;;  %v1151_v33 = vld [vmem:[#allocation14 + $0x4b0] sm:$0xff] }
 0x277   :  { %2666 = vmatpush2.bf16.msra.mxu1 %v5958_v46  ;;  %2719 = vmatpush2.bf16.msra.mxu0 %v6086_v47  ;;  %v1198_v44 = vld [vmem:[#allocation14 + $0x628] sm:$0xff]  ;;  %v6033_v46 = vcombine.high %v1171_v32, %v1175_v34  ;;  %v1035_v47 = vld [vmem:[#allocation14 + $0x110] sm:$0xff] }
 0x278   :  { %2667 = vmatprep.subr.bf16.mxu1 %v5951_v48  ;;  %2720 = vmatprep.subr.bf16.mxu0 %v6079_v49  ;;  %v6055_v8 = vcombine.high %v1194_v43, %v1198_v44  ;;  %v6054_v3 = vcombine.low %v1194_v43, %v1198_v44  ;;  %v1039_v48 = vld [vmem:[#allocation14 + $0x130] sm:$0xff] }
 0x279   :  { %v1163_v49 = vld [vmem:[#allocation14 + $0x510] sm:$0xff]  ;;  %v5897_v53 = vcombine.high %v1035_v47, %v1039_v48  ;;  %v5896_v58 = vcombine.low %v1035_v47, %v1039_v48 }
 0x27a   :  { %v6024_v21 = vcombine.low %v1163_v49, %v1167_v50  ;;  %v1143_v12 = vld [vmem:[#allocation14 + $0x470] sm:$0xff] }
 0x27b   :  { %2668 = vmatpush2.bf16.msra.mxu1 %v5950_v54  ;;  %2721 = vmatpush2.bf16.msra.mxu0 %v6078_v55  ;;  %v6025_v54 = vcombine.high %v1163_v49, %v1167_v50  ;;  %v1027_v55 = vld [vmem:[#allocation14 + $0xd0] sm:$0xff] }
 0x27c   :  { %2669 = vmatprep.subr.bf16.mxu1 %v5943_v56  ;;  %2722 = vmatprep.subr.bf16.mxu0 %v6071_v57  ;;  %v1031_v56 = vld [vmem:[#allocation14 + $0xf0] sm:$0xff] }
 0x27d   :  { %v1155_v57 = vld [vmem:[#allocation14 + $0x4d0] sm:$0xff]  ;;  %v5889_v61 = vcombine.high %v1027_v55, %v1031_v56  ;;  %v5888_v35 = vcombine.low %v1027_v55, %v1031_v56 }
 0x27e   :  { %v6016_v43 = vcombine.low %v1155_v57, %v1159_v18  ;;  %v1135_v6 = vld [vmem:[#allocation14 + $0x430] sm:$0xff] }
 0x27f   :  { %2670 = vmatpush2.bf16.msra.mxu1 %v5942_v24  ;;  %2723 = vmatpush2.bf16.msra.mxu0 %v6070_v26  ;;  %v6017_v24 = vcombine.high %v1155_v57, %v1159_v18  ;;  %v1019_v26 = vld [vmem:[#allocation14 + $0x90] sm:$0xff] }
 0x280   :  { %2671 = vmatprep.subr.bf16.mxu1 %v5935_v62  ;;  %2724 = vmatprep.subr.bf16.mxu0 %v6063_v63  ;;  %v1023_v62 = vld [vmem:[#allocation14 + $0xb0] sm:$0xff] }
 0x281   :  { %v1147_v63 = vld [vmem:[#allocation14 + $0x490] sm:$0xff]  ;;  %v5881_v44 = vcombine.high %v1019_v26, %v1023_v62  ;;  %v5880_v9 = vcombine.low %v1019_v26, %v1023_v62 }
 0x282   :  { %v6008_v11 = vcombine.low %v1147_v63, %v1151_v33  ;;  %v1255_v27 = vld [vmem:[#allocation14 + $0x7f0] sm:$0xff] }
 0x283   :  { %2672 = vmatpush2.bf16.msra.mxu1 %v5934_v37  ;;  %2725 = vmatpush2.bf16.msra.mxu0 %v6062_v0  ;;  %v6009_v37 = vcombine.high %v1147_v63, %v1151_v33  ;;  %v1011_v0 = vld [vmem:[#allocation14 + $0x50] sm:$0xff] }
 0x284   :  { %2673 = vmatprep.subr.bf16.mxu1 %v5927_v39  ;;  %2726 = vmatprep.subr.bf16.mxu0 %v6055_v8  ;;  %v1015_v39 = vld [vmem:[#allocation14 + $0x70] sm:$0xff] }
 0x285   :  { %v1139_v8 = vld [vmem:[#allocation14 + $0x450] sm:$0xff]  ;;  %v5873_v42 = vcombine.high %v1011_v0, %v1015_v39  ;;  %v5872_v10 = vcombine.low %v1011_v0, %v1015_v39 }
 0x286   :  { %v6000_v22 = vcombine.low %v1139_v8, %v1143_v12  ;;  %v1247_v47 = vld [vmem:[#allocation14 + $0x7b0] sm:$0xff] }
 0x287   :  { %2674 = vmatpush2.bf16.msra.mxu1 %v5926_v60  ;;  %2727 = vmatpush2.bf16.msra.mxu0 %v6054_v3  ;;  %v6001_v60 = vcombine.high %v1139_v8, %v1143_v12  ;;  %v1003_v3 = vld [vmem:[#allocation14 + $0x10] sm:$0xff] }
 0x288   :  { %2749 = vmatprep.subr.bf16.mxu1 %v5921_v4  ;;  %2802 = vmatprep.subr.bf16.mxu0 %v6049_v5  ;;  %v1007_v4 = vld [vmem:[#allocation14 + $0x30] sm:$0xff] }
 0x289   :  { %v1131_v5 = vld [vmem:[#allocation14 + $0x410] sm:$0xff]  ;;  %v5865_v25 = vcombine.high %v1003_v3, %v1007_v4  ;;  %v5864_v31 = vcombine.low %v1003_v3, %v1007_v4 }
 0x28a   :  { %2676 = vmatmul.mubr.bf16.vlgmr.msra.gmra.mxu1 %v7576_v36  ;;  %2729 = vmatmul.mubr.bf16.vlgmr.msra.gmra.mxu0 %v7578_v38  ;;  %v5992_v32 = vcombine.low %v1131_v5, %v1135_v6  ;;  %v1239_v55 = vld [vmem:[#allocation14 + $0x770] sm:$0xff] }
 0x28b   :  { %2685 = vmatprep.mubr.bf16.mxu1 %v7613_v13  ;;  %2738 = vmatprep.mubr.bf16.mxu0 %v7615_v2  ;;  %v1231_v26 = vld [vmem:[#allocation14 + $0x730] sm:$0xff] }
 0x28c   :  { %2750 = vmatpush1.bf16.msra.mxu1 %v5920_v59  ;;  %2803 = vmatpush1.bf16.msra.mxu0 %v6048_v14  ;;  %v5993_v59 = vcombine.high %v1131_v5, %v1135_v6  ;;  %v1123_v14 = vld [vmem:[#allocation14 + $0x3d0] sm:$0xff] }
 0x28d   :  { %2751 = vmatprep.subr.bf16.mxu1 %v5913_v16  ;;  %2804 = vmatprep.subr.bf16.mxu0 %v6041_v23  ;;  %v1127_v16 = vld [vmem:[#allocation14 + $0x3f0] sm:$0xff] }
 0x28e   :  { %v1251_v23 = vld [vmem:[#allocation14 + $0x7d0] sm:$0xff]  ;;  %v5985_v34 = vcombine.high %v1123_v14, %v1127_v16  ;;  %v5984_v48 = vcombine.low %v1123_v14, %v1127_v16 }
 0x28f   :  { %v6112_v49 = vcombine.low %v1251_v23, %v1255_v27  ;;  %v1223_v0 = vld [vmem:[#allocation14 + $0x6f0] sm:$0xff] }
 0x290   :  { %2752 = vmatpush1.bf16.msra.mxu1 %v5912_v19  ;;  %2805 = vmatpush1.bf16.msra.mxu0 %v6040_v20  ;;  %v6113_v19 = vcombine.high %v1251_v23, %v1255_v27  ;;  %v1115_v20 = vld [vmem:[#allocation14 + $0x390] sm:$0xff] }
 0x291   :  { %2753 = vmatprep.subr.bf16.mxu1 %v5905_v45  ;;  %2806 = vmatprep.subr.bf16.mxu0 %v6033_v46  ;;  %v1119_v45 = vld [vmem:[#allocation14 + $0x3b0] sm:$0xff] }
 0x292   :  { %2686 = vmatmul.mubr.bf16.gmra.mxu1 %v7609_v1  ;;  %2739 = vmatmul.mubr.bf16.gmra.mxu0 %v7611_v7  ;;  %v1243_v46 = vld [vmem:[#allocation14 + $0x790] sm:$0xff]  ;;  %v5977_v50 = vcombine.high %v1115_v20, %v1119_v45  ;;  %v5976_v56 = vcombine.low %v1115_v20, %v1119_v45 }
 0x293   :  { %2781 = vmatprep.mubr.bf16.mxu1 %v7580_v40  ;;  %2834 = vmatprep.mubr.bf16.mxu0 %v7582_v41  ;;  %v6104_v57 = vcombine.low %v1243_v46, %v1247_v47  ;;  %v1215_v3 = vld [vmem:[#allocation14 + $0x6b0] sm:$0xff] }
 0x294   :  { %2754 = vmatpush1.bf16.msra.mxu1 %v5904_v51  ;;  %2807 = vmatpush1.bf16.msra.mxu0 %v6032_v52  ;;  %v6105_v51 = vcombine.high %v1243_v46, %v1247_v47  ;;  %v1107_v52 = vld [vmem:[#allocation14 + $0x350] sm:$0xff] }
 0x295   :  { %2755 = vmatprep.subr.bf16.mxu1 %v5897_v53  ;;  %2808 = vmatprep.subr.bf16.mxu0 %v6025_v54  ;;  %v1111_v53 = vld [vmem:[#allocation14 + $0x370] sm:$0xff] }
 0x296   :  { %v1235_v54 = vld [vmem:[#allocation14 + $0x750] sm:$0xff]  ;;  %v5969_v18 = vcombine.high %v1107_v52, %v1111_v53  ;;  %v5968_v62 = vcombine.low %v1107_v52, %v1111_v53  ;;  %v1192_v52 = vld [vmem:[#allocation14 + $0x5f8] sm:$0xff] }
 0x297   :  { %v6096_v63 = vcombine.low %v1235_v54, %v1239_v55  ;;  %v1207_v14 = vld [vmem:[#allocation14 + $0x670] sm:$0xff] }
 0x298   :  { %2756 = vmatpush1.bf16.msra.mxu1 %v5896_v58  ;;  %2809 = vmatpush1.bf16.msra.mxu0 %v6024_v21  ;;  %v6097_v58 = vcombine.high %v1235_v54, %v1239_v55  ;;  %v1099_v21 = vld [vmem:[#allocation14 + $0x310] sm:$0xff] }
 0x299   :  { %2757 = vmatprep.subr.bf16.mxu1 %v5889_v61  ;;  %2810 = vmatprep.subr.bf16.mxu0 %v6017_v24  ;;  %v1103_v61 = vld [vmem:[#allocation14 + $0x330] sm:$0xff] }
 0x29a   :  { %v1227_v24 = vld [vmem:[#allocation14 + $0x710] sm:$0xff]  ;;  %v5961_v33 = vcombine.high %v1099_v21, %v1103_v61  ;;  %v5960_v39 = vcombine.low %v1099_v21, %v1103_v61  ;;  %v1184_v21 = vld [vmem:[#allocation14 + $0x5b8] sm:$0xff] }
 0x29b   :  { %v6088_v8 = vcombine.low %v1227_v24, %v1231_v26  ;;  %v1199_v20 = vld [vmem:[#allocation14 + $0x630] sm:$0xff] }
 0x29c   :  { %2758 = vmatpush1.bf16.msra.mxu1 %v5888_v35  ;;  %2811 = vmatpush1.bf16.msra.mxu0 %v6016_v43  ;;  %v6089_v35 = vcombine.high %v1227_v24, %v1231_v26  ;;  %v1091_v43 = vld [vmem:[#allocation14 + $0x2d0] sm:$0xff] }
 0x29d   :  { %2759 = vmatprep.subr.bf16.mxu1 %v5881_v44  ;;  %2812 = vmatprep.subr.bf16.mxu0 %v6009_v37  ;;  %v1095_v44 = vld [vmem:[#allocation14 + $0x2f0] sm:$0xff] }
 0x29e   :  { %v1219_v37 = vld [vmem:[#allocation14 + $0x6d0] sm:$0xff]  ;;  %v5953_v12 = vcombine.high %v1091_v43, %v1095_v44  ;;  %v5952_v4 = vcombine.low %v1091_v43, %v1095_v44  ;;  %v1176_v43 = vld [vmem:[#allocation14 + $0x578] sm:$0xff] }
 0x29f   :  { %v6080_v5 = vcombine.low %v1219_v37, %v1223_v0 }
 0x2a0   :  { %2760 = vmatpush1.bf16.msra.mxu1 %v5880_v9  ;;  %2813 = vmatpush1.bf16.msra.mxu0 %v6008_v11  ;;  %v6081_v9 = vcombine.high %v1219_v37, %v1223_v0  ;;  %v1083_v11 = vld [vmem:[#allocation14 + $0x290] sm:$0xff] }
 0x2a1   :  { %2761 = vmatprep.subr.bf16.mxu1 %v5873_v42  ;;  %2814 = vmatprep.subr.bf16.mxu0 %v6001_v60  ;;  %v1087_v42 = vld [vmem:[#allocation14 + $0x2b0] sm:$0xff] }
 0x2a2   :  { %v1211_v60 = vld [vmem:[#allocation14 + $0x690] sm:$0xff]  ;;  %v5945_v6 = vcombine.high %v1083_v11, %v1087_v42  ;;  %v5944_v16 = vcombine.low %v1083_v11, %v1087_v42  ;;  %v1168_v11 = vld [vmem:[#allocation14 + $0x538] sm:$0xff] }
 0x2a3   :  { %v6072_v23 = vcombine.low %v1211_v60, %v1215_v3 }
 0x2a4   :  { %2762 = vmatpush1.bf16.msra.mxu1 %v5872_v10  ;;  %2815 = vmatpush1.bf16.msra.mxu0 %v6000_v22  ;;  %v6073_v10 = vcombine.high %v1211_v60, %v1215_v3  ;;  %v1075_v22 = vld [vmem:[#allocation14 + $0x250] sm:$0xff] }
 0x2a5   :  { %2763 = vmatprep.subr.bf16.mxu1 %v5865_v25  ;;  %2816 = vmatprep.subr.bf16.mxu0 %v5993_v59  ;;  %v1079_v25 = vld [vmem:[#allocation14 + $0x270] sm:$0xff] }
 0x2a6   :  { %v1203_v59 = vld [vmem:[#allocation14 + $0x650] sm:$0xff]  ;;  %v5937_v27 = vcombine.high %v1075_v22, %v1079_v25  ;;  %v5936_v45 = vcombine.low %v1075_v22, %v1079_v25  ;;  %v1160_v22 = vld [vmem:[#allocation14 + $0x4f8] sm:$0xff] }
 0x2a7   :  { %v6064_v46 = vcombine.low %v1203_v59, %v1207_v14 }
 0x2a8   :  { %2764 = vmatpush1.bf16.msra.mxu1 %v5864_v31  ;;  %2817 = vmatpush1.bf16.msra.mxu0 %v5992_v32  ;;  %v6065_v31 = vcombine.high %v1203_v59, %v1207_v14  ;;  %v1067_v32 = vld [vmem:[#allocation14 + $0x210] sm:$0xff] }
 0x2a9   :  { %2765 = vmatprep.subr.bf16.mxu1 %v5985_v34  ;;  %2818 = vmatprep.subr.bf16.mxu0 %v6113_v19  ;;  %v1071_v34 = vld [vmem:[#allocation14 + $0x230] sm:$0xff] }
 0x2aa   :  { %v1195_v19 = vld [vmem:[#allocation14 + $0x610] sm:$0xff]  ;;  %v5929_v47 = vcombine.high %v1067_v32, %v1071_v34  ;;  %v5928_v53 = vcombine.low %v1067_v32, %v1071_v34  ;;  %v1152_v32 = vld [vmem:[#allocation14 + $0x4b8] sm:$0xff] }
 0x2ab   :  { %v6056_v54 = vcombine.low %v1195_v19, %v1199_v20 }
 0x2ac   :  { %2766 = vmatpush2.bf16.msra.mxu1 %v5984_v48  ;;  %2819 = vmatpush2.bf16.msra.mxu0 %v6112_v49  ;;  %v6057_v48 = vcombine.high %v1195_v19, %v1199_v20  ;;  %v1060_v49 = vld [vmem:[#allocation14 + $0x1d8] sm:$0xff] }
 0x2ad   :  { %2767 = vmatprep.subr.bf16.mxu1 %v5977_v50  ;;  %2820 = vmatprep.subr.bf16.mxu0 %v6105_v51  ;;  %v1064_v50 = vld [vmem:[#allocation14 + $0x1f8] sm:$0xff] }
 0x2ae   :  { %v1188_v51 = vld [vmem:[#allocation14 + $0x5d8] sm:$0xff]  ;;  %v5923_v55 = vcombine.high %v1060_v49, %v1064_v50  ;;  %v5922_v61 = vcombine.low %v1060_v49, %v1064_v50 }
 0x2af   :  { %v6050_v24 = vcombine.low %v1188_v51, %v1192_v52  ;;  %v1012_v20 = vld [vmem:[#allocation14 + $0x58] sm:$0xff] }
 0x2b0   :  { %2768 = vmatpush2.bf16.msra.mxu1 %v5976_v56  ;;  %2821 = vmatpush2.bf16.msra.mxu0 %v6104_v57  ;;  %v6051_v56 = vcombine.high %v1188_v51, %v1192_v52  ;;  %v1052_v57 = vld [vmem:[#allocation14 + $0x198] sm:$0xff] }
 0x2b1   :  { %2769 = vmatprep.subr.bf16.mxu1 %v5969_v18  ;;  %2822 = vmatprep.subr.bf16.mxu0 %v6097_v58  ;;  %v1056_v18 = vld [vmem:[#allocation14 + $0x1b8] sm:$0xff] }
 0x2b2   :  { %v1180_v58 = vld [vmem:[#allocation14 + $0x598] sm:$0xff]  ;;  %v5915_v26 = vcombine.high %v1052_v57, %v1056_v18  ;;  %v5914_v44 = vcombine.low %v1052_v57, %v1056_v18 }
 0x2b3   :  { %v6042_v37 = vcombine.low %v1180_v58, %v1184_v21  ;;  %v1004_v52 = vld [vmem:[#allocation14 + $0x18] sm:$0xff] }
 0x2b4   :  { %2770 = vmatpush2.bf16.msra.mxu1 %v5968_v62  ;;  %2823 = vmatpush2.bf16.msra.mxu0 %v6096_v63  ;;  %v6043_v62 = vcombine.high %v1180_v58, %v1184_v21  ;;  %v1044_v63 = vld [vmem:[#allocation14 + $0x158] sm:$0xff] }
 0x2b5   :  { %2771 = vmatprep.subr.bf16.mxu1 %v5961_v33  ;;  %2824 = vmatprep.subr.bf16.mxu0 %v6089_v35  ;;  %v1048_v33 = vld [vmem:[#allocation14 + $0x178] sm:$0xff] }
 0x2b6   :  { %v1172_v35 = vld [vmem:[#allocation14 + $0x558] sm:$0xff]  ;;  %v5907_v0 = vcombine.high %v1044_v63, %v1048_v33  ;;  %v5906_v42 = vcombine.low %v1044_v63, %v1048_v33 }
 0x2b7   :  { %v6034_v60 = vcombine.low %v1172_v35, %v1176_v43  ;;  %v1124_v21 = vld [vmem:[#allocation14 + $0x3d8] sm:$0xff] }
 0x2b8   :  { %2772 = vmatpush2.bf16.msra.mxu1 %v5960_v39  ;;  %2825 = vmatpush2.bf16.msra.mxu0 %v6088_v8  ;;  %v6035_v39 = vcombine.high %v1172_v35, %v1176_v43  ;;  %v1036_v8 = vld [vmem:[#allocation14 + $0x118] sm:$0xff] }
 0x2b9   :  { %2773 = vmatprep.subr.bf16.mxu1 %v5953_v12  ;;  %2826 = vmatprep.subr.bf16.mxu0 %v6081_v9  ;;  %v1040_v12 = vld [vmem:[#allocation14 + $0x138] sm:$0xff] }
 0x2ba   :  { %v1164_v9 = vld [vmem:[#allocation14 + $0x518] sm:$0xff]  ;;  %v5899_v3 = vcombine.high %v1036_v8, %v1040_v12  ;;  %v5898_v25 = vcombine.low %v1036_v8, %v1040_v12 }
 0x2bb   :  { %v6026_v59 = vcombine.low %v1164_v9, %v1168_v11  ;;  %v1116_v43 = vld [vmem:[#allocation14 + $0x398] sm:$0xff] }
 0x2bc   :  { %2774 = vmatpush2.bf16.msra.mxu1 %v5952_v4  ;;  %2827 = vmatpush2.bf16.msra.mxu0 %v6080_v5  ;;  %v6027_v4 = vcombine.high %v1164_v9, %v1168_v11  ;;  %v1028_v5 = vld [vmem:[#allocation14 + $0xd8] sm:$0xff] }
 0x2bd   :  { %2775 = vmatprep.subr.bf16.mxu1 %v5945_v6  ;;  %2828 = vmatprep.subr.bf16.mxu0 %v6073_v10  ;;  %v1032_v6 = vld [vmem:[#allocation14 + $0xf8] sm:$0xff] }
 0x2be   :  { %v1156_v10 = vld [vmem:[#allocation14 + $0x4d8] sm:$0xff]  ;;  %v5891_v14 = vcombine.high %v1028_v5, %v1032_v6  ;;  %v5890_v34 = vcombine.low %v1028_v5, %v1032_v6 }
 0x2bf   :  { %v6018_v19 = vcombine.low %v1156_v10, %v1160_v22  ;;  %v1108_v11 = vld [vmem:[#allocation14 + $0x358] sm:$0xff] }
 0x2c0   :  { %2776 = vmatpush2.bf16.msra.mxu1 %v5944_v16  ;;  %2829 = vmatpush2.bf16.msra.mxu0 %v6072_v23  ;;  %v6019_v16 = vcombine.high %v1156_v10, %v1160_v22  ;;  %v1020_v23 = vld [vmem:[#allocation14 + $0x98] sm:$0xff] }
 0x2c1   :  { %2777 = vmatprep.subr.bf16.mxu1 %v5937_v27  ;;  %2830 = vmatprep.subr.bf16.mxu0 %v6065_v31  ;;  %v1024_v27 = vld [vmem:[#allocation14 + $0xb8] sm:$0xff] }
 0x2c2   :  { %v1148_v31 = vld [vmem:[#allocation14 + $0x498] sm:$0xff] }
 0x2c3   :  { %v6010_v49 = vcombine.low %v1148_v31, %v1152_v32  ;;  %v1100_v22 = vld [vmem:[#allocation14 + $0x318] sm:$0xff] }
 0x2c4   :  { %2778 = vmatpush2.bf16.msra.mxu1 %v5936_v45  ;;  %2831 = vmatpush2.bf16.msra.mxu0 %v6064_v46  ;;  %v1016_v45 = vld [vmem:[#allocation14 + $0x78] sm:$0xff] }
 0x2c5   :  { %2779 = vmatprep.subr.bf16.mxu1 %v5929_v47  ;;  %2832 = vmatprep.subr.bf16.mxu0 %v6057_v48  ;;  %v1140_v46 = vld [vmem:[#allocation14 + $0x458] sm:$0xff]  ;;  %v5882_v48 = vcombine.low %v1020_v23, %v1024_v27  ;;  %v5875_v50 = vcombine.high %v1012_v20, %v1016_v45 }
 0x2c6   :  { %v1144_v47 = vld [vmem:[#allocation14 + $0x478] sm:$0xff] }
 0x2c7   :  { %v6003_v51 = vcombine.high %v1140_v46, %v1144_v47  ;;  %v6002_v57 = vcombine.low %v1140_v46, %v1144_v47  ;;  %v1084_v47 = vld [vmem:[#allocation14 + $0x298] sm:$0xff] }
 0x2c8   :  { %2780 = vmatpush2.bf16.msra.mxu1 %v5928_v53  ;;  %2833 = vmatpush2.bf16.msra.mxu0 %v6056_v54  ;;  %v1008_v53 = vld [vmem:[#allocation14 + $0x38] sm:$0xff] }
 0x2c9   :  { %2855 = vmatprep.subr.bf16.mxu1 %v5923_v55  ;;  %2908 = vmatprep.subr.bf16.mxu0 %v6051_v56  ;;  %v1132_v54 = vld [vmem:[#allocation14 + $0x418] sm:$0xff]  ;;  %v5874_v56 = vcombine.low %v1012_v20, %v1016_v45  ;;  %v5867_v18 = vcombine.high %v1004_v52, %v1008_v53 }
 0x2ca   :  { %v1136_v55 = vld [vmem:[#allocation14 + $0x438] sm:$0xff] }
 0x2cb   :  { %2782 = vmatmul.mubr.bf16.vlgmr.msra.gmra.mxu1 %v7576_v36  ;;  %2835 = vmatmul.mubr.bf16.vlgmr.msra.gmra.mxu0 %v7578_v38  ;;  %v5995_v58 = vcombine.high %v1132_v54, %v1136_v55  ;;  %v5994_v63 = vcombine.low %v1132_v54, %v1136_v55  ;;  %v1076_v55 = vld [vmem:[#allocation14 + $0x258] sm:$0xff] }
 0x2cc   :  { %2791 = vmatprep.mubr.bf16.mxu1 %v7613_v13  ;;  %2844 = vmatprep.mubr.bf16.mxu0 %v7615_v2 }
 0x2cd   :  { %2856 = vmatpush1.bf16.msra.mxu1 %v5922_v61  ;;  %2909 = vmatpush1.bf16.msra.mxu0 %v6050_v24  ;;  %v1128_v61 = vld [vmem:[#allocation14 + $0x3f8] sm:$0xff] }
 0x2ce   :  { %2857 = vmatprep.subr.bf16.mxu1 %v5915_v26  ;;  %2910 = vmatprep.subr.bf16.mxu0 %v6043_v62  ;;  %v1252_v24 = vld [vmem:[#allocation14 + $0x7d8] sm:$0xff]  ;;  %v5866_v62 = vcombine.low %v1004_v52, %v1008_v53  ;;  %v5987_v33 = vcombine.high %v1124_v21, %v1128_v61 }
 0x2cf   :  { %v1256_v26 = vld [vmem:[#allocation14 + $0x7f8] sm:$0xff] }
 0x2d0   :  { %v6115_v35 = vcombine.high %v1252_v24, %v1256_v26  ;;  %v6114_v8 = vcombine.low %v1252_v24, %v1256_v26  ;;  %v1068_v26 = vld [vmem:[#allocation14 + $0x218] sm:$0xff] }
 0x2d1   :  { %2858 = vmatpush1.bf16.msra.mxu1 %v5914_v44  ;;  %2911 = vmatpush1.bf16.msra.mxu0 %v6042_v37  ;;  %v1120_v44 = vld [vmem:[#allocation14 + $0x3b8] sm:$0xff] }
 0x2d2   :  { %2859 = vmatprep.subr.bf16.mxu1 %v5907_v0  ;;  %2912 = vmatprep.subr.bf16.mxu0 %v6035_v39  ;;  %v1244_v37 = vld [vmem:[#allocation14 + $0x798] sm:$0xff]  ;;  %v5986_v39 = vcombine.low %v1124_v21, %v1128_v61  ;;  %v5979_v12 = vcombine.high %v1116_v43, %v1120_v44 }
 0x2d3   :  { %2792 = vmatmul.mubr.bf16.gmra.mxu1 %v7609_v1  ;;  %2845 = vmatmul.mubr.bf16.gmra.mxu0 %v7611_v7  ;;  %v1248_v0 = vld [vmem:[#allocation14 + $0x7b8] sm:$0xff] }
 0x2d4   :  { %2887 = vmatprep.mubr.bf16.mxu1 %v7580_v40  ;;  %2940 = vmatprep.mubr.bf16.mxu0 %v7582_v41  ;;  %v5883_v40 = vcombine.high %v1020_v23, %v1024_v27  ;;  %v6011_v41 = vcombine.high %v1148_v31, %v1152_v32  ;;  %v6107_v9 = vcombine.high %v1244_v37, %v1248_v0  ;;  %v1092_v32 = vld [vmem:[#allocation14 + $0x2d8] sm:$0xff] }
 0x2d5   :  { %2860 = vmatpush1.bf16.msra.mxu1 %v5906_v42  ;;  %2913 = vmatpush1.bf16.msra.mxu0 %v6034_v60  ;;  %v1112_v42 = vld [vmem:[#allocation14 + $0x378] sm:$0xff]  ;;  %v6106_v5 = vcombine.low %v1244_v37, %v1248_v0 }
 0x2d6   :  { %2861 = vmatprep.subr.bf16.mxu1 %v5899_v3  ;;  %2914 = vmatprep.subr.bf16.mxu0 %v6027_v4  ;;  %v1236_v60 = vld [vmem:[#allocation14 + $0x758] sm:$0xff]  ;;  %v5978_v4 = vcombine.low %v1116_v43, %v1120_v44  ;;  %v5971_v6 = vcombine.high %v1108_v11, %v1112_v42 }
 0x2d7   :  { %v1240_v3 = vld [vmem:[#allocation14 + $0x778] sm:$0xff] }
 0x2d8   :  { %v6099_v10 = vcombine.high %v1236_v60, %v1240_v3  ;;  %v6098_v23 = vcombine.low %v1236_v60, %v1240_v3  ;;  %v7649_v60 = vld [vmem:[%s7841_s8] sm:$0xff]  ;;  %v6616_v3 = vld [vmem:[#allocation16 + $0x2e0] ss:$16 sps:$4 sm:$0xff]  }
 0x2d9   :  { %2862 = vmatpush1.bf16.msra.mxu1 %v5898_v25  ;;  %2915 = vmatpush1.bf16.msra.mxu0 %v6026_v59  ;;  %v1104_v25 = vld [vmem:[#allocation14 + $0x338] sm:$0xff] }
 0x2da   :  { %2863 = vmatprep.subr.bf16.mxu1 %v5891_v14  ;;  %2916 = vmatprep.subr.bf16.mxu0 %v6019_v16  ;;  %v1228_v59 = vld [vmem:[#allocation14 + $0x718] sm:$0xff]  ;;  %v5970_v16 = vcombine.low %v1108_v11, %v1112_v42  ;;  %v5963_v27 = vcombine.high %v1100_v22, %v1104_v25 }
 0x2db   :  { %v1232_v14 = vld [vmem:[#allocation14 + $0x738] sm:$0xff] }
 0x2dc   :  { %v6091_v31 = vcombine.high %v1228_v59, %v1232_v14  ;;  %v6090_v20 = vcombine.low %v1228_v59, %v1232_v14  ;;  %v7662_v59 = vld [vmem:[%s7842_s9] sm:$0xff]  ;;  %v6583_v14 = vld [vmem:[#allocation16 + $0xc0] ss:$16 sps:$4 sm:$0xff]  }
 0x2dd   :  { %2864 = vmatpush1.bf16.msra.mxu1 %v5890_v34  ;;  %2917 = vmatpush1.bf16.msra.mxu0 %v6018_v19  ;;  %v1096_v34 = vld [vmem:[#allocation14 + $0x2f8] sm:$0xff] }
 0x2de   :  { %2865 = vmatprep.subr.bf16.mxu1 %v5883_v40  ;;  %2918 = vmatprep.subr.bf16.mxu0 %v6011_v41  ;;  %v1220_v19 = vld [vmem:[#allocation14 + $0x6d8] sm:$0xff]  ;;  %v5962_v41 = vcombine.low %v1100_v22, %v1104_v25  ;;  %v5955_v45 = vcombine.high %v1092_v32, %v1096_v34 }
 0x2df   :  { %v1224_v40 = vld [vmem:[#allocation14 + $0x6f8] sm:$0xff] }
 0x2e0   :  { %v6083_v46 = vcombine.high %v1220_v19, %v1224_v40  ;;  %v6082_v52 = vcombine.low %v1220_v19, %v1224_v40  ;;  %v6586_v19 = vld [vmem:[#allocation16 + $0xa0] ss:$16 sps:$4 sm:$0xff]  }
 0x2e1   :  { %2866 = vmatpush1.bf16.msra.mxu1 %v5882_v48  ;;  %2919 = vmatpush1.bf16.msra.mxu0 %v6010_v49  ;;  %v1088_v48 = vld [vmem:[#allocation14 + $0x2b8] sm:$0xff] }
 0x2e2   :  { %2867 = vmatprep.subr.bf16.mxu1 %v5875_v50  ;;  %2920 = vmatprep.subr.bf16.mxu0 %v6003_v51  ;;  %v1212_v49 = vld [vmem:[#allocation14 + $0x698] sm:$0xff]  ;;  %v5954_v51 = vcombine.low %v1092_v32, %v1096_v34  ;;  %v5947_v53 = vcombine.high %v1084_v47, %v1088_v48 }
 0x2e3   :  { %v1216_v50 = vld [vmem:[#allocation14 + $0x6b8] sm:$0xff] }
 0x2e4   :  { %v6075_v54 = vcombine.high %v1212_v49, %v1216_v50  ;;  %v6074_v21 = vcombine.low %v1212_v49, %v1216_v50 }
 0x2e5   :  { %2868 = vmatpush1.bf16.msra.mxu1 %v5874_v56  ;;  %2921 = vmatpush1.bf16.msra.mxu0 %v6002_v57  ;;  %v1080_v56 = vld [vmem:[#allocation14 + $0x278] sm:$0xff] }
 0x2e6   :  { %2869 = vmatprep.subr.bf16.mxu1 %v5867_v18  ;;  %2922 = vmatprep.subr.bf16.mxu0 %v5995_v58  ;;  %v1204_v57 = vld [vmem:[#allocation14 + $0x658] sm:$0xff]  ;;  %v5946_v58 = vcombine.low %v1084_v47, %v1088_v48  ;;  %v5939_v61 = vcombine.high %v1076_v55, %v1080_v56  ;;  %v6591_v47 = vld [vmem:[#allocation16 + $0x84] ss:$16 sps:$4 sm:$0xff]  }
 0x2e7   :  { %v1208_v18 = vld [vmem:[#allocation14 + $0x678] sm:$0xff]  ;;  %v6636_v48 = vld [vmem:[#allocation16 + $0x284] ss:$16 sps:$4 sm:$0xff]  }
 0x2e8   :  { %v6067_v24 = vcombine.high %v1204_v57, %v1208_v18  ;;  %v6066_v43 = vcombine.low %v1204_v57, %v1208_v18 }
 0x2e9   :  { %2870 = vmatpush1.bf16.msra.mxu1 %v5866_v62  ;;  %2923 = vmatpush1.bf16.msra.mxu0 %v5994_v63  ;;  %v1072_v62 = vld [vmem:[#allocation14 + $0x238] sm:$0xff] }
 0x2ea   :  { %2871 = vmatprep.subr.bf16.mxu1 %v5987_v33  ;;  %2924 = vmatprep.subr.bf16.mxu0 %v6115_v35  ;;  %v1196_v63 = vld [vmem:[#allocation14 + $0x618] sm:$0xff]  ;;  %v5938_v35 = vcombine.low %v1076_v55, %v1080_v56  ;;  %v5931_v44 = vcombine.high %v1068_v26, %v1072_v62  ;;  %v5930_v0 = vcombine.low %v1068_v26, %v1072_v62  ;;  %v6589_v56 = vld [vmem:[#allocation16 + $0x80] ss:$16 sps:$4 sm:$0xff]  }
 0x2eb   :  { %v1200_v33 = vld [vmem:[#allocation14 + $0x638] sm:$0xff]  ;;  %v2966_v55 = vrot.slane %v7649_v60, %v7485_v30 }
 0x2ec   :  { %v6059_v37 = vcombine.high %v1196_v63, %v1200_v33 }
 0x2ed   :  { %2872 = vmatpush2.bf16.msra.mxu1 %v5986_v39  ;;  %2925 = vmatpush2.bf16.msra.mxu0 %v6114_v8  ;;  %v6058_v39 = vcombine.low %v1196_v63, %v1200_v33  ;;  %v6582_v8 = vld [vmem:[#allocation16 + $0xe4] ss:$16 sps:$4 sm:$0xff]  }
 0x2ee   :  { %2873 = vmatprep.subr.bf16.mxu1 %v5979_v12  ;;  %2926 = vmatprep.subr.bf16.mxu0 %v6107_v9  ;;  %v6618_v12 = vld [vmem:[#allocation16 + $0x2e4] ss:$16 sps:$4 sm:$0xff]   ;;  %v6580_v9 = vld [vmem:[#allocation16 + $0xe0] ss:$16 sps:$4 sm:$0xff]  }
 0x2f1   :  { %2874 = vmatpush2.bf16.msra.mxu1 %v5978_v4  ;;  %2927 = vmatpush2.bf16.msra.mxu0 %v6106_v5  ;;  %v7653_v4 = vrot.slane %v7649_v60, %v7482_v29  ;;  %v6585_v5 = vld [vmem:[#allocation16 + $0xc4] ss:$16 sps:$4 sm:$0xff]  }
 0x2f2   :  { %2875 = vmatprep.subr.bf16.mxu1 %v5971_v6  ;;  %2928 = vmatprep.subr.bf16.mxu0 %v6099_v10  ;;  %v6624_v6 = vld [vmem:[#allocation16 + $0x2c4] ss:$16 sps:$4 sm:$0xff]  }
 0x2f5   :  { %2876 = vmatpush2.bf16.msra.mxu1 %v5970_v16  ;;  %2929 = vmatpush2.bf16.msra.mxu0 %v6098_v23 }
 0x2f6   :  { %2877 = vmatprep.subr.bf16.mxu1 %v5963_v27  ;;  %2930 = vmatprep.subr.bf16.mxu0 %v6091_v31  ;;  %v7667_v27 = vrot.slane %v7662_v59, %v7482_v29 }
 0x2f9   :  { %2878 = vmatpush2.bf16.msra.mxu1 %v5962_v41  ;;  %2931 = vmatpush2.bf16.msra.mxu0 %v6090_v20  ;;  %v6628_v20 = vld [vmem:[#allocation16 + $0x2a0] ss:$16 sps:$4 sm:$0xff]  }
 0x2fa   :  { %2879 = vmatprep.subr.bf16.mxu1 %v5955_v45  ;;  %2932 = vmatprep.subr.bf16.mxu0 %v6083_v46 }
 0x2fd   :  { %2880 = vmatpush2.bf16.msra.mxu1 %v5954_v51  ;;  %2933 = vmatpush2.bf16.msra.mxu0 %v6082_v52 }
 0x2fe   :  { %2881 = vmatprep.subr.bf16.mxu1 %v5947_v53  ;;  %2934 = vmatprep.subr.bf16.mxu0 %v6075_v54 }
 0x301   :  { %2882 = vmatpush2.bf16.msra.mxu1 %v5946_v58  ;;  %2935 = vmatpush2.bf16.msra.mxu0 %v6074_v21  ;;  %v6634_v58 = vld [vmem:[#allocation16 + $0x280] ss:$16 sps:$4 sm:$0xff]  }
 0x302   :  { %2883 = vmatprep.subr.bf16.mxu1 %v5939_v61  ;;  %2936 = vmatprep.subr.bf16.mxu0 %v6067_v24  ;;  %v6594_v61 = vld [vmem:[#allocation16 + $0x64] ss:$16 sps:$4 sm:$0xff]  }
 0x303   :  { %v6642_v24 = vld [vmem:[#allocation16 + $0x264] ss:$16 sps:$4 sm:$0xff]  }
 0x305   :  { %2884 = vmatpush2.bf16.msra.mxu1 %v5938_v35  ;;  %2937 = vmatpush2.bf16.msra.mxu0 %v6066_v43  ;;  %v3040_v43 = vrot.slane %v7662_v59, %v7485_v30 }
 0x306   :  { %2885 = vmatprep.subr.bf16.mxu1 %v5931_v44  ;;  %2938 = vmatprep.subr.bf16.mxu0 %v6059_v37 }
 0x309   :  { %2886 = vmatpush2.bf16.msra.mxu1 %v5930_v0  ;;  %2939 = vmatpush2.bf16.msra.mxu0 %v6058_v39 }
 0x30a   :  { %4862 = vmatprep.subr.bf16.mxu1 %v6582_v8  ;;  %v7642_v11 = vpop.f32.mrf.mxu1  ;;  %v7644_v42 = vpop.f32.mrf.mxu0  ;;  %4903 = vmatprep.subr.bf16.mxu0 %v6618_v12  ;;  %v6592_v12 = vld [vmem:[#allocation16 + $0x60] ss:$16 sps:$4 sm:$0xff]  }
 0x30b   :  { %v2625_v26 = vadd.f32 %v7644_v42, %v7642_v11  ;;  %v6597_v11 = vld [vmem:[#allocation16 + $0x44] ss:$16 sps:$4 sm:$0xff]  }
 0x30c   :  { %2888 = vmatmul.mubr.bf16.vlgmr.msra.gmra.mxu1 %v7576_v36  ;;  %2941 = vmatmul.mubr.bf16.vlgmr.msra.gmra.mxu0 %v7578_v38  ;;  %v2573_v10 = vpop.f32.mrf.mxu1  ;;  %v2626_v22 = vpop.f32.mrf.mxu0  ;;  %v6622_v36 = vld [vmem:[#allocation16 + $0x2c0] ss:$16 sps:$4 sm:$0xff]   ;;  %v6645_v42 = vld [vmem:[#allocation16 + $0x244] ss:$16 sps:$4 sm:$0xff]  }
 0x30d   :  { %2897 = vmatprep.mubr.bf16.mxu1 %v7613_v13  ;;  %2950 = vmatprep.mubr.bf16.mxu0 %v7615_v2  ;;  %v2627_v25 = vadd.f32 %v2626_v22, %v2573_v10  ;;  %v6588_v13 = vld [vmem:[#allocation16 + $0xa4] ss:$16 sps:$4 sm:$0xff]  }
 0x30e   :  { %4863 = vmatpush1.bf16.msra.mxu1 %v6580_v9  ;;  %v2575_v16 = vpop.f32.mrf.mxu1  ;;  %v2628_v23 = vpop.f32.mrf.mxu0  ;;  %4904 = vmatpush1.bf16.msra.mxu0 %v6616_v3  ;;  %v6630_v2 = vld [vmem:[#allocation16 + $0x2a4] ss:$16 sps:$4 sm:$0xff]   ;;  %v6640_v9 = vld [vmem:[#allocation16 + $0x260] ss:$16 sps:$4 sm:$0xff]  }
 0x30f   :  { %v3004_v38 = vmul.f32 %v7653_v4, %v2627_v25  ;;  %4864 = vmatprep.subr.bf16.mxu1 %v6585_v5  ;;  %4905 = vmatprep.subr.bf16.mxu0 %v6624_v6  ;;  %v2629_v52 = vadd.f32 %v2628_v23, %v2575_v16  ;;  %v3003_v5 = vmul.f32 %v2966_v55, %v2625_v26  ;;  %v6609_v26 = vld [vmem:[#allocation16 + $0x1c4] ss:$16 sps:$4 sm:$0xff]  }
 0x310   :  { %v2577_v31 = vpop.f32.mrf.mxu1  ;;  %v2630_v32 = vpop.f32.mrf.mxu0 }
 0x311   :  { %v2631_v34 = vadd.f32 %v2630_v32, %v2577_v31  ;;  %v3078_v45 = vadd.f32 %v7667_v27, %v3004_v38  ;;  %v3011_v44 = vmul.f32 %v2966_v55, %v2629_v52  ;;  %v6643_v38 = vld [vmem:[#allocation16 + $0x240] ss:$16 sps:$4 sm:$0xff]   ;;  %v6648_v31 = vld [vmem:[#allocation16 + $0x224] ss:$16 sps:$4 sm:$0xff]   ;;  %v3077_v32 = vadd.f32 %v3040_v43, %v3003_v5 }
 0x312   :  { %4865 = vmatpush1.bf16.msra.mxu1 %v6583_v14  ;;  %v2581_v40 = vpop.f32.mrf.mxu1  ;;  %v2634_v41 = vpop.f32.mrf.mxu0  ;;  %4906 = vmatpush1.bf16.msra.mxu0 %v6622_v36  ;;  %v6595_v36 = vld [vmem:[#allocation16 + $0x40] ss:$16 sps:$4 sm:$0xff]  }
 0x313   :  { %v3012_v46 = vmul.f32 %v7653_v4, %v2631_v34  ;;  %4866 = vmatprep.subr.bf16.mxu1 %v6588_v13  ;;  %4907 = vmatprep.subr.bf16.mxu0 %v6630_v2  ;;  %v2635_v49 = vadd.f32 %v2634_v41, %v2581_v40  ;;  %v3110_v21 = vmax.f32 %v3078_v45, 0.0  ;;  %v3085_v14 = vadd.f32 %v3040_v43, %v3011_v44  ;;  %v6600_v2 = vld [vmem:[#allocation16 + $0x24] ss:$16 sps:$4 sm:$0xff]   ;;  %v6598_v45 = vld [vmem:[#allocation16 + $0x20] ss:$16 sps:$4 sm:$0xff]  }
 0x314   :  { %2898 = vmatmul.mubr.bf16.gmra.mxu1 %v7609_v1  ;;  %2951 = vmatmul.mubr.bf16.gmra.mxu0 %v7611_v7  ;;  %v2583_v50 = vpop.f32.mrf.mxu1  ;;  %v2636_v51 = vpop.f32.mrf.mxu0 }
 0x315   :  { %v3086_v53 = vadd.f32 %v7667_v27, %v3012_v46  ;;  %v2637_v54 = vadd.f32 %v2636_v51, %v2583_v50  ;;  %v3019_v62 = vmul.f32 %v2966_v55, %v2635_v49  ;;  %v3117_v41 = vmax.f32 %v3085_v14, 0.0  ;;  %v6603_v46 = vld [vmem:[#allocation16 + $0x4] ss:$16 sps:$4 sm:$0xff]  }
 0x316   :  { %4867 = vmatpush1.bf16.msra.mxu1 %v6586_v19  ;;  %v2585_v57 = vpop.f32.mrf.mxu1  ;;  %v2638_v18 = vpop.f32.mrf.mxu0  ;;  %4908 = vmatpush1.bf16.msra.mxu0 %v6628_v20  ;;  %v6663_v14 = vld [vmem:[#allocation16 + $0x384] ss:$16 sps:$4 sm:$0xff]  }
 0x317   :  { %v3118_v1 = vmax.f32 %v3086_v53, 0.0  ;;  %v3020_v7 = vmul.f32 %v7653_v4, %v2637_v54  ;;  %4868 = vmatprep.subr.bf16.mxu1 %v6591_v47  ;;  %4909 = vmatprep.subr.bf16.mxu0 %v6636_v48  ;;  %v2639_v63 = vadd.f32 %v2638_v18, %v2585_v57  ;;  %v3093_v6 = vadd.f32 %v3040_v43, %v3019_v62  ;;  %v6651_v47 = vld [vmem:[#allocation16 + $0x204] ss:$16 sps:$4 sm:$0xff]   ;;  %v6601_v53 = vld [vmem:[#allocation16] ss:$16 sps:$4 sm:$0xff]  }
 0x318   :  { %v2587_v33 = vpop.f32.mrf.mxu1  ;;  %v2640_v35 = vpop.f32.mrf.mxu0  ;;  %v3109_v48 = vmax.f32 %v3077_v32, 0.0  ;;  %v6654_v57 = vld [vmem:[#allocation16 + $0x3e4] ss:$16 sps:$4 sm:$0xff]  }
 0x319   :  { %v3148_v37 = vmax.f32 %v3110_v21, %v3118_v1  ;;  %v3094_v0 = vadd.f32 %v7667_v27, %v3020_v7  ;;  %v3027_v39 = vmul.f32 %v2966_v55, %v2639_v63  ;;  %v2641_v8 = vadd.f32 %v2640_v35, %v2587_v33  ;;  %v6649_v55 = vld [vmem:[#allocation16 + $0x200] ss:$16 sps:$4 sm:$0xff]   ;;  %v6657_v62 = vld [vmem:[#allocation16 + $0x3c4] ss:$16 sps:$4 sm:$0xff]  }
 0x31a   :  { %4869 = vmatpush1.bf16.msra.mxu1 %v6589_v56  ;;  %4910 = vmatpush1.bf16.msra.mxu0 %v6634_v58  ;;  %v3125_v34 = vmax.f32 %v3093_v6, 0.0  ;;  %v3141_v51 = vmax.f32 %v3109_v48, %v3117_v41  ;;  %v6606_v56 = vld [vmem:[#allocation16 + $0x1e4] ss:$16 sps:$4 sm:$0xff]   ;;  %v6604_v7 = vld [vmem:[#allocation16 + $0x1e0] ss:$16 sps:$4 sm:$0xff]  }
 0x31b   :  { %v3149_v3 = vrot.slane %v3148_v37, 4  ;;  %4870 = vmatprep.subr.bf16.mxu1 %v6594_v61  ;;  %4911 = vmatprep.subr.bf16.mxu0 %v6642_v24  ;;  %v3101_v10 = vadd.f32 %v3040_v43, %v3027_v39  ;;  %v3028_v22 = vmul.f32 %v7653_v4, %v2641_v8  ;;  %v3126_v16 = vmax.f32 %v3094_v0, 0.0  ;;  %v6652_v24 = vld [vmem:[#allocation16 + $0x3e0] ss:$16 sps:$4 sm:$0xff]   ;;  %v6612_v39 = vld [vmem:[#allocation16 + $0x1a4] ss:$16 sps:$4 sm:$0xff]  }
 0x31c   :  { %v3142_v21 = vrot.slane %v3141_v51, 4  ;;  %v6607_v43 = vld [vmem:[#allocation16 + $0x1c0] ss:$16 sps:$4 sm:$0xff]   ;;  %v6660_v8 = vld [vmem:[#allocation16 + $0x3a4] ss:$16 sps:$4 sm:$0xff]  }
 0x31d   :  { %v3150_v25 = vmax.f32 %v3148_v37, %v3149_v3  ;;  %v3102_v23 = vadd.f32 %v7667_v27, %v3028_v22  ;;  %v3133_v19 = vmax.f32 %v3101_v10, 0.0  ;;  %v6646_v27 = vld [vmem:[#allocation16 + $0x220] ss:$16 sps:$4 sm:$0xff]   ;;  %v6615_v10 = vld [vmem:[#allocation16 + $0x184] ss:$16 sps:$4 sm:$0xff]  }
 0x31e   :  { %4871 = vmatpush1.bf16.msra.mxu1 %v6592_v12  ;;  %4912 = vmatpush1.bf16.msra.mxu0 %v6640_v9  ;;  %v3143_v35 = vmax.f32 %v3141_v51, %v3142_v21  ;;  %v6655_v0 = vld [vmem:[#allocation16 + $0x3c0] ss:$16 sps:$4 sm:$0xff]   ;;  %v6669_v41 = vld [vmem:[#allocation16 + $0x344] ss:$16 sps:$4 sm:$0xff]  }
 0x31f   :  { %v3151_v13 = vrot.slane %v3150_v25, 2  ;;  %4872 = vmatprep.subr.bf16.mxu1 %v6597_v11  ;;  %4913 = vmatprep.subr.bf16.mxu0 %v6645_v42  ;;  %v3134_v40 = vmax.f32 %v3102_v23, 0.0  ;;  %v3197_v49 = vmax.f32 %v3125_v34, %v3133_v19  ;;  %v6610_v11 = vld [vmem:[#allocation16 + $0x1a0] ss:$16 sps:$4 sm:$0xff]  }
 0x320   :  { %v3144_v3 = vrot.slane %v3143_v35, 2  ;;  %v6658_v6 = vld [vmem:[#allocation16 + $0x3a0] ss:$16 sps:$4 sm:$0xff]  }
 0x321   :  { %v3152_v4 = vmax.f32 %v3150_v25, %v3151_v13  ;;  %v3204_v20 = vmax.f32 %v3126_v16, %v3134_v40  ;;  %v3198_v18 = vrot.slane %v3197_v49, 4  ;;  %v6621_v13 = vld [vmem:[#allocation16 + $0x164] ss:$16 sps:$4 sm:$0xff]   ;;  %v6619_v34 = vld [vmem:[#allocation16 + $0x160] ss:$16 sps:$4 sm:$0xff]  }
 0x322   :  { %4873 = vmatpush1.bf16.msra.mxu1 %v6595_v36  ;;  %4914 = vmatpush1.bf16.msra.mxu0 %v6643_v38  ;;  %v3145_v23 = vmax.f32 %v3143_v35, %v3144_v3  ;;  %v6613_v36 = vld [vmem:[#allocation16 + $0x180] ss:$16 sps:$4 sm:$0xff]   ;;  %v6627_v40 = vld [vmem:[#allocation16 + $0x144] ss:$16 sps:$4 sm:$0xff]   ;;  %v3052_v3 = vrot.slane %v7662_v59, %v7514_v17 }
 0x323   :  { %4874 = vmatprep.subr.bf16.mxu1 %v6600_v2  ;;  %4915 = vmatprep.subr.bf16.mxu0 %v6648_v31  ;;  %v3205_v50 = vrot.slane %v3204_v20, 4  ;;  %v3153_v54 = vrot.slane %v3152_v4, 1  ;;  %v3199_v63 = vmax.f32 %v3197_v49, %v3198_v18  ;;  %v6661_v38 = vld [vmem:[#allocation16 + $0x380] ss:$16 sps:$4 sm:$0xff]   ;;  %v6666_v2 = vld [vmem:[#allocation16 + $0x364] ss:$16 sps:$4 sm:$0xff]  }
 0x324   :  { %v3146_v32 = vrot.slane %v3145_v23, 1  ;;  %v6664_v19 = vld [vmem:[#allocation16 + $0x360] ss:$16 sps:$4 sm:$0xff]   ;;  %v6678_v18 = vld [vmem:[#allocation16 + $0x4e4] ss:$16 sps:$4 sm:$0xff]  }
 0x325   :  { %v3206_v52 = vmax.f32 %v3204_v20, %v3205_v50  ;;  %v3154_v61 = vmax.f32 %v3152_v4, %v3153_v54  ;;  %v3200_v12 = vrot.slane %v3199_v63, 2  ;;  %v6631_v50 = vld [vmem:[#allocation16 + $0x120] ss:$16 sps:$4 sm:$0xff]  }
 0x326   :  { %4875 = vmatpush1.bf16.msra.mxu1 %v6598_v45  ;;  %4916 = vmatpush1.bf16.msra.mxu0 %v6646_v27  ;;  %v3147_v20 = vmax.f32 %v3145_v23, %v3146_v32  ;;  %v6625_v45 = vld [vmem:[#allocation16 + $0x140] ss:$16 sps:$4 sm:$0xff]   ;;  %v6687_v32 = vld [vmem:[#allocation16 + $0x484] ss:$16 sps:$4 sm:$0xff]  }
 0x327   :  { %4876 = vmatprep.subr.bf16.mxu1 %v6603_v46  ;;  %4917 = vmatprep.subr.bf16.mxu0 %v6651_v47  ;;  %v3207_v58 = vrot.slane %v3206_v52, 2  ;;  %v3254_v37 = vpack.c.bf16 %v3154_v61, %v3154_v61  ;;  %v3201_v22 = vmax.f32 %v3199_v63, %v3200_v12  ;;  %v6667_v27 = vld [vmem:[#allocation16 + $0x340] ss:$16 sps:$4 sm:$0xff]   ;;  %v6633_v46 = vld [vmem:[#allocation16 + $0x124] ss:$16 sps:$4 sm:$0xff]   ;;  %v7697_v63 = vrot.slane %v7649_v60, %v7514_v17 }
 0x328   :  { %v6672_v47 = vld [vmem:[#allocation16 + $0x324] ss:$16 sps:$4 sm:$0xff]   ;;  %v3253_v49 = vpack.c.bf16 %v3147_v20, %v3147_v20  ;;  %v6670_v51 = vld [vmem:[#allocation16 + $0x320] ss:$16 sps:$4 sm:$0xff]  }
 0x329   :  { %v3208_v1 = vmax.f32 %v3206_v52, %v3207_v58  ;;  %v3542_v42 = vunpack.c.l.b16 %v3254_v37  ;;  %v3202_v31 = vrot.slane %v3201_v22, 1  ;;  %v6639_v52 = vld [vmem:[#allocation16 + $0x104] ss:$16 sps:$4 sm:$0xff]   ;;  %v3048_v37 = vrot.slane %v7662_v59, %v7511_v15  ;;  %v6679_v12 = vld [vmem:[#allocation16 + $0x4c0] ss:$16 sps:$4 sm:$0xff]  }
 0x32a   :  { %4877 = vmatpush1.bf16.msra.mxu1 %v6601_v53  ;;  %4918 = vmatpush1.bf16.msra.mxu0 %v6649_v55  ;;  %v6675_v53 = vld [vmem:[#allocation16 + $0x304] ss:$16 sps:$4 sm:$0xff]   ;;  %v3541_v55 = vunpack.c.l.b16 %v3253_v49 }
 0x32b   :  { %4878 = vmatprep.subr.bf16.mxu1 %v6606_v56  ;;  %4919 = vmatprep.subr.bf16.mxu0 %v6654_v57  ;;  %v3209_v33 = vrot.slane %v3208_v1, 1  ;;  %v3203_v4 = vmax.f32 %v3201_v22, %v3202_v31  ;;  %v6637_v56 = vld [vmem:[#allocation16 + $0x100] ss:$16 sps:$4 sm:$0xff]   ;;  %v6726_v58 = vld [vmem:[#allocation16 + $0x6e4] ss:$16 sps:$4 sm:$0xff]  }
 0x32c   :  { %v6673_v57 = vld [vmem:[#allocation16 + $0x300] ss:$16 sps:$4 sm:$0xff]  }
 0x32d   :  { %v3210_v44 = vmax.f32 %v3208_v1, %v3209_v33  ;;  %v3261_v48 = vpack.c.bf16 %v3203_v4, %v3203_v4  ;;  %v7691_v1 = vrot.slane %v7649_v60, %v7511_v15  ;;  %v6681_v33 = vld [vmem:[#allocation16 + $0x4c4] ss:$16 sps:$4 sm:$0xff]  }
 0x32e   :  { %4879 = vmatpush2.bf16.msra.mxu1 %v6604_v7  ;;  %4920 = vmatpush2.bf16.msra.mxu0 %v6652_v24  ;;  %v6676_v24 = vld [vmem:[#allocation16 + $0x4e0] ss:$16 sps:$4 sm:$0xff]  }
 0x32f   :  { %4880 = vmatprep.subr.bf16.mxu1 %v6609_v26  ;;  %4921 = vmatprep.subr.bf16.mxu0 %v6657_v62  ;;  %v3262_v9 = vpack.c.bf16 %v3210_v44, %v3210_v44  ;;  %v3549_v54 = vunpack.c.l.b16 %v3261_v48 }
 0x331   :  { %v3550_v5 = vunpack.c.l.b16 %v3262_v9  ;;  %v3558_v21 = vsel %vm3557_vm0, %v3549_v54, %v3541_v55 }
 0x332   :  { %4881 = vmatpush2.bf16.msra.mxu1 %v6607_v43  ;;  %4922 = vmatpush2.bf16.msra.mxu0 %v6655_v0  ;;  %v7693_v62 = vpack.c.b16 %v3558_v21, %v3558_v21 }
 0x333   :  { %4882 = vmatprep.subr.bf16.mxu1 %v6612_v39  ;;  %4923 = vmatprep.subr.bf16.mxu0 %v6660_v8  ;;  %v3559_v25 = vsel %vm3557_vm0, %v3550_v5, %v3542_v42  ;;  %v6684_v42 = vld [vmem:[#allocation16 + $0x4a4] ss:$16 sps:$4 sm:$0xff]  }
 0x334   :  { %v7685_v16 = vpack.c.b16 %v3559_v25, %v3559_v25 }
 0x336   :  { %4883 = vmatpush2.bf16.msra.mxu1 %v6610_v11  ;;  %4924 = vmatpush2.bf16.msra.mxu0 %v6658_v6 }
 0x337   :  { %4884 = vmatprep.subr.bf16.mxu1 %v6615_v10  ;;  %4894 = vmatprep.mubr.bf16.mxu1 %v7685_v16 }
 0x338   :  { %4925 = vmatprep.subr.bf16.mxu0 %v6663_v14 }
 0x33a   :  { %4885 = vmatpush2.bf16.msra.mxu1 %v6613_v36  ;;  %4926 = vmatpush2.bf16.msra.mxu0 %v6661_v38  ;;  %v6682_v36 = vld [vmem:[#allocation16 + $0x4a0] ss:$16 sps:$4 sm:$0xff]  }
 0x33b   :  { %4886 = vmatprep.subr.bf16.mxu1 %v6621_v13  ;;  %4927 = vmatprep.subr.bf16.mxu0 %v6666_v2 }
 0x33e   :  { %4887 = vmatpush2.bf16.msra.mxu1 %v6619_v34  ;;  %4928 = vmatpush2.bf16.msra.mxu0 %v6664_v19 }
 0x33f   :  { %4888 = vmatprep.subr.bf16.mxu1 %v6627_v40  ;;  %4929 = vmatprep.subr.bf16.mxu0 %v6669_v41 }
 0x342   :  { %4889 = vmatpush2.bf16.msra.mxu1 %v6625_v45  ;;  %4930 = vmatpush2.bf16.msra.mxu0 %v6667_v27 }
 0x343   :  { %4890 = vmatprep.subr.bf16.mxu1 %v6633_v46  ;;  %4931 = vmatprep.subr.bf16.mxu0 %v6672_v47  ;;  %v6685_v47 = vld [vmem:[#allocation16 + $0x480] ss:$16 sps:$4 sm:$0xff]  }
 0x346   :  { %4891 = vmatpush2.bf16.msra.mxu1 %v6631_v50  ;;  %4932 = vmatpush2.bf16.msra.mxu0 %v6670_v51  ;;  %v6690_v51 = vld [vmem:[#allocation16 + $0x464] ss:$16 sps:$4 sm:$0xff]  }
 0x347   :  { %4892 = vmatprep.subr.bf16.mxu1 %v6639_v52  ;;  %4933 = vmatprep.subr.bf16.mxu0 %v6675_v53 }
 0x34a   :  { %4893 = vmatpush2.bf16.msra.mxu1 %v6637_v56  ;;  %v2677_v7 = vpop.f32.mrf.mxu1  ;;  %v2730_v61 = vpop.f32.mrf.mxu0  ;;  %4934 = vmatpush2.bf16.msra.mxu0 %v6673_v57 }
 0x34b   :  { %v2731_v26 = vadd.f32 %v2730_v61, %v2677_v7  ;;  %4944 = vmatprep.subr.bf16.mxu1 %v6678_v18  ;;  %4985 = vmatprep.subr.bf16.mxu0 %v6726_v58  ;;  %v6688_v7 = vld [vmem:[#allocation16 + $0x460] ss:$16 sps:$4 sm:$0xff]  }
 0x34c   :  { %v2679_v35 = vpop.f32.mrf.mxu1  ;;  %v2732_v43 = vpop.f32.mrf.mxu0 }
 0x34d   :  { %v3005_v44 = vmul.f32 %v7691_v1, %v2731_v26  ;;  %4895 = vmatmul.mubr.bf16.vlgmr.msra.gmra.mxu1 %v7693_v62  ;;  %v2733_v0 = vadd.f32 %v2732_v43, %v2679_v35  ;;  %v6693_v26 = vld [vmem:[#allocation16 + $0x444] ss:$16 sps:$4 sm:$0xff]  }
 0x34e   :  { %v2681_v39 = vpop.f32.mrf.mxu1  ;;  %v2734_v8 = vpop.f32.mrf.mxu0  ;;  %4945 = vmatpush1.bf16.msra.mxu1 %v6676_v24 }
 0x34f   :  { %v3006_v9 = vmul.f32 %v7697_v63, %v2733_v0  ;;  %v2735_v11 = vadd.f32 %v2734_v8, %v2681_v39  ;;  %4946 = vmatprep.subr.bf16.mxu1 %v6681_v33  ;;  %v3079_v10 = vadd.f32 %v3048_v37, %v3005_v44 }
 0x350   :  { %v2683_v5 = vpop.f32.mrf.mxu1  ;;  %v2736_v6 = vpop.f32.mrf.mxu0 }
 0x351   :  { %v3013_v22 = vmul.f32 %v7691_v1, %v2735_v11  ;;  %v2737_v25 = vadd.f32 %v2736_v6, %v2683_v5  ;;  %v3080_v38 = vadd.f32 %v3052_v3, %v3006_v9  ;;  %v3111_v40 = vmax.f32 %v3079_v10, 0.0  ;;  %v6691_v9 = vld [vmem:[#allocation16 + $0x440] ss:$16 sps:$4 sm:$0xff]  }
 0x352   :  { %v2687_v14 = vpop.f32.mrf.mxu1  ;;  %v2740_v23 = vpop.f32.mrf.mxu0  ;;  %4947 = vmatpush1.bf16.msra.mxu1 %v6679_v12 }
 0x353   :  { %v3087_v13 = vadd.f32 %v3048_v37, %v3013_v22  ;;  %v3014_v2 = vmul.f32 %v7697_v63, %v2737_v25  ;;  %v2741_v31 = vadd.f32 %v2740_v23, %v2687_v14  ;;  %4948 = vmatprep.subr.bf16.mxu1 %v6684_v42  ;;  %v3112_v48 = vmax.f32 %v3080_v38, 0.0 }
 0x354   :  { %v2689_v34 = vpop.f32.mrf.mxu1  ;;  %v2742_v19 = vpop.f32.mrf.mxu0 }
 0x355   :  { %v3119_v41 = vmax.f32 %v3087_v13, 0.0  ;;  %v3088_v4 = vadd.f32 %v3052_v3, %v3014_v2  ;;  %v2743_v20 = vadd.f32 %v2742_v19, %v2689_v34  ;;  %v3021_v45 = vmul.f32 %v7691_v1, %v2741_v31  ;;  %v6697_v31 = vld [vmem:[#allocation16 + $0x400] ss:$16 sps:$4 sm:$0xff]  }
 0x356   :  { %v2691_v27 = vpop.f32.mrf.mxu1  ;;  %v2744_v46 = vpop.f32.mrf.mxu0  ;;  %4949 = vmatpush1.bf16.msra.mxu1 %v6682_v36 }
 0x357   :  { %v3155_v49 = vmax.f32 %v3111_v40, %v3119_v41  ;;  %v3120_v50 = vmax.f32 %v3088_v4, 0.0  ;;  %4950 = vmatprep.subr.bf16.mxu1 %v6687_v32  ;;  %v3022_v52 = vmul.f32 %v7697_v63, %v2743_v20  ;;  %v2745_v53 = vadd.f32 %v2744_v46, %v2691_v27  ;;  %v6702_v32 = vld [vmem:[#allocation16 + $0x5e4] ss:$16 sps:$4 sm:$0xff]  }
 0x358   :  { %v2693_v54 = vpop.f32.mrf.mxu1  ;;  %v2746_v55 = vpop.f32.mrf.mxu0  ;;  %v3095_v18 = vadd.f32 %v3048_v37, %v3021_v45  ;;  %v6700_v45 = vld [vmem:[#allocation16 + $0x5e0] ss:$16 sps:$4 sm:$0xff]   ;;  %v6705_v27 = vld [vmem:[#allocation16 + $0x5c4] ss:$16 sps:$4 sm:$0xff]  }
 0x359   :  { %v3156_v56 = vrot.slane %v3155_v49, 4  ;;  %v3162_v57 = vmax.f32 %v3112_v48, %v3120_v50  ;;  %v3029_v58 = vmul.f32 %v7691_v1, %v2745_v53  ;;  %v2747_v21 = vadd.f32 %v2746_v55, %v2693_v54  ;;  %v6696_v1 = vld [vmem:[#allocation16 + $0x424] ss:$16 sps:$4 sm:$0xff]  }
 0x35a   :  { %4951 = vmatpush1.bf16.msra.mxu1 %v6685_v47  ;;  %v3096_v33 = vadd.f32 %v3052_v3, %v3022_v52  ;;  %v3127_v39 = vmax.f32 %v3095_v18, 0.0  ;;  %v6703_v52 = vld [vmem:[#allocation16 + $0x5c0] ss:$16 sps:$4 sm:$0xff]   ;;  %v6708_v53 = vld [vmem:[#allocation16 + $0x5a4] ss:$16 sps:$4 sm:$0xff]  }
 0x35b   :  { %v3157_v61 = vmax.f32 %v3155_v49, %v3156_v56  ;;  %v3163_v24 = vrot.slane %v3162_v57, 4  ;;  %4952 = vmatprep.subr.bf16.mxu1 %v6690_v51  ;;  %v3103_v35 = vadd.f32 %v3048_v37, %v3029_v58  ;;  %v3030_v43 = vmul.f32 %v7697_v63, %v2747_v21  ;;  %v6694_v37 = vld [vmem:[#allocation16 + $0x420] ss:$16 sps:$4 sm:$0xff]   ;;  %v6699_v63 = vld [vmem:[#allocation16 + $0x404] ss:$16 sps:$4 sm:$0xff]  }
 0x35c   :  { %v3128_v42 = vmax.f32 %v3096_v33, 0.0  ;;  %v6706_v58 = vld [vmem:[#allocation16 + $0x5a0] ss:$16 sps:$4 sm:$0xff]  }
 0x35d   :  { %v3158_v44 = vrot.slane %v3157_v61, 2  ;;  %v3164_v0 = vmax.f32 %v3162_v57, %v3163_v24  ;;  %v3135_v8 = vmax.f32 %v3103_v35, 0.0  ;;  %v3104_v12 = vadd.f32 %v3052_v3, %v3030_v43  ;;  %v6709_v35 = vld [vmem:[#allocation16 + $0x580] ss:$16 sps:$4 sm:$0xff]   ;;  %v6732_v43 = vld [vmem:[#allocation16 + $0x6c4] ss:$16 sps:$4 sm:$0xff]  }
 0x35e   :  { %4953 = vmatpush1.bf16.msra.mxu1 %v6688_v7  ;;  %v6711_v7 = vld [vmem:[#allocation16 + $0x584] ss:$16 sps:$4 sm:$0xff]  }
 0x35f   :  { %v3165_v11 = vrot.slane %v3164_v0, 2  ;;  %4954 = vmatprep.subr.bf16.mxu1 %v6693_v26  ;;  %v3211_v5 = vmax.f32 %v3127_v39, %v3135_v8  ;;  %v3136_v6 = vmax.f32 %v3104_v12, 0.0  ;;  %v3159_v10 = vmax.f32 %v3157_v61, %v3158_v44  ;;  %v6724_v26 = vld [vmem:[#allocation16 + $0x6e0] ss:$16 sps:$4 sm:$0xff]   ;;  %v6714_v44 = vld [vmem:[#allocation16 + $0x564] ss:$16 sps:$4 sm:$0xff]  }
 0x360   :  { %v6712_v39 = vld [vmem:[#allocation16 + $0x560] ss:$16 sps:$4 sm:$0xff]   ;;  %v6738_v8 = vld [vmem:[#allocation16 + $0x6a4] ss:$16 sps:$4 sm:$0xff]  }
 0x361   :  { %v3166_v22 = vmax.f32 %v3164_v0, %v3165_v11  ;;  %v3212_v25 = vrot.slane %v3211_v5, 4  ;;  %v3218_v14 = vmax.f32 %v3128_v42, %v3136_v6  ;;  %v3160_v38 = vrot.slane %v3159_v10, 1  ;;  %v6730_v0 = vld [vmem:[#allocation16 + $0x6c0] ss:$16 sps:$4 sm:$0xff]   ;;  %v6717_v12 = vld [vmem:[#allocation16 + $0x544] ss:$16 sps:$4 sm:$0xff]  }
 0x362   :  { %4955 = vmatpush1.bf16.msra.mxu1 %v6691_v9  ;;  %v6736_v9 = vld [vmem:[#allocation16 + $0x6a0] ss:$16 sps:$4 sm:$0xff]   ;;  %v6720_v42 = vld [vmem:[#allocation16 + $0x524] ss:$16 sps:$4 sm:$0xff]  }
 0x363   :  { %4956 = vmatprep.subr.bf16.mxu1 %v6696_v1  ;;  %v3213_v23 = vmax.f32 %v3211_v5, %v3212_v25  ;;  %v3219_v36 = vrot.slane %v3218_v14, 4  ;;  %v3167_v2 = vrot.slane %v3166_v22, 1  ;;  %v3161_v40 = vmax.f32 %v3159_v10, %v3160_v38  ;;  %v6715_v11 = vld [vmem:[#allocation16 + $0x540] ss:$16 sps:$4 sm:$0xff]   ;;  %v6744_v1 = vld [vmem:[#allocation16 + $0x684] ss:$16 sps:$4 sm:$0xff]  }
 0x364   :  { %v6742_v5 = vld [vmem:[#allocation16 + $0x680] ss:$16 sps:$4 sm:$0xff]   ;;  %v6750_v10 = vld [vmem:[#allocation16 + $0x664] ss:$16 sps:$4 sm:$0xff]  }
 0x365   :  { %v3214_v3 = vrot.slane %v3213_v23, 2  ;;  %v3220_v13 = vmax.f32 %v3218_v14, %v3219_v36  ;;  %v3168_v20 = vmax.f32 %v3166_v22, %v3167_v2  ;;  %v3255_v48 = vpack.c.bf16 %v3161_v40, %v3161_v40  ;;  %v6718_v6 = vld [vmem:[#allocation16 + $0x520] ss:$16 sps:$4 sm:$0xff]   ;;  %v6723_v22 = vld [vmem:[#allocation16 + $0x504] ss:$16 sps:$4 sm:$0xff]  }
 0x366   :  { %4957 = vmatpush1.bf16.msra.mxu1 %v6694_v37  ;;  %v6748_v25 = vld [vmem:[#allocation16 + $0x660] ss:$16 sps:$4 sm:$0xff]   ;;  %v2981_v14 = vsub.s32 4, %v7479_v28  ;;  %v2985_v36 = vsub.s32 5, %v7479_v28 }
 0x367   :  { %4958 = vmatprep.subr.bf16.mxu1 %v6699_v63  ;;  %v3215_v34 = vmax.f32 %v3213_v23, %v3214_v3  ;;  %v3221_v19 = vrot.slane %v3220_v13, 2  ;;  %v3256_v51 = vpack.c.bf16 %v3168_v20, %v3168_v20  ;;  %v3543_v56 = vunpack.c.l.b16 %v3255_v48  ;;  %v6721_v37 = vld [vmem:[#allocation16 + $0x500] ss:$16 sps:$4 sm:$0xff]   ;;  %v6756_v63 = vld [vmem:[#allocation16 + $0x644] ss:$16 sps:$4 sm:$0xff]  }
 0x368   :  { %v6729_v23 = vld [vmem:[#allocation16 + $0xec] ss:$16 sps:$4 sm:$0xff]   ;;  %v6754_v38 = vld [vmem:[#allocation16 + $0x640] ss:$16 sps:$4 sm:$0xff]   ;;  %v7723_v3 = vrot.slane %v7649_v60, %v2981_v14  ;;  %v3056_v20 = vrot.slane %v7662_v59, %v2981_v14 }
 0x369   :  { %v3216_v41 = vrot.slane %v3215_v34, 1  ;;  %v3222_v4 = vmax.f32 %v3220_v13, %v3221_v19  ;;  %v3544_v57 = vunpack.c.l.b16 %v3256_v51  ;;  %v6762_v13 = vld [vmem:[#allocation16 + $0x624] ss:$16 sps:$4 sm:$0xff]   ;;  %v6778_v14 = vld [vmem:[#allocation16 + $0x7c0] ss:$16 sps:$4 sm:$0xff]  }
 0x36a   :  { %4959 = vmatpush1.bf16.msra.mxu1 %v6697_v31 }
 0x36b   :  { %4960 = vmatprep.subr.bf16.mxu1 %v6702_v32  ;;  %v3217_v46 = vmax.f32 %v3215_v34, %v3216_v41  ;;  %v3223_v47 = vrot.slane %v3222_v4, 1  ;;  %v7726_v34 = vrot.slane %v7649_v60, %v2985_v36  ;;  %v6760_v41 = vld [vmem:[#allocation16 + $0x620] ss:$16 sps:$4 sm:$0xff]  }
 0x36d   :  { %v3263_v49 = vpack.c.bf16 %v3217_v46, %v3217_v46  ;;  %v3224_v50 = vmax.f32 %v3222_v4, %v3223_v47 }
 0x36e   :  { %4961 = vmatpush2.bf16.msra.mxu1 %v6700_v45 }
 0x36f   :  { %4962 = vmatprep.subr.bf16.mxu1 %v6705_v27  ;;  %v3551_v54 = vunpack.c.l.b16 %v3263_v49  ;;  %v3264_v55 = vpack.c.bf16 %v3224_v50, %v3224_v50  ;;  %v6768_v27 = vld [vmem:[#allocation16 + $0x604] ss:$16 sps:$4 sm:$0xff]   ;;  %v3060_v49 = vrot.slane %v7662_v59, %v2985_v36 }
 0x371   :  { %v3552_v18 = vunpack.c.l.b16 %v3264_v55  ;;  %v3560_v21 = vsel %vm3557_vm0, %v3551_v54, %v3543_v56  ;;  %v6774_v56 = vld [vmem:[#allocation16 + $0x7e4] ss:$16 sps:$4 sm:$0xff]  }
 0x372   :  { %4963 = vmatpush2.bf16.msra.mxu1 %v6703_v52  ;;  %v7716_v33 = vpack.c.b16 %v3560_v21, %v3560_v21  ;;  %v6766_v52 = vld [vmem:[#allocation16 + $0x600] ss:$16 sps:$4 sm:$0xff]  }
 0x373   :  { %4964 = vmatprep.subr.bf16.mxu1 %v6708_v53  ;;  %v3561_v61 = vsel %vm3557_vm0, %v3552_v18, %v3544_v57 }
 0x374   :  { %v7714_v24 = vpack.c.b16 %v3561_v61, %v3561_v61 }
 0x376   :  { %4965 = vmatpush2.bf16.msra.mxu1 %v6706_v58  ;;  %4935 = vmatprep.mubr.bf16.mxu0 %v7714_v24 }
 0x377   :  { %4966 = vmatprep.subr.bf16.mxu1 %v6711_v7  ;;  %4936 = vmatmul.mubr.bf16.vlgmr.msra.gmra.mxu0 %v7716_v33 }
 0x378   :  { %4986 = vmatpush1.bf16.msra.mxu0 %v6724_v26 }
 0x379   :  { %4987 = vmatprep.subr.bf16.mxu0 %v6732_v43 }
 0x37a   :  { %4967 = vmatpush2.bf16.msra.mxu1 %v6709_v35  ;;  %v6772_v35 = vld [vmem:[#allocation16 + $0x7e0] ss:$16 sps:$4 sm:$0xff]  }
 0x37b   :  { %4968 = vmatprep.subr.bf16.mxu1 %v6714_v44 }
 0x37c   :  { %4988 = vmatpush1.bf16.msra.mxu0 %v6730_v0 }
 0x37d   :  { %4989 = vmatprep.subr.bf16.mxu0 %v6738_v8  ;;  %v6780_v8 = vld [vmem:[#allocation16 + $0x7c4] ss:$16 sps:$4 sm:$0xff]  }
 0x37e   :  { %4969 = vmatpush2.bf16.msra.mxu1 %v6712_v39 }
 0x37f   :  { %4970 = vmatprep.subr.bf16.mxu1 %v6717_v12 }
 0x380   :  { %4990 = vmatpush1.bf16.msra.mxu0 %v6736_v9 }
 0x381   :  { %4991 = vmatprep.subr.bf16.mxu0 %v6744_v1 }
 0x382   :  { %4971 = vmatpush2.bf16.msra.mxu1 %v6715_v11 }
 0x383   :  { %4972 = vmatprep.subr.bf16.mxu1 %v6720_v42 }
 0x384   :  { %4992 = vmatpush1.bf16.msra.mxu0 %v6742_v5 }
 0x385   :  { %4993 = vmatprep.subr.bf16.mxu0 %v6750_v10 }
 0x386   :  { %4973 = vmatpush2.bf16.msra.mxu1 %v6718_v6 }
 0x387   :  { %4974 = vmatprep.subr.bf16.mxu1 %v6723_v22 }
 0x388   :  { %4994 = vmatpush1.bf16.msra.mxu0 %v6748_v25 }
 0x389   :  { %4995 = vmatprep.subr.bf16.mxu0 %v6756_v63 }
 0x38a   :  { %4975 = vmatpush2.bf16.msra.mxu1 %v6721_v37 }
 0x38b   :  { %v2783_v2 = vpop.f32.mrf.mxu1  ;;  %v2836_v31 = vpop.f32.mrf.mxu0  ;;  %5026 = vmatprep.subr.bf16.mxu1 %v6729_v23  ;;  %v6786_v23 = vld [vmem:[#allocation16 + $0x7a4] ss:$16 sps:$4 sm:$0xff]  }
 0x38c   :  { %v2837_v32 = vadd.f32 %v2836_v31, %v2783_v2  ;;  %4996 = vmatpush1.bf16.msra.mxu0 %v6754_v38 }
 0x38d   :  { %v2785_v19 = vpop.f32.mrf.mxu1  ;;  %v2838_v40 = vpop.f32.mrf.mxu0  ;;  %4997 = vmatprep.subr.bf16.mxu0 %v6762_v13 }
 0x38e   :  { %v3007_v4 = vmul.f32 %v7723_v3, %v2837_v32  ;;  %v2839_v45 = vadd.f32 %v2838_v40, %v2785_v19 }
 0x38f   :  { %v2787_v46 = vpop.f32.mrf.mxu1  ;;  %v2840_v47 = vpop.f32.mrf.mxu0 }
 0x390   :  { %v3008_v48 = vmul.f32 %v7726_v34, %v2839_v45  ;;  %v2841_v50 = vadd.f32 %v2840_v47, %v2787_v46  ;;  %4998 = vmatpush1.bf16.msra.mxu0 %v6760_v41  ;;  %v3081_v53 = vadd.f32 %v3056_v20, %v3007_v4  ;;  %v6784_v41 = vld [vmem:[#allocation16 + $0x7a0] ss:$16 sps:$4 sm:$0xff]  }
 0x391   :  { %v2789_v60 = vpop.f32.mrf.mxu1  ;;  %v2842_v51 = vpop.f32.mrf.mxu0  ;;  %4999 = vmatprep.subr.bf16.mxu0 %v6768_v27  ;;  %v6792_v27 = vld [vmem:[#allocation16 + $0x784] ss:$16 sps:$4 sm:$0xff]  }
 0x392   :  { %v3015_v54 = vmul.f32 %v7723_v3, %v2841_v50  ;;  %v2843_v55 = vadd.f32 %v2842_v51, %v2789_v60  ;;  %v3082_v58 = vadd.f32 %v3060_v49, %v3008_v48  ;;  %v3113_v43 = vmax.f32 %v3081_v53, 0.0 }
 0x393   :  { %v2793_v57 = vpop.f32.mrf.mxu1  ;;  %v2846_v18 = vpop.f32.mrf.mxu0 }
 0x394   :  { %v3089_v21 = vadd.f32 %v3056_v20, %v3015_v54  ;;  %v3016_v7 = vmul.f32 %v7726_v34, %v2843_v55  ;;  %v2847_v61 = vadd.f32 %v2846_v18, %v2793_v57  ;;  %5000 = vmatpush1.bf16.msra.mxu0 %v6766_v52  ;;  %v3114_v1 = vmax.f32 %v3082_v58, 0.0  ;;  %v6790_v52 = vld [vmem:[#allocation16 + $0x780] ss:$16 sps:$4 sm:$0xff]  }
 0x395   :  { %v2795_v26 = vpop.f32.mrf.mxu1  ;;  %v2848_v59 = vpop.f32.mrf.mxu0  ;;  %5001 = vmatprep.subr.bf16.mxu0 %v6774_v56  ;;  %v6796_v18 = vld [vmem:[#allocation16 + $0x760] ss:$16 sps:$4 sm:$0xff]  }
 0x396   :  { %v3121_v44 = vmax.f32 %v3089_v21, 0.0  ;;  %v3090_v0 = vadd.f32 %v3060_v49, %v3016_v7  ;;  %v2849_v39 = vadd.f32 %v2848_v59, %v2795_v26  ;;  %v3023_v12 = vmul.f32 %v7723_v3, %v2847_v61  ;;  %v6804_v21 = vld [vmem:[#allocation16 + $0x744] ss:$16 sps:$4 sm:$0xff]  }
 0x397   :  { %v2797_v9 = vpop.f32.mrf.mxu1  ;;  %v2850_v11 = vpop.f32.mrf.mxu0 }
 0x398   :  { %v3169_v42 = vmax.f32 %v3113_v43, %v3121_v44  ;;  %v3122_v5 = vmax.f32 %v3090_v0, 0.0  ;;  %v3024_v6 = vmul.f32 %v7726_v34, %v2849_v39  ;;  %v2851_v10 = vadd.f32 %v2850_v11, %v2797_v9  ;;  %5002 = vmatpush2.bf16.msra.mxu0 %v6772_v35  ;;  %v6802_v35 = vld [vmem:[#allocation16 + $0x740] ss:$16 sps:$4 sm:$0xff]   ;;  %v6810_v44 = vld [vmem:[#allocation16 + $0x724] ss:$16 sps:$4 sm:$0xff]  }
 0x399   :  { %v2799_v22 = vpop.f32.mrf.mxu1  ;;  %v2852_v25 = vpop.f32.mrf.mxu0  ;;  %5003 = vmatprep.subr.bf16.mxu0 %v6780_v8  ;;  %v3097_v36 = vadd.f32 %v3056_v20, %v3023_v12  ;;  %v6808_v11 = vld [vmem:[#allocation16 + $0x720] ss:$16 sps:$4 sm:$0xff]  }
 0x39a   :  { %v3170_v37 = vrot.slane %v3169_v42, 4  ;;  %v3176_v63 = vmax.f32 %v3114_v1, %v3122_v5  ;;  %v3031_v38 = vmul.f32 %v7723_v3, %v2851_v10  ;;  %v2853_v13 = vadd.f32 %v2852_v25, %v2799_v22 }
 0x39b   :  { %v3098_v32 = vadd.f32 %v3060_v49, %v3024_v6  ;;  %v3129_v46 = vmax.f32 %v3097_v36, 0.0 }
 0x39c   :  { %v3171_v2 = vmax.f32 %v3169_v42, %v3170_v37  ;;  %v3177_v31 = vrot.slane %v3176_v63, 4  ;;  %v3105_v19 = vadd.f32 %v3056_v20, %v3031_v38  ;;  %v3032_v40 = vmul.f32 %v7726_v34, %v2853_v13  ;;  %5004 = vmatpush2.bf16.msra.mxu0 %v6778_v14  ;;  %v6798_v20 = vld [vmem:[#allocation16 + $0x764] ss:$16 sps:$4 sm:$0xff]   ;;  %v6814_v14 = vld [vmem:[#allocation16 + $0x700] ss:$16 sps:$4 sm:$0xff]  }
 0x39d   :  { %5005 = vmatprep.subr.bf16.mxu0 %v6786_v23  ;;  %v3130_v60 = vmax.f32 %v3098_v32, 0.0  ;;  %v6816_v42 = vld [vmem:[#allocation16 + $0x704] ss:$16 sps:$4 sm:$0xff]  }
 0x39e   :  { %v3172_v4 = vrot.slane %v3171_v2, 2  ;;  %v3178_v45 = vmax.f32 %v3176_v63, %v3177_v31  ;;  %v3137_v47 = vmax.f32 %v3105_v19, 0.0  ;;  %v3106_v48 = vadd.f32 %v3060_v49, %v3032_v40  ;;  %v6822_v63 = vld [vmem:[#allocation16 + $0x2ec] ss:$16 sps:$4 sm:$0xff]   ;;  %v6727_v31 = vld [vmem:[#allocation16 + $0xe8] ss:$16 sps:$4 sm:$0xff]  }
 0x39f   :  { %v6735_v19 = vld [vmem:[#allocation16 + $0xcc] ss:$16 sps:$4 sm:$0xff]   ;;  %v6733_v40 = vld [vmem:[#allocation16 + $0xc8] ss:$16 sps:$4 sm:$0xff]  }
 0x3a0   :  { %v3179_v50 = vrot.slane %v3178_v45, 2  ;;  %v3225_v51 = vmax.f32 %v3129_v46, %v3137_v47  ;;  %v3138_v3 = vmax.f32 %v3106_v48, 0.0  ;;  %5006 = vmatpush2.bf16.msra.mxu0 %v6784_v41  ;;  %v3173_v53 = vmax.f32 %v3171_v2, %v3172_v4  ;;  %v6741_v41 = vld [vmem:[#allocation16 + $0xac] ss:$16 sps:$4 sm:$0xff]   ;;  %v6739_v4 = vld [vmem:[#allocation16 + $0xa8] ss:$16 sps:$4 sm:$0xff]  }
 0x3a1   :  { %5007 = vmatprep.subr.bf16.mxu0 %v6792_v27  ;;  %v6745_v27 = vld [vmem:[#allocation16 + $0x88] ss:$16 sps:$4 sm:$0xff]   ;;  %v6753_v46 = vld [vmem:[#allocation16 + $0x6c] ss:$16 sps:$4 sm:$0xff]   ;;  %v2989_v48 = vsub.s32 6, %v7479_v28 }
 0x3a2   :  { %v3180_v54 = vmax.f32 %v3178_v45, %v3179_v50  ;;  %v3226_v34 = vrot.slane %v3225_v51, 4  ;;  %v3232_v55 = vmax.f32 %v3130_v60, %v3138_v3  ;;  %v3174_v58 = vrot.slane %v3173_v53, 1  ;;  %v6747_v45 = vld [vmem:[#allocation16 + $0x8c] ss:$16 sps:$4 sm:$0xff]   ;;  %v6751_v47 = vld [vmem:[#allocation16 + $0x68] ss:$16 sps:$4 sm:$0xff]  }
 0x3a3   :  { %v6759_v50 = vld [vmem:[#allocation16 + $0x4c] ss:$16 sps:$4 sm:$0xff]   ;;  %v2993_v60 = vsub.s32 7, %v7479_v28 }
 0x3a4   :  { %v3227_v56 = vmax.f32 %v3225_v51, %v3226_v34  ;;  %v3233_v57 = vrot.slane %v3232_v55, 4  ;;  %5008 = vmatpush2.bf16.msra.mxu0 %v6790_v52  ;;  %v3181_v61 = vrot.slane %v3180_v54, 1  ;;  %v3175_v43 = vmax.f32 %v3173_v53, %v3174_v58  ;;  %v7060_v51 = vld [vmem:[%s7841_s8] sm:$0xff]  ;;  %v6765_v52 = vld [vmem:[#allocation16 + $0x2c] ss:$16 sps:$4 sm:$0xff]  }
 0x3a5   :  { %5009 = vmatprep.subr.bf16.mxu0 %v6798_v20  ;;  %v7752_v3 = vrot.slane %v7060_v51, %v2989_v48  ;;  %v7754_v34 = vrot.slane %v7060_v51, %v2993_v60 }
 0x3a6   :  { %v3228_v49 = vrot.slane %v3227_v56, 2  ;;  %v3234_v7 = vmax.f32 %v3232_v55, %v3233_v57  ;;  %v3182_v8 = vmax.f32 %v3180_v54, %v3181_v61  ;;  %v3257_v1 = vpack.c.bf16 %v3175_v43, %v3175_v43  ;;  %v6763_v57 = vld [vmem:[#allocation16 + $0x28] ss:$16 sps:$4 sm:$0xff]  }
 0x3a8   :  { %v3229_v26 = vmax.f32 %v3227_v56, %v3228_v49  ;;  %v3235_v59 = vrot.slane %v3234_v7, 2  ;;  %5010 = vmatpush2.bf16.msra.mxu0 %v6796_v18  ;;  %v3258_v6 = vpack.c.bf16 %v3182_v8, %v3182_v8  ;;  %v3545_v37 = vunpack.c.l.b16 %v3257_v1  ;;  %v7061_v18 = vld [vmem:[%s7842_s9] sm:$0xff]  ;;  %v6771_v49 = vld [vmem:[#allocation16 + $0xc] ss:$16 sps:$4 sm:$0xff]  }
 0x3a9   :  { %5011 = vmatprep.subr.bf16.mxu0 %v6804_v21  ;;  %v3064_v58 = vrot.slane %v7061_v18, %v2989_v48  ;;  %v6781_v48 = vld [vmem:[#allocation16 + $0x1c8] ss:$16 sps:$4 sm:$0xff]  }
 0x3aa   :  { %v3230_v0 = vrot.slane %v3229_v26, 1  ;;  %v3236_v39 = vmax.f32 %v3234_v7, %v3235_v59  ;;  %v3546_v23 = vunpack.c.l.b16 %v3258_v6  ;;  %v3068_v59 = vrot.slane %v7061_v18, %v2993_v60 }
 0x3ac   :  { %v3231_v12 = vmax.f32 %v3229_v26, %v3230_v0  ;;  %v3237_v9 = vrot.slane %v3236_v39, 1  ;;  %5012 = vmatpush2.bf16.msra.mxu0 %v6802_v35  ;;  %v6769_v0 = vld [vmem:[#allocation16 + $0x8] ss:$16 sps:$4 sm:$0xff]  }
 0x3ad   :  { %5013 = vmatprep.subr.bf16.mxu0 %v6810_v44 }
 0x3ae   :  { %v3238_v5 = vmax.f32 %v3236_v39, %v3237_v9  ;;  %v3265_v10 = vpack.c.bf16 %v3231_v12, %v3231_v12  ;;  %v6777_v9 = vld [vmem:[#allocation16 + $0x1ec] ss:$16 sps:$4 sm:$0xff]  }
 0x3b0   :  { %v3266_v22 = vpack.c.bf16 %v3238_v5, %v3238_v5  ;;  %v3553_v25 = vunpack.c.l.b16 %v3265_v10  ;;  %5014 = vmatpush2.bf16.msra.mxu0 %v6808_v11 }
 0x3b1   :  { %5015 = vmatprep.subr.bf16.mxu0 %v6816_v42 }
 0x3b2   :  { %v3554_v36 = vunpack.c.l.b16 %v3266_v22  ;;  %v3562_v38 = vsel %vm3557_vm0, %v3553_v25, %v3545_v37 }
 0x3b3   :  { %v7742_v32 = vpack.c.b16 %v3562_v38, %v3562_v38  ;;  %v6783_v38 = vld [vmem:[#allocation16 + $0x1cc] ss:$16 sps:$4 sm:$0xff]  }
 0x3b4   :  { %v3563_v13 = vsel %vm3557_vm0, %v3554_v36, %v3546_v23  ;;  %5016 = vmatpush2.bf16.msra.mxu0 %v6814_v14  ;;  %v6775_v14 = vld [vmem:[#allocation16 + $0x1e8] ss:$16 sps:$4 sm:$0xff]  }
 0x3b5   :  { %v7740_v2 = vpack.c.b16 %v3563_v13, %v3563_v13  ;;  %5067 = vmatprep.subr.bf16.mxu0 %v6822_v63 }
 0x3b7   :  { %4976 = vmatprep.mubr.bf16.mxu1 %v7740_v2 }
 0x3b8   :  { %4977 = vmatmul.mubr.bf16.vlgmr.msra.gmra.mxu1 %v7742_v32 }
 0x3b9   :  { %5027 = vmatpush1.bf16.msra.mxu1 %v6727_v31  ;;  %5058 = vmatprep.mubr.bf16.mxu1 %v7685_v16  ;;  %v6757_v16 = vld [vmem:[#allocation16 + $0x48] ss:$16 sps:$4 sm:$0xff]  }
 0x3ba   :  { %5028 = vmatprep.subr.bf16.mxu1 %v6735_v19 }
 0x3bd   :  { %5029 = vmatpush1.bf16.msra.mxu1 %v6733_v40 }
 0x3be   :  { %5030 = vmatprep.subr.bf16.mxu1 %v6741_v41 }
 0x3c1   :  { %5031 = vmatpush1.bf16.msra.mxu1 %v6739_v4 }
 0x3c2   :  { %5032 = vmatprep.subr.bf16.mxu1 %v6747_v45 }
 0x3c5   :  { %5033 = vmatpush1.bf16.msra.mxu1 %v6745_v27 }
 0x3c6   :  { %5034 = vmatprep.subr.bf16.mxu1 %v6753_v46 }
 0x3c9   :  { %5035 = vmatpush1.bf16.msra.mxu1 %v6751_v47 }
 0x3ca   :  { %5036 = vmatprep.subr.bf16.mxu1 %v6759_v50 }
 0x3cc   :  { %v2889_v53 = vpop.f32.mrf.mxu1  ;;  %v2942_v20 = vpop.f32.mrf.mxu0 }
 0x3cd   :  { %v2943_v54 = vadd.f32 %v2942_v20, %v2889_v53  ;;  %5037 = vmatpush1.bf16.msra.mxu1 %v6757_v16  ;;  %v6789_v16 = vld [vmem:[#allocation16 + $0x1ac] ss:$16 sps:$4 sm:$0xff]  }
 0x3ce   :  { %v2891_v55 = vpop.f32.mrf.mxu1  ;;  %v2944_v56 = vpop.f32.mrf.mxu0  ;;  %5038 = vmatprep.subr.bf16.mxu1 %v6765_v52 }
 0x3cf   :  { %v3009_v28 = vmul.f32 %v7752_v3, %v2943_v54  ;;  %v2945_v21 = vadd.f32 %v2944_v56, %v2891_v55 }
 0x3d0   :  { %v2893_v7 = vpop.f32.mrf.mxu1  ;;  %v2946_v61 = vpop.f32.mrf.mxu0 }
 0x3d1   :  { %v3010_v26 = vmul.f32 %v7754_v34, %v2945_v21  ;;  %v2947_v35 = vadd.f32 %v2946_v61, %v2893_v7  ;;  %5039 = vmatpush1.bf16.msra.mxu1 %v6763_v57  ;;  %v3083_v39 = vadd.f32 %v3064_v58, %v3009_v28  ;;  %v6787_v28 = vld [vmem:[#allocation16 + $0x1a8] ss:$16 sps:$4 sm:$0xff]  }
 0x3d2   :  { %v2895_v43 = vpop.f32.mrf.mxu1  ;;  %v2948_v44 = vpop.f32.mrf.mxu0  ;;  %5040 = vmatprep.subr.bf16.mxu1 %v6771_v49  ;;  %v6795_v49 = vld [vmem:[#allocation16 + $0x18c] ss:$16 sps:$4 sm:$0xff]  }
 0x3d3   :  { %v3017_v8 = vmul.f32 %v7752_v3, %v2947_v35  ;;  %v2949_v12 = vadd.f32 %v2948_v44, %v2895_v43  ;;  %v3084_v42 = vadd.f32 %v3068_v59, %v3010_v26  ;;  %v3115_v37 = vmax.f32 %v3083_v39, 0.0 }
 0x3d4   :  { %v2899_v11 = vpop.f32.mrf.mxu1  ;;  %v2952_v1 = vpop.f32.mrf.mxu0 }
 0x3d5   :  { %v3091_v5 = vadd.f32 %v3064_v58, %v3017_v8  ;;  %v3018_v6 = vmul.f32 %v7754_v34, %v2949_v12  ;;  %v2953_v10 = vadd.f32 %v2952_v1, %v2899_v11  ;;  %5041 = vmatpush1.bf16.msra.mxu1 %v6769_v0  ;;  %v3116_v40 = vmax.f32 %v3084_v42, 0.0  ;;  %v6793_v0 = vld [vmem:[#allocation16 + $0x188] ss:$16 sps:$4 sm:$0xff]  }
 0x3d6   :  { %v2901_v22 = vpop.f32.mrf.mxu1  ;;  %v2954_v25 = vpop.f32.mrf.mxu0  ;;  %5042 = vmatprep.subr.bf16.mxu1 %v6777_v9  ;;  %v6799_v1 = vld [vmem:[#allocation16 + $0x168] ss:$16 sps:$4 sm:$0xff]  }
 0x3d7   :  { %v3123_v63 = vmax.f32 %v3091_v5, 0.0  ;;  %v3092_v23 = vadd.f32 %v3068_v59, %v3018_v6  ;;  %v2955_v36 = vadd.f32 %v2954_v25, %v2901_v22  ;;  %v3025_v13 = vmul.f32 %v7752_v3, %v2953_v10  ;;  %v6807_v5 = vld [vmem:[#allocation16 + $0x14c] ss:$16 sps:$4 sm:$0xff]  }
 0x3d8   :  { %v2903_v31 = vpop.f32.mrf.mxu1  ;;  %v2956_v19 = vpop.f32.mrf.mxu0 }
 0x3d9   :  { %v3183_v41 = vmax.f32 %v3115_v37, %v3123_v63  ;;  %v3124_v4 = vmax.f32 %v3092_v23, 0.0  ;;  %v3026_v45 = vmul.f32 %v7754_v34, %v2955_v36  ;;  %v2957_v27 = vadd.f32 %v2956_v19, %v2903_v31  ;;  %5043 = vmatpush2.bf16.msra.mxu1 %v6775_v14  ;;  %v6805_v14 = vld [vmem:[#allocation16 + $0x148] ss:$16 sps:$4 sm:$0xff]   ;;  %v6813_v63 = vld [vmem:[#allocation16 + $0x12c] ss:$16 sps:$4 sm:$0xff]  }
 0x3da   :  { %v2905_v46 = vpop.f32.mrf.mxu1  ;;  %v2958_v47 = vpop.f32.mrf.mxu0  ;;  %5044 = vmatprep.subr.bf16.mxu1 %v6783_v38  ;;  %v3099_v51 = vadd.f32 %v3064_v58, %v3025_v13  ;;  %v6811_v31 = vld [vmem:[#allocation16 + $0x128] ss:$16 sps:$4 sm:$0xff]  }
 0x3db   :  { %v3184_v50 = vrot.slane %v3183_v41, 4  ;;  %v3190_v60 = vmax.f32 %v3116_v40, %v3124_v4  ;;  %v3033_v52 = vmul.f32 %v7752_v3, %v2957_v27  ;;  %v2959_v53 = vadd.f32 %v2958_v47, %v2905_v46  ;;  %v6819_v40 = vld [vmem:[#allocation16 + $0x10c] ss:$16 sps:$4 sm:$0xff]   ;;  %v6817_v46 = vld [vmem:[#allocation16 + $0x108] ss:$16 sps:$4 sm:$0xff]  }
 0x3dc   :  { %v3100_v55 = vadd.f32 %v3068_v59, %v3026_v45  ;;  %v3131_v7 = vmax.f32 %v3099_v51, 0.0 }
 0x3dd   :  { %v3185_v20 = vmax.f32 %v3183_v41, %v3184_v50  ;;  %v3191_v54 = vrot.slane %v3190_v60, 4  ;;  %v3107_v56 = vadd.f32 %v3064_v58, %v3033_v52  ;;  %v3034_v57 = vmul.f32 %v7754_v34, %v2959_v53  ;;  %5045 = vmatpush2.bf16.msra.mxu1 %v6781_v48  ;;  %v6801_v58 = vld [vmem:[#allocation16 + $0x16c] ss:$16 sps:$4 sm:$0xff]  }
 0x3de   :  { %5046 = vmatprep.subr.bf16.mxu1 %v6789_v16  ;;  %v3132_v43 = vmax.f32 %v3100_v55, 0.0  ;;  %v6825_v50 = vld [vmem:[#allocation16 + $0x4ec] ss:$16 sps:$4 sm:$0xff]   ;;  %v6820_v55 = vld [vmem:[#allocation16 + $0x2e8] ss:$16 sps:$4 sm:$0xff]  }
 0x3df   :  { %v3186_v18 = vrot.slane %v3185_v20, 2  ;;  %v3192_v21 = vmax.f32 %v3190_v60, %v3191_v54  ;;  %v3139_v61 = vmax.f32 %v3107_v56, 0.0  ;;  %v3108_v26 = vadd.f32 %v3068_v59, %v3034_v57  ;;  %v6828_v57 = vld [vmem:[#allocation16 + $0x2cc] ss:$16 sps:$4 sm:$0xff]  }
 0x3e1   :  { %v3193_v35 = vrot.slane %v3192_v21, 2  ;;  %v3239_v44 = vmax.f32 %v3131_v7, %v3139_v61  ;;  %v3140_v3 = vmax.f32 %v3108_v26, 0.0  ;;  %5047 = vmatpush2.bf16.msra.mxu1 %v6787_v28  ;;  %v3187_v39 = vmax.f32 %v3185_v20, %v3186_v18  ;;  %v6823_v20 = vld [vmem:[#allocation16 + $0x4e8] ss:$16 sps:$4 sm:$0xff]   ;;  %v6831_v28 = vld [vmem:[#allocation16 + $0x4cc] ss:$16 sps:$4 sm:$0xff]  }
 0x3e2   :  { %5048 = vmatprep.subr.bf16.mxu1 %v6795_v49  ;;  %v6829_v18 = vld [vmem:[#allocation16 + $0x4c8] ss:$16 sps:$4 sm:$0xff]   ;;  %v6837_v49 = vld [vmem:[#allocation16 + $0x4ac] ss:$16 sps:$4 sm:$0xff]  }
 0x3e3   :  { %v3194_v8 = vmax.f32 %v3192_v21, %v3193_v35  ;;  %v3240_v34 = vrot.slane %v3239_v44, 4  ;;  %v3246_v12 = vmax.f32 %v3132_v43, %v3140_v3  ;;  %v3188_v42 = vrot.slane %v3187_v39, 1  ;;  %v6826_v21 = vld [vmem:[#allocation16 + $0x2c8] ss:$16 sps:$4 sm:$0xff]   ;;  %v6834_v7 = vld [vmem:[#allocation16 + $0x2ac] ss:$16 sps:$4 sm:$0xff]  }
 0x3e4   :  { %v6835_v61 = vld [vmem:[#allocation16 + $0x4a8] ss:$16 sps:$4 sm:$0xff]   ;;  %v6840_v35 = vld [vmem:[#allocation16 + $0x28c] ss:$16 sps:$4 sm:$0xff]  }
 0x3e5   :  { %v3241_v9 = vmax.f32 %v3239_v44, %v3240_v34  ;;  %v3247_v11 = vrot.slane %v3246_v12, 4  ;;  %5049 = vmatpush2.bf16.msra.mxu1 %v6793_v0  ;;  %v3195_v10 = vrot.slane %v3194_v8, 1  ;;  %v3189_v37 = vmax.f32 %v3187_v39, %v3188_v42  ;;  %v6832_v26 = vld [vmem:[#allocation16 + $0x2a8] ss:$16 sps:$4 sm:$0xff]   ;;  %v6846_v3 = vld [vmem:[#allocation16 + $0x26c] ss:$16 sps:$4 sm:$0xff]  }
 0x3e6   :  { %5050 = vmatprep.subr.bf16.mxu1 %v6801_v58  ;;  %v6841_v43 = vld [vmem:[#allocation16 + $0x488] ss:$16 sps:$4 sm:$0xff]   ;;  %v6855_v39 = vld [vmem:[#allocation16 + $0x44c] ss:$16 sps:$4 sm:$0xff]  }
 0x3e7   :  { %v3242_v59 = vrot.slane %v3241_v9, 2  ;;  %v3248_v6 = vmax.f32 %v3246_v12, %v3247_v11  ;;  %v3196_v38 = vmax.f32 %v3194_v8, %v3195_v10  ;;  %v3259_v41 = vpack.c.bf16 %v3189_v37, %v3189_v37  ;;  %v6838_v44 = vld [vmem:[#allocation16 + $0x288] ss:$16 sps:$4 sm:$0xff]   ;;  %v6852_v58 = vld [vmem:[#allocation16 + $0x24c] ss:$16 sps:$4 sm:$0xff]  }
 0x3e8   :  { %v6844_v0 = vld [vmem:[#allocation16 + $0x268] ss:$16 sps:$4 sm:$0xff]   ;;  %v6861_v12 = vld [vmem:[#allocation16 + $0x42c] ss:$16 sps:$4 sm:$0xff]  }
 0x3e9   :  { %v3243_v22 = vmax.f32 %v3241_v9, %v3242_v59  ;;  %v3249_v25 = vrot.slane %v3248_v6, 2  ;;  %5051 = vmatpush2.bf16.msra.mxu1 %v6799_v1  ;;  %v3260_v45 = vpack.c.bf16 %v3196_v38, %v3196_v38  ;;  %v3547_v60 = vunpack.c.l.b16 %v3259_v41  ;;  %v6853_v8 = vld [vmem:[#allocation16 + $0x448] ss:$16 sps:$4 sm:$0xff]   ;;  %v6858_v9 = vld [vmem:[#allocation16 + $0x22c] ss:$16 sps:$4 sm:$0xff]  }
 0x3ea   :  { %5052 = vmatprep.subr.bf16.mxu1 %v6807_v5  ;;  %v6850_v34 = vld [vmem:[#allocation16 + $0x248] ss:$16 sps:$4 sm:$0xff]   ;;  %v6867_v59 = vld [vmem:[#allocation16 + $0x40c] ss:$16 sps:$4 sm:$0xff]  }
 0x3eb   :  { %v3244_v23 = vrot.slane %v3243_v22, 1  ;;  %v3250_v36 = vmax.f32 %v3248_v6, %v3249_v25  ;;  %v3548_v16 = vunpack.c.l.b16 %v3260_v45  ;;  %v6859_v1 = vld [vmem:[#allocation16 + $0x428] ss:$16 sps:$4 sm:$0xff]   ;;  %v6864_v6 = vld [vmem:[#allocation16 + $0x20c] ss:$16 sps:$4 sm:$0xff]  }
 0x3ec   :  { %v6856_v5 = vld [vmem:[#allocation16 + $0x228] ss:$16 sps:$4 sm:$0xff]   ;;  %v6873_v37 = vld [vmem:[#allocation16 + $0x5ec] ss:$16 sps:$4 sm:$0xff]  }
 0x3ed   :  { %v3245_v13 = vmax.f32 %v3243_v22, %v3244_v23  ;;  %5053 = vmatpush2.bf16.msra.mxu1 %v6805_v14  ;;  %v3251_v19 = vrot.slane %v3250_v36, 1  ;;  %v6865_v22 = vld [vmem:[#allocation16 + $0x408] ss:$16 sps:$4 sm:$0xff]   ;;  %v6879_v38 = vld [vmem:[#allocation16 + $0x5cc] ss:$16 sps:$4 sm:$0xff]  }
 0x3ee   :  { %5054 = vmatprep.subr.bf16.mxu1 %v6813_v63  ;;  %v6862_v14 = vld [vmem:[#allocation16 + $0x208] ss:$16 sps:$4 sm:$0xff]   ;;  %v6870_v63 = vld [vmem:[#allocation16 + $0x3ec] ss:$16 sps:$4 sm:$0xff]  }
 0x3ef   :  { %v3252_v4 = vmax.f32 %v3250_v36, %v3251_v19  ;;  %v3267_v27 = vpack.c.bf16 %v3245_v13, %v3245_v13  ;;  %v6871_v23 = vld [vmem:[#allocation16 + $0x5e8] ss:$16 sps:$4 sm:$0xff]   ;;  %v6876_v13 = vld [vmem:[#allocation16 + $0x3cc] ss:$16 sps:$4 sm:$0xff]  }
 0x3f0   :  { %v6868_v36 = vld [vmem:[#allocation16 + $0x3e8] ss:$16 sps:$4 sm:$0xff]   ;;  %v6882_v41 = vld [vmem:[#allocation16 + $0x3ac] ss:$16 sps:$4 sm:$0xff]  }
 0x3f1   :  { %5055 = vmatpush2.bf16.msra.mxu1 %v6811_v31  ;;  %v3268_v47 = vpack.c.bf16 %v3252_v4, %v3252_v4  ;;  %v3555_v48 = vunpack.c.l.b16 %v3267_v27  ;;  %v6877_v31 = vld [vmem:[#allocation16 + $0x5c8] ss:$16 sps:$4 sm:$0xff]   ;;  %v6891_v27 = vld [vmem:[#allocation16 + $0x58c] ss:$16 sps:$4 sm:$0xff]  }
 0x3f2   :  { %5056 = vmatprep.subr.bf16.mxu1 %v6819_v40  ;;  %v6874_v19 = vld [vmem:[#allocation16 + $0x3c8] ss:$16 sps:$4 sm:$0xff]   ;;  %v6885_v40 = vld [vmem:[#allocation16 + $0x5ac] ss:$16 sps:$4 sm:$0xff]  }
 0x3f3   :  { %v3556_v51 = vunpack.c.l.b16 %v3268_v47  ;;  %v3564_v52 = vsel %vm3557_vm0, %v3555_v48, %v3547_v60  ;;  %v6883_v4 = vld [vmem:[#allocation16 + $0x5a8] ss:$16 sps:$4 sm:$0xff]   ;;  %v6894_v60 = vld [vmem:[#allocation16 + $0x36c] ss:$16 sps:$4 sm:$0xff]  }
 0x3f4   :  { %v7771_v56 = vpack.c.b16 %v3564_v52, %v3564_v52  ;;  %v6880_v45 = vld [vmem:[#allocation16 + $0x3a8] ss:$16 sps:$4 sm:$0xff]   ;;  %v6903_v52 = vld [vmem:[#allocation16 + $0x54c] ss:$16 sps:$4 sm:$0xff]  }
 0x3f5   :  { %5057 = vmatpush2.bf16.msra.mxu1 %v6817_v46  ;;  %v3565_v53 = vsel %vm3557_vm0, %v3556_v51, %v3548_v16  ;;  %v6888_v46 = vld [vmem:[#allocation16 + $0x38c] ss:$16 sps:$4 sm:$0xff]   ;;  %v6889_v47 = vld [vmem:[#allocation16 + $0x588] ss:$16 sps:$4 sm:$0xff]  }
 0x3f6   :  { %v7769_v54 = vpack.c.b16 %v3565_v53, %v3565_v53  ;;  %5108 = vmatprep.subr.bf16.mxu1 %v6825_v50  ;;  %v6886_v48 = vld [vmem:[#allocation16 + $0x388] ss:$16 sps:$4 sm:$0xff]   ;;  %v6897_v50 = vld [vmem:[#allocation16 + $0x56c] ss:$16 sps:$4 sm:$0xff]  }
 0x3f7   :  { %v6895_v16 = vld [vmem:[#allocation16 + $0x568] ss:$16 sps:$4 sm:$0xff]   ;;  %v6900_v53 = vld [vmem:[#allocation16 + $0x34c] ss:$16 sps:$4 sm:$0xff]  }
 0x3f8   :  { %5017 = vmatprep.mubr.bf16.mxu0 %v7769_v54  ;;  %5059 = vmatmul.mubr.bf16.vlgmr.msra.gmra.mxu1 %v7693_v62  ;;  %v6843_v62 = vld [vmem:[#allocation16 + $0x48c] ss:$16 sps:$4 sm:$0xff]   ;;  %v6892_v51 = vld [vmem:[#allocation16 + $0x368] ss:$16 sps:$4 sm:$0xff]  }
 0x3f9   :  { %5018 = vmatmul.mubr.bf16.vlgmr.msra.gmra.mxu0 %v7771_v56  ;;  %5109 = vmatpush1.bf16.msra.mxu1 %v6823_v20  ;;  %v6901_v20 = vld [vmem:[#allocation16 + $0x548] ss:$16 sps:$4 sm:$0xff]  }
 0x3fa   :  { %5068 = vmatpush1.bf16.msra.mxu0 %v6820_v55  ;;  %5140 = vmatprep.mubr.bf16.mxu1 %v7740_v2  ;;  %v6849_v2 = vld [vmem:[#allocation16 + $0x46c] ss:$16 sps:$4 sm:$0xff]   ;;  %v6898_v55 = vld [vmem:[#allocation16 + $0x348] ss:$16 sps:$4 sm:$0xff]  }
 0x3fb   :  { %5099 = vmatprep.mubr.bf16.mxu0 %v7714_v24  ;;  %5069 = vmatprep.subr.bf16.mxu0 %v6828_v57  ;;  %v6847_v24 = vld [vmem:[#allocation16 + $0x468] ss:$16 sps:$4 sm:$0xff]   ;;  %v6909_v57 = vld [vmem:[#allocation16 + $0x52c] ss:$16 sps:$4 sm:$0xff]  }
 0x3fc   :  { %5110 = vmatprep.subr.bf16.mxu1 %v6831_v28  ;;  %v6906_v28 = vld [vmem:[#allocation16 + $0x32c] ss:$16 sps:$4 sm:$0xff]  }
 0x3fd   :  { %5111 = vmatpush1.bf16.msra.mxu1 %v6829_v18  ;;  %v6907_v18 = vld [vmem:[#allocation16 + $0x528] ss:$16 sps:$4 sm:$0xff]  }
 0x3fe   :  { %5070 = vmatpush1.bf16.msra.mxu0 %v6826_v21  ;;  %5112 = vmatprep.subr.bf16.mxu1 %v6837_v49  ;;  %v6904_v21 = vld [vmem:[#allocation16 + $0x328] ss:$16 sps:$4 sm:$0xff]   ;;  %v6915_v49 = vld [vmem:[#allocation16 + $0x50c] ss:$16 sps:$4 sm:$0xff]  }
 0x3ff   :  { %5071 = vmatprep.subr.bf16.mxu0 %v6834_v7  ;;  %v6912_v7 = vld [vmem:[#allocation16 + $0x30c] ss:$16 sps:$4 sm:$0xff]  }
 0x401   :  { %5113 = vmatpush1.bf16.msra.mxu1 %v6835_v61  ;;  %v6913_v61 = vld [vmem:[#allocation16 + $0x508] ss:$16 sps:$4 sm:$0xff]  }
 0x402   :  { %5072 = vmatpush1.bf16.msra.mxu0 %v6832_v26  ;;  %5114 = vmatprep.subr.bf16.mxu1 %v6843_v62  ;;  %v6910_v26 = vld [vmem:[#allocation16 + $0x308] ss:$16 sps:$4 sm:$0xff]  }
 0x403   :  { %5073 = vmatprep.subr.bf16.mxu0 %v6840_v35  ;;  %v6966_v62 = vld [vmem:[#allocation19 + $0x74] ss:$8 sps:$4 sm:$0xff]   ;;  %v6918_v35 = vld [vmem:[#allocation16 + $0x6ec] ss:$16 sps:$4 sm:$0xff]  }
 0x405   :  { %5115 = vmatpush1.bf16.msra.mxu1 %v6841_v43  ;;  %v6964_v43 = vld [vmem:[#allocation19 + $0x70] ss:$8 sps:$4 sm:$0xff]  }
 0x406   :  { %5074 = vmatpush1.bf16.msra.mxu0 %v6838_v44  ;;  %5116 = vmatprep.subr.bf16.mxu1 %v6849_v2  ;;  %v6916_v44 = vld [vmem:[#allocation16 + $0x6e8] ss:$16 sps:$4 sm:$0xff]  }
 0x407   :  { %5075 = vmatprep.subr.bf16.mxu0 %v6846_v3  ;;  %v6921_v3 = vld [vmem:[#allocation16 + $0x6cc] ss:$16 sps:$4 sm:$0xff]  }
 0x409   :  { %5117 = vmatpush1.bf16.msra.mxu1 %v6847_v24  ;;  %v6969_v24 = vld [vmem:[#allocation19 + $0x64] ss:$8 sps:$4 sm:$0xff]  }
 0x40a   :  { %5076 = vmatpush1.bf16.msra.mxu0 %v6844_v0  ;;  %5118 = vmatprep.subr.bf16.mxu1 %v6855_v39 }
 0x40b   :  { %5077 = vmatprep.subr.bf16.mxu0 %v6852_v58  ;;  %v6967_v58 = vld [vmem:[#allocation19 + $0x60] ss:$8 sps:$4 sm:$0xff]  }
 0x40d   :  { %v7778_v11 = vpop.f32.mrf.mxu1  ;;  %5119 = vmatpush1.bf16.msra.mxu1 %v6853_v8 }
 0x40e   :  { %5078 = vmatpush1.bf16.msra.mxu0 %v6850_v34  ;;  %5120 = vmatprep.subr.bf16.mxu1 %v6861_v12  ;;  %v6919_v34 = vld [vmem:[#allocation16 + $0x6c8] ss:$16 sps:$4 sm:$0xff]  }
 0x40f   :  { %v7780_v42 = vpop.f32.mrf.mxu1  ;;  %5079 = vmatprep.subr.bf16.mxu0 %v6858_v9  ;;  %v6972_v12 = vld [vmem:[#allocation19 + $0x54] ss:$8 sps:$4 sm:$0xff]  }
 0x411   :  { %v4900_v10 = vpop.f32.mrf.mxu1  ;;  %5121 = vmatpush1.bf16.msra.mxu1 %v6859_v1  ;;  %v6924_v1 = vld [vmem:[#allocation16 + $0x6ac] ss:$16 sps:$4 sm:$0xff]  }
 0x412   :  { %5080 = vmatpush1.bf16.msra.mxu0 %v6856_v5  ;;  %5122 = vmatprep.subr.bf16.mxu1 %v6867_v59  ;;  %v6975_v5 = vld [vmem:[#allocation19 + $0x44] ss:$8 sps:$4 sm:$0xff]   ;;  %v6927_v59 = vld [vmem:[#allocation16 + $0x68c] ss:$16 sps:$4 sm:$0xff]  }
 0x413   :  { %v4901_v25 = vpop.f32.mrf.mxu1  ;;  %5081 = vmatprep.subr.bf16.mxu0 %v6864_v6  ;;  %v6978_v6 = vld [vmem:[#allocation19 + $0x34] ss:$8 sps:$4 sm:$0xff]   ;;  %v6930_v10 = vld [vmem:[#allocation16 + $0x66c] ss:$16 sps:$4 sm:$0xff]  }
 0x414   :  { %v6928_v25 = vld [vmem:[#allocation16 + $0x668] ss:$16 sps:$4 sm:$0xff]  }
 0x415   :  { %5123 = vmatpush1.bf16.msra.mxu1 %v6865_v22  ;;  %v6976_v22 = vld [vmem:[#allocation19 + $0x30] ss:$8 sps:$4 sm:$0xff]  }
 0x416   :  { %5082 = vmatpush1.bf16.msra.mxu0 %v6862_v14  ;;  %5124 = vmatprep.subr.bf16.mxu1 %v6873_v37  ;;  %v6981_v14 = vld [vmem:[#allocation19 + $0x24] ss:$8 sps:$4 sm:$0xff]   ;;  %v6933_v37 = vld [vmem:[#allocation16 + $0x64c] ss:$16 sps:$4 sm:$0xff]  }
 0x417   :  { %5083 = vmatprep.subr.bf16.mxu0 %v6870_v63  ;;  %v6979_v63 = vld [vmem:[#allocation19 + $0x20] ss:$8 sps:$4 sm:$0xff]  }
 0x419   :  { %5125 = vmatpush2.bf16.msra.mxu1 %v6871_v23  ;;  %v6931_v23 = vld [vmem:[#allocation16 + $0x648] ss:$16 sps:$4 sm:$0xff]  }
 0x41a   :  { %5084 = vmatpush2.bf16.msra.mxu0 %v6868_v36  ;;  %5126 = vmatprep.subr.bf16.mxu1 %v6879_v38  ;;  %v6984_v36 = vld [vmem:[#allocation19 + $0x14] ss:$8 sps:$4 sm:$0xff]   ;;  %v6936_v38 = vld [vmem:[#allocation16 + $0x62c] ss:$16 sps:$4 sm:$0xff]  }
 0x41b   :  { %5085 = vmatprep.subr.bf16.mxu0 %v6876_v13  ;;  %v6982_v13 = vld [vmem:[#allocation19 + $0x10] ss:$8 sps:$4 sm:$0xff]  }
 0x41d   :  { %5127 = vmatpush2.bf16.msra.mxu1 %v6877_v31  ;;  %v6934_v31 = vld [vmem:[#allocation16 + $0x628] ss:$16 sps:$4 sm:$0xff]  }
 0x41e   :  { %5086 = vmatpush2.bf16.msra.mxu0 %v6874_v19  ;;  %5128 = vmatprep.subr.bf16.mxu1 %v6885_v40  ;;  %v6987_v19 = vld [vmem:[#allocation19 + $0x4] ss:$8 sps:$4 sm:$0xff]   ;;  %v6939_v40 = vld [vmem:[#allocation16 + $0x60c] ss:$16 sps:$4 sm:$0xff]  }
 0x41f   :  { %5087 = vmatprep.subr.bf16.mxu0 %v6882_v41  ;;  %v6985_v41 = vld [vmem:[#allocation19] ss:$8 sps:$4 sm:$0xff]  }
 0x421   :  { %5129 = vmatpush2.bf16.msra.mxu1 %v6883_v4  ;;  %v6937_v4 = vld [vmem:[#allocation16 + $0x608] ss:$16 sps:$4 sm:$0xff]  }
 0x422   :  { %5088 = vmatpush2.bf16.msra.mxu0 %v6880_v45  ;;  %5130 = vmatprep.subr.bf16.mxu1 %v6891_v27  ;;  %v6990_v45 = vld [vmem:[#allocation19 + $0xf4] ss:$8 sps:$4 sm:$0xff]   ;;  %v6942_v27 = vld [vmem:[#allocation16 + $0x7ec] ss:$16 sps:$4 sm:$0xff]  }
 0x423   :  { %5089 = vmatprep.subr.bf16.mxu0 %v6888_v46  ;;  %v6988_v46 = vld [vmem:[#allocation19 + $0xf0] ss:$8 sps:$4 sm:$0xff]  }
 0x425   :  { %5131 = vmatpush2.bf16.msra.mxu1 %v6889_v47  ;;  %v6940_v47 = vld [vmem:[#allocation16 + $0x7e8] ss:$16 sps:$4 sm:$0xff]  }
 0x426   :  { %5090 = vmatpush2.bf16.msra.mxu0 %v6886_v48  ;;  %5132 = vmatprep.subr.bf16.mxu1 %v6897_v50  ;;  %v6993_v48 = vld [vmem:[#allocation19 + $0xe4] ss:$8 sps:$4 sm:$0xff]   ;;  %v6945_v50 = vld [vmem:[#allocation16 + $0x7cc] ss:$16 sps:$4 sm:$0xff]  }
 0x427   :  { %5091 = vmatprep.subr.bf16.mxu0 %v6894_v60  ;;  %v6991_v60 = vld [vmem:[#allocation19 + $0xe0] ss:$8 sps:$4 sm:$0xff]  }
 0x429   :  { %5133 = vmatpush2.bf16.msra.mxu1 %v6895_v16  ;;  %v6943_v16 = vld [vmem:[#allocation16 + $0x7c8] ss:$16 sps:$4 sm:$0xff]  }
 0x42a   :  { %5092 = vmatpush2.bf16.msra.mxu0 %v6892_v51  ;;  %5134 = vmatprep.subr.bf16.mxu1 %v6903_v52  ;;  %v6996_v51 = vld [vmem:[#allocation19 + $0xd4] ss:$8 sps:$4 sm:$0xff]   ;;  %v6948_v52 = vld [vmem:[#allocation16 + $0x7ac] ss:$16 sps:$4 sm:$0xff]  }
 0x42b   :  { %5093 = vmatprep.subr.bf16.mxu0 %v6900_v53  ;;  %v6994_v53 = vld [vmem:[#allocation19 + $0xd0] ss:$8 sps:$4 sm:$0xff]  }
 0x42d   :  { %5135 = vmatpush2.bf16.msra.mxu1 %v6901_v20  ;;  %v6946_v20 = vld [vmem:[#allocation16 + $0x7a8] ss:$16 sps:$4 sm:$0xff]  }
 0x42e   :  { %5094 = vmatpush2.bf16.msra.mxu0 %v6898_v55  ;;  %5136 = vmatprep.subr.bf16.mxu1 %v6909_v57  ;;  %v6999_v55 = vld [vmem:[#allocation19 + $0xc4] ss:$8 sps:$4 sm:$0xff]   ;;  %v6951_v57 = vld [vmem:[#allocation16 + $0x78c] ss:$16 sps:$4 sm:$0xff]  }
 0x42f   :  { %5095 = vmatprep.subr.bf16.mxu0 %v6906_v28  ;;  %v6997_v28 = vld [vmem:[#allocation19 + $0xc0] ss:$8 sps:$4 sm:$0xff]  }
 0x431   :  { %5137 = vmatpush2.bf16.msra.mxu1 %v6907_v18  ;;  %v6949_v18 = vld [vmem:[#allocation16 + $0x788] ss:$16 sps:$4 sm:$0xff]  }
 0x432   :  { %5096 = vmatpush2.bf16.msra.mxu0 %v6904_v21  ;;  %5138 = vmatprep.subr.bf16.mxu1 %v6915_v49  ;;  %v7002_v21 = vld [vmem:[#allocation19 + $0xb4] ss:$8 sps:$4 sm:$0xff]   ;;  %v6954_v49 = vld [vmem:[#allocation16 + $0x76c] ss:$16 sps:$4 sm:$0xff]  }
 0x433   :  { %5097 = vmatprep.subr.bf16.mxu0 %v6912_v7  ;;  %v7000_v7 = vld [vmem:[#allocation19 + $0xb0] ss:$8 sps:$4 sm:$0xff]  }
 0x435   :  { %5139 = vmatpush2.bf16.msra.mxu1 %v6913_v61  ;;  %v6952_v61 = vld [vmem:[#allocation16 + $0x768] ss:$16 sps:$4 sm:$0xff]  }
 0x436   :  { %5098 = vmatpush2.bf16.msra.mxu0 %v6910_v26  ;;  %5634 = vmatprep.subr.bf16.mxu1 %v6966_v62  ;;  %v7005_v26 = vld [vmem:[#allocation19 + $0xa4] ss:$8 sps:$4 sm:$0xff]   ;;  %v6957_v62 = vld [vmem:[#allocation16 + $0x74c] ss:$16 sps:$4 sm:$0xff]  }
 0x437   :  { %5149 = vmatprep.subr.bf16.mxu0 %v6918_v35  ;;  %v4937_v2 = vpop.f32.mrf.mxu0  ;;  %v7003_v35 = vld [vmem:[#allocation19 + $0xa0] ss:$8 sps:$4 sm:$0xff]  }
 0x438   :  { %5141 = vmatmul.mubr.bf16.vlgmr.msra.gmra.mxu1 %v7742_v32  ;;  %v7784_v0 = vadd.f32 %v4937_v2, %v7778_v11  ;;  %v6970_v11 = vld [vmem:[#allocation19 + $0x50] ss:$8 sps:$4 sm:$0xff]  }
 0x439   :  { %5100 = vmatmul.mubr.bf16.vlgmr.msra.gmra.mxu0 %v7716_v33  ;;  %v4939_v39 = vpop.f32.mrf.mxu0  ;;  %5635 = vmatpush1.bf16.msra.mxu1 %v6964_v43  ;;  %v6922_v33 = vld [vmem:[#allocation16 + $0x6a8] ss:$16 sps:$4 sm:$0xff]   ;;  %v6960_v2 = vld [vmem:[#allocation16 + $0x72c] ss:$16 sps:$4 sm:$0xff]  }
 0x43a   :  { %5150 = vmatpush1.bf16.msra.mxu0 %v6916_v44  ;;  %5181 = vmatprep.mubr.bf16.mxu0 %v7769_v54  ;;  %v7789_v8 = vadd.f32 %v4939_v39, %v7780_v42  ;;  %v6973_v54 = vld [vmem:[#allocation19 + $0x40] ss:$8 sps:$4 sm:$0xff]   ;;  %v6925_v42 = vld [vmem:[#allocation16 + $0x688] ss:$16 sps:$4 sm:$0xff]  }
 0x43b   :  { %5151 = vmatprep.subr.bf16.mxu0 %v6921_v3  ;;  %v4941_v9 = vpop.f32.mrf.mxu0  ;;  %5636 = vmatprep.subr.bf16.mxu1 %v6969_v24  ;;  %v6955_v43 = vld [vmem:[#allocation16 + $0x748] ss:$16 sps:$4 sm:$0xff]   ;;  %v7006_v3 = vld [vmem:[#allocation19 + $0x90] ss:$8 sps:$4 sm:$0xff]  }
 0x43c   :  { %v7008_v44 = vld [vmem:[#allocation19 + $0x94] ss:$8 sps:$4 sm:$0xff]   ;;  %v7011_v39 = vld [vmem:[#allocation19 + $0x84] ss:$8 sps:$4 sm:$0xff]  }
 0x43d   :  { %v4942_v32 = vpop.f32.mrf.mxu0  ;;  %5637 = vmatpush1.bf16.msra.mxu1 %v6967_v58  ;;  %v6958_v24 = vld [vmem:[#allocation16 + $0x728] ss:$16 sps:$4 sm:$0xff]   ;;  %v6963_v58 = vld [vmem:[#allocation16 + $0x70c] ss:$16 sps:$4 sm:$0xff]  }
 0x43e   :  { %5152 = vmatpush1.bf16.msra.mxu0 %v6919_v34  ;;  %5638 = vmatprep.subr.bf16.mxu1 %v6972_v12  ;;  %v7009_v34 = vld [vmem:[#allocation19 + $0x80] ss:$8 sps:$4 sm:$0xff]   ;;  %v6961_v12 = vld [vmem:[#allocation16 + $0x708] ss:$16 sps:$4 sm:$0xff]  }
 0x43f   :  { %5153 = vmatprep.subr.bf16.mxu0 %v6924_v1 }
 0x441   :  { %5639 = vmatpush1.bf16.msra.mxu1 %v6970_v11 }
 0x442   :  { %5154 = vmatpush1.bf16.msra.mxu0 %v6922_v33  ;;  %5640 = vmatprep.subr.bf16.mxu1 %v6975_v5  ;;  %v7012_v5 = vld [vmem:[#allocation19 + $0x170] ss:$8 sps:$4 sm:$0xff]  }
 0x443   :  { %5155 = vmatprep.subr.bf16.mxu0 %v6927_v59  ;;  %v7014_v59 = vld [vmem:[#allocation19 + $0x174] ss:$8 sps:$4 sm:$0xff]  }
 0x445   :  { %5641 = vmatpush1.bf16.msra.mxu1 %v6973_v54  ;;  %v7017_v54 = vld [vmem:[#allocation19 + $0x164] ss:$8 sps:$4 sm:$0xff]  }
 0x446   :  { %5156 = vmatpush1.bf16.msra.mxu0 %v6925_v42  ;;  %5642 = vmatprep.subr.bf16.mxu1 %v6978_v6  ;;  %v7015_v42 = vld [vmem:[#allocation19 + $0x160] ss:$8 sps:$4 sm:$0xff]   ;;  %v7020_v6 = vld [vmem:[#allocation19 + $0x154] ss:$8 sps:$4 sm:$0xff]  }
 0x447   :  { %5157 = vmatprep.subr.bf16.mxu0 %v6930_v10  ;;  %v7018_v10 = vld [vmem:[#allocation19 + $0x150] ss:$8 sps:$4 sm:$0xff]  }
 0x449   :  { %5643 = vmatpush1.bf16.msra.mxu1 %v6976_v22  ;;  %v7023_v22 = vld [vmem:[#allocation19 + $0x144] ss:$8 sps:$4 sm:$0xff]  }
 0x44a   :  { %5158 = vmatpush1.bf16.msra.mxu0 %v6928_v25  ;;  %5644 = vmatprep.subr.bf16.mxu1 %v6981_v14  ;;  %v7024_v25 = vld [vmem:[#allocation19 + $0x130] ss:$8 sps:$4 sm:$0xff]   ;;  %v7029_v14 = vld [vmem:[#allocation19 + $0x124] ss:$8 sps:$4 sm:$0xff]  }
 0x44b   :  { %5159 = vmatprep.subr.bf16.mxu0 %v6933_v37  ;;  %v7027_v37 = vld [vmem:[#allocation19 + $0x120] ss:$8 sps:$4 sm:$0xff]  }
 0x44d   :  { %5645 = vmatpush1.bf16.msra.mxu1 %v6979_v63  ;;  %v7032_v63 = vld [vmem:[#allocation19 + $0x114] ss:$8 sps:$4 sm:$0xff]  }
 0x44e   :  { %5160 = vmatpush1.bf16.msra.mxu0 %v6931_v23  ;;  %5646 = vmatprep.subr.bf16.mxu1 %v6984_v36  ;;  %v7030_v23 = vld [vmem:[#allocation19 + $0x110] ss:$8 sps:$4 sm:$0xff]   ;;  %v7035_v36 = vld [vmem:[#allocation19 + $0x104] ss:$8 sps:$4 sm:$0xff]  }
 0x44f   :  { %5161 = vmatprep.subr.bf16.mxu0 %v6936_v38  ;;  %v7033_v38 = vld [vmem:[#allocation19 + $0x100] ss:$8 sps:$4 sm:$0xff]  }
 0x451   :  { %5647 = vmatpush1.bf16.msra.mxu1 %v6982_v13  ;;  %v7038_v13 = vld [vmem:[#allocation19 + $0x1f4] ss:$8 sps:$4 sm:$0xff]  }
 0x452   :  { %5162 = vmatpush1.bf16.msra.mxu0 %v6934_v31  ;;  %5648 = vmatprep.subr.bf16.mxu1 %v6987_v19  ;;  %v7036_v31 = vld [vmem:[#allocation19 + $0x1f0] ss:$8 sps:$4 sm:$0xff]   ;;  %v7041_v19 = vld [vmem:[#allocation19 + $0x1e4] ss:$8 sps:$4 sm:$0xff]  }
 0x453   :  { %5163 = vmatprep.subr.bf16.mxu0 %v6939_v40  ;;  %v7039_v40 = vld [vmem:[#allocation19 + $0x1e0] ss:$8 sps:$4 sm:$0xff]  }
 0x455   :  { %5649 = vmatpush1.bf16.msra.mxu1 %v6985_v41  ;;  %v7044_v41 = vld [vmem:[#allocation19 + $0x1d4] ss:$8 sps:$4 sm:$0xff]  }
 0x456   :  { %5164 = vmatpush1.bf16.msra.mxu0 %v6937_v4  ;;  %5650 = vmatprep.subr.bf16.mxu1 %v6990_v45  ;;  %v7042_v4 = vld [vmem:[#allocation19 + $0x1d0] ss:$8 sps:$4 sm:$0xff]   ;;  %v7047_v45 = vld [vmem:[#allocation19 + $0x1c4] ss:$8 sps:$4 sm:$0xff]  }
 0x457   :  { %5165 = vmatprep.subr.bf16.mxu0 %v6942_v27  ;;  %v7045_v27 = vld [vmem:[#allocation19 + $0x1c0] ss:$8 sps:$4 sm:$0xff]  }
 0x459   :  { %5651 = vmatpush2.bf16.msra.mxu1 %v6988_v46  ;;  %v7050_v46 = vld [vmem:[#allocation19 + $0x1b4] ss:$8 sps:$4 sm:$0xff]  }
 0x45a   :  { %5166 = vmatpush2.bf16.msra.mxu0 %v6940_v47  ;;  %5652 = vmatprep.subr.bf16.mxu1 %v6993_v48  ;;  %v7048_v47 = vld [vmem:[#allocation19 + $0x1b0] ss:$8 sps:$4 sm:$0xff]   ;;  %v7798_v48 = vld [vmem:[%s7844_s11] sm:$0xf] }
 0x45b   :  { %5167 = vmatprep.subr.bf16.mxu0 %v6945_v50  ;;  %v7800_v50 = vld [vmem:[#allocation17] sm:$0xf] }
 0x45d   :  { %5653 = vmatpush2.bf16.msra.mxu1 %v6991_v60 }
 0x45e   :  { %5168 = vmatpush2.bf16.msra.mxu0 %v6943_v16  ;;  %5654 = vmatprep.subr.bf16.mxu1 %v6996_v51  ;;  %v5195_v16 = vrot.slane %v7798_v48, %v7485_v30 }
 0x45f   :  { %5169 = vmatprep.subr.bf16.mxu0 %v6948_v52  ;;  %v7053_v52 = vld [vmem:[#allocation19 + $0x1a4] ss:$8 sps:$4 sm:$0xff]  }
 0x461   :  { %5655 = vmatpush2.bf16.msra.mxu1 %v6994_v53 }
 0x462   :  { %5170 = vmatpush2.bf16.msra.mxu0 %v6946_v20  ;;  %5656 = vmatprep.subr.bf16.mxu1 %v6999_v55  ;;  %v5221_v55 = vrot.slane %v7800_v50, %v7485_v30 }
 0x463   :  { %5171 = vmatprep.subr.bf16.mxu0 %v6951_v57 }
 0x465   :  { %5657 = vmatpush2.bf16.msra.mxu1 %v6997_v28  ;;  %v5199_v28 = vrot.slane %v7798_v48, %v7482_v29 }
 0x466   :  { %5172 = vmatpush2.bf16.msra.mxu0 %v6949_v18  ;;  %5658 = vmatprep.subr.bf16.mxu1 %v7002_v21  ;;  %v7051_v18 = vld [vmem:[#allocation19 + $0x1a0] ss:$8 sps:$4 sm:$0xff]  }
 0x467   :  { %5173 = vmatprep.subr.bf16.mxu0 %v6954_v49 }
 0x469   :  { %5659 = vmatpush2.bf16.msra.mxu1 %v7000_v7 }
 0x46a   :  { %5174 = vmatpush2.bf16.msra.mxu0 %v6952_v61  ;;  %5660 = vmatprep.subr.bf16.mxu1 %v7005_v26  ;;  %v5225_v61 = vrot.slane %v7800_v50, %v7482_v29 }
 0x46b   :  { %5175 = vmatprep.subr.bf16.mxu0 %v6957_v62  ;;  %v7056_v62 = vld [vmem:[#allocation19 + $0x194] ss:$8 sps:$4 sm:$0xff]  }
 0x46d   :  { %5661 = vmatpush2.bf16.msra.mxu1 %v7003_v35 }
 0x46e   :  { %5176 = vmatpush2.bf16.msra.mxu0 %v6955_v43  ;;  %5662 = vmatprep.subr.bf16.mxu1 %v7008_v44 }
 0x46f   :  { %5177 = vmatprep.subr.bf16.mxu0 %v6960_v2  ;;  %v7054_v2 = vld [vmem:[#allocation19 + $0x190] ss:$8 sps:$4 sm:$0xff]  }
 0x471   :  { %5663 = vmatpush2.bf16.msra.mxu1 %v7006_v3 }
 0x472   :  { %5178 = vmatpush2.bf16.msra.mxu0 %v6958_v24  ;;  %5664 = vmatprep.subr.bf16.mxu1 %v7011_v39 }
 0x473   :  { %5179 = vmatprep.subr.bf16.mxu0 %v6963_v58  ;;  %v7059_v58 = vld [vmem:[#allocation19 + $0x184] ss:$8 sps:$4 sm:$0xff]  }
 0x475   :  { %5665 = vmatpush2.bf16.msra.mxu1 %v7009_v34 }
 0x476   :  { %5180 = vmatpush2.bf16.msra.mxu0 %v6961_v12  ;;  %v7057_v12 = vld [vmem:[#allocation19 + $0x180] ss:$8 sps:$4 sm:$0xff]  }
 0x477   :  { %5675 = vmatprep.subr.bf16.mxu0 %v7014_v59 }
 0x478   :  { %v4978_v9 = vpop.f32.mrf.mxu1 }
 0x479   :  { %5182 = vmatmul.mubr.bf16.vlgmr.msra.gmra.mxu0 %v7771_v56  ;;  %v7793_v1 = vadd.f32 %v4978_v9, %v7784_v0  ;;  %v7021_v56 = vld [vmem:[#allocation19 + $0x140] ss:$8 sps:$4 sm:$0xff]   ;;  %v7026_v0 = vld [vmem:[#allocation19 + $0x134] ss:$8 sps:$4 sm:$0xff]  }
 0x47a   :  { %v4980_v32 = vpop.f32.mrf.mxu1  ;;  %5676 = vmatpush1.bf16.msra.mxu0 %v7012_v5 }
 0x47b   :  { %5677 = vmatprep.subr.bf16.mxu0 %v7017_v54  ;;  %v4981_v53 = vadd.f32 %v4980_v32, %v7789_v8 }
 0x47c   :  { %v4982_v11 = vpop.f32.mrf.mxu1 }
 0x47e   :  { %v4983_v33 = vpop.f32.mrf.mxu1  ;;  %5678 = vmatpush1.bf16.msra.mxu0 %v7015_v42 }
 0x47f   :  { %5679 = vmatprep.subr.bf16.mxu0 %v7020_v6 }
 0x482   :  { %5680 = vmatpush1.bf16.msra.mxu0 %v7018_v10 }
 0x483   :  { %5681 = vmatprep.subr.bf16.mxu0 %v7023_v22 }
 0x486   :  { %5682 = vmatpush1.bf16.msra.mxu0 %v7021_v56 }
 0x487   :  { %5683 = vmatprep.subr.bf16.mxu0 %v7026_v0  ;;  %v5203_v0 = vrot.slane %v7798_v48, %v7511_v15 }
 0x48a   :  { %5684 = vmatpush1.bf16.msra.mxu0 %v7024_v25 }
 0x48b   :  { %5685 = vmatprep.subr.bf16.mxu0 %v7029_v14 }
 0x48e   :  { %5686 = vmatpush1.bf16.msra.mxu0 %v7027_v37 }
 0x48f   :  { %5687 = vmatprep.subr.bf16.mxu0 %v7032_v63  ;;  %v5229_v63 = vrot.slane %v7800_v50, %v7511_v15 }
 0x492   :  { %5688 = vmatpush1.bf16.msra.mxu0 %v7030_v23  ;;  %v5207_v23 = vrot.slane %v7798_v48, %v7514_v17 }
 0x493   :  { %5689 = vmatprep.subr.bf16.mxu0 %v7035_v36 }
 0x496   :  { %5690 = vmatpush1.bf16.msra.mxu0 %v7033_v38 }
 0x497   :  { %5691 = vmatprep.subr.bf16.mxu0 %v7038_v13 }
 0x49a   :  { %5692 = vmatpush2.bf16.msra.mxu0 %v7036_v31  ;;  %v5233_v31 = vrot.slane %v7800_v50, %v7514_v17  ;;  %v5730_v17 = vld [vmem:[%s7848_s15] sm:$0x3] }
 0x49b   :  { %5693 = vmatprep.subr.bf16.mxu0 %v7041_v19 }
 0x49e   :  { %5694 = vmatpush2.bf16.msra.mxu0 %v7039_v40 }
 0x49f   :  { %5695 = vmatprep.subr.bf16.mxu0 %v7044_v41 }
 0x4a2   :  { %5696 = vmatpush2.bf16.msra.mxu0 %v7042_v4 }
 0x4a3   :  { %5697 = vmatprep.subr.bf16.mxu0 %v7047_v45 }
 0x4a6   :  { %5698 = vmatpush2.bf16.msra.mxu0 %v7045_v27 }
 0x4a7   :  { %5699 = vmatprep.subr.bf16.mxu0 %v7050_v46 }
 0x4aa   :  { %5700 = vmatpush2.bf16.msra.mxu0 %v7048_v47 }
 0x4ab   :  { %5701 = vmatprep.subr.bf16.mxu0 %v7053_v52  ;;  %v5716_v52 = vld [vmem:[%s7847_s14] sm:$0x3]  ;;  %s7336_s14 = smov [#allocation20]  }
 0x4ac   :  { %v5721_v50 = vrot.slane %v5716_v52, %v7485_v30  ;;  %s5764_s15 = sshll.u32 %s7336_s14, 4  ;;  %s5765_s15 = int_to_ptr.vmem [resolvable:$true] %s5764_s15 }
 0x4ad   :  { %s7282_s7 = scalar_lea.vmem %s5765_s15, 64  ;;  %p7287_p0 = scmp.lt.s32.totalorder %s5765_s15, %s5765_s15 }
 0x4ae   :  { %5702 = vmatpush2.bf16.msra.mxu0 %v7051_v18  ;;  %p7283_p13 = scmp.ne.s32.totalorder %s5765_s15, %s7282_s7  ;;  %p7288_p1 = scmp.lt.s32.totalorder %s7282_s7, %s7282_s7 }
 0x4af   :  { %5703 = vmatprep.subr.bf16.mxu0 %v7056_v62 }
 0x4b0   :  { %p7289_p2 = por %p7288_p1, %p7287_p0 }
 0x4b2   :  { %5704 = vmatpush2.bf16.msra.mxu0 %v7054_v2  ;;  %p7290_p3 = pnand %p7289_p2, %p7283_p13 }
 0x4b3   :  { %5705 = vmatprep.subr.bf16.mxu0 %v7059_v58 }
 0x4b6   :  { %5706 = vmatpush2.bf16.msra.mxu0 %v7057_v12 }
 0x4b8   :  { %v5060_v60 = vpop.f32.mrf.mxu1 }
 0x4b9   :  { %v5019_v51 = vpop.f32.mrf.mxu0 }
 0x4ba   :  { %v5020_v20 = vadd.f32 %v5019_v51, %v7793_v1  ;;  %v5062_v57 = vpop.f32.mrf.mxu1 }
 0x4bb   :  { %v5021_v21 = vpop.f32.mrf.mxu0 }
 0x4bc   :  { %v5212_v49 = vmul.f32 %v5195_v16, %v5020_v20  ;;  %v5022_v7 = vadd.f32 %v5021_v21, %v4981_v53  ;;  %v5064_v26 = vpop.f32.mrf.mxu1 }
 0x4bd   :  { %v5023_v8 = vpop.f32.mrf.mxu0 }
 0x4be   :  { %v5238_v35 = vadd.f32 %v5221_v55, %v5212_v49  ;;  %v5213_v43 = vmul.f32 %v5199_v28, %v5022_v7  ;;  %v5065_v44 = vpop.f32.mrf.mxu1  ;;  %v5735_v55 = vrot.slane %v5730_v17, %v7485_v30  ;;  %v5739_v49 = vrot.slane %v5730_v17, %v7482_v29 }
 0x4bf   :  { %v5024_v3 = vpop.f32.mrf.mxu0 }
 0x4c0   :  { %v5239_v24 = vadd.f32 %v5225_v61, %v5213_v43  ;;  %v5242_v39 = vmax.f32 %v5238_v35, 0.0 }
 0x4c2   :  { %v5243_v34 = vmax.f32 %v5239_v24, 0.0  ;;  %v5246_v1 = vpack.c.bf16 %v5242_v39, %v5242_v39 }
 0x4c4   :  { %v5247_v9 = vpack.c.bf16 %v5243_v34, %v5243_v34 }
 0x4c6   :  { %5666 = vmatprep.mubr.bf16.mxu1 %v5247_v9 }
 0x4c7   :  { %5667 = vmatmul.mubr.bf16.vlgmr.msra.gmra.mxu1 %v5246_v1 }
 0x4f8   :  { %v5142_v32 = vpop.f32.mrf.mxu1 }
 0x4f9   :  { %v5101_v11 = vpop.f32.mrf.mxu0 }
 0x4fa   :  { %v5102_v33 = vadd.f32 %v5101_v11, %v5060_v60  ;;  %v5144_v5 = vpop.f32.mrf.mxu1 }
 0x4fb   :  { %v5103_v59 = vpop.f32.mrf.mxu0 }
 0x4fc   :  { %v5143_v54 = vadd.f32 %v5142_v32, %v5102_v33  ;;  %v5146_v42 = vpop.f32.mrf.mxu1  ;;  %v5104_v56 = vadd.f32 %v5103_v59, %v5062_v57  ;;  %v5725_v57 = vrot.slane %v5716_v52, %v7482_v29 }
 0x4fd   :  { %v5105_v6 = vpop.f32.mrf.mxu0 }
 0x4fe   :  { %v5147_v10 = vpop.f32.mrf.mxu1  ;;  %v5145_v14 = vadd.f32 %v5144_v5, %v5104_v56 }
 0x4ff   :  { %v5106_v22 = vpop.f32.mrf.mxu0 }
 0x539   :  { %v5183_v25 = vpop.f32.mrf.mxu0 }
 0x53a   :  { %v5184_v37 = vadd.f32 %v5183_v25, %v5143_v54 }
 0x53b   :  { %v5185_v36 = vpop.f32.mrf.mxu0 }
 0x53c   :  { %v5214_v38 = vmul.f32 %v5203_v0, %v5184_v37  ;;  %v5186_v13 = vadd.f32 %v5185_v36, %v5145_v14 }
 0x53d   :  { %v5187_v19 = vpop.f32.mrf.mxu0 }
 0x53e   :  { %v5240_v40 = vadd.f32 %v5229_v63, %v5214_v38  ;;  %v5215_v41 = vmul.f32 %v5207_v23, %v5186_v13 }
 0x53f   :  { %v5188_v4 = vpop.f32.mrf.mxu0 }
 0x540   :  { %v5241_v45 = vadd.f32 %v5233_v31, %v5215_v41  ;;  %v5244_v27 = vmax.f32 %v5240_v40, 0.0 }
 0x542   :  { %v5245_v46 = vmax.f32 %v5241_v45, 0.0  ;;  %v5248_v60 = vpack.c.bf16 %v5244_v27, %v5244_v27 }
 0x544   :  { %v5249_v47 = vpack.c.bf16 %v5245_v46, %v5245_v46 }
 0x546   :  { %5707 = vmatprep.mubr.bf16.mxu0 %v5249_v47 }
 0x547   :  { %5708 = vmatmul.mubr.bf16.vlgmr.msra.gmra.mxu0 %v5248_v60 }
 0x587   :  { %v5668_v15 = vpop.f32.mrf.mxu1 }
 0x589   :  { %v5670_v16 = vpop.f32.mrf.mxu1 }
 0x58b   :  { %v5672_v48 = vpop.f32.mrf.mxu1 }
 0x58d   :  { %v5673_v51 = vpop.f32.mrf.mxu1 }
 0x607   :  { %v5709_v53 = vpop.f32.mrf.mxu0 }
 0x608   :  { %v5710_v20 = vadd.f32 %v5709_v53, %v5668_v15 }
 0x609   :  { %v5711_v28 = vpop.f32.mrf.mxu0 }
 0x60a   :  { %v5728_v18 = vmul.f32 %v5721_v50, %v5710_v20  ;;  %v5712_v21 = vadd.f32 %v5711_v28, %v5670_v16 }
 0x60b   :  { %v5713_v7 = vpop.f32.mrf.mxu0 }
 0x60c   :  { %v5742_v61 = vadd.f32 %v5735_v55, %v5728_v18  ;;  %v5729_v26 = vmul.f32 %v5725_v57, %v5712_v21 }
 0x60d   :  { %v5714_v8 = vpop.f32.mrf.mxu0 }
 0x60e   :  { %v5743_v62 = vadd.f32 %v5739_v49, %v5729_v26  ;;  %v5744_v35 = vmax.f32 %v5742_v61, 0.0 }
 0x610   :  { %v5745_v43 = vmax.f32 %v5743_v62, 0.0 }
 0x612   :  { %v5748_v44 = vcombine.low %v5744_v35, %v5745_v43 }
 0x614   :  { %6436 = vst.sshfl [vmem:[#allocation20] sm:$0x33 pattern:$0x76325410] %v5748_v44 }
 0x615   :  { %7293 = shalt.err (!%p7290_p3)
}
 0x616   :  { %5767 = dma.vmem_to_hbm [thread:$0]  %s5765_s15, 64, %s7849_s16, [#allocation4]  }
 0x617   :  { %7314 = dma.done.wait [#allocation4], 64  }
 0x618   :  { %7315 = vsyncadd [#allocation4], 4294967232 }
 0x619   :  { %5771 = vsyncpa [#allocation3], 1 }
 0x61a   :  { %5772 = vsyncpa [#allocation6], 1 }
 0x61b   :  { %5773 = vsyncpa [#allocation9], 1 }
 0x61c   :  { %5774 = vsyncpa [#allocation12], 1 }
 0x61d   :  { %5775 = vsyncpa [#allocation15], 1 }
 0x61e   :  { %5776 = vsyncpa [#allocation18], 1 }
 0x61f   :  { %5777 = vsyncpa [#allocation4], 1 }

</bundles_post_ra>
